<compile_context>
chip_gen: v6e
topology: v6e:2x2x1
jax: 0.10.0
libtpu: 0.0.40
codegen_flags: <defaults>
</compile_context>

<pallas_src>
import numpy as np
import jax
import jax.numpy as jnp
from jax.experimental import pallas as pl
from jax.experimental.pallas import tpu as pltpu


# ----------------------- FIR / phase folds (host-side, one-time, numpy) ------

def _setup_filter():
    k = np.array([1.0, 3.0, 3.0, 1.0], dtype=np.float64)
    f = np.outer(k, k)
    return f / f.sum()                                   # (4,4), sums to 1


def _fir_effective():
    # upfirdn2d with up=2 applies gain = up**2 = 4 and flips the filter.
    f = _setup_filter()
    return 4.0 * f[::-1, ::-1]                           # (4,4)


def _phase_fold_conv0(w0):
    """Fold (transposed 3x3 conv, stride 2) + 4x4 FIR into 4 sub-pixel phases.

    WF[p, q*Cin+ci, co]: contribution of x[m+di, n+dj, ci] (q=(di+1)*3+(dj+1))
    to output channel co at output pixel (2m+py, 2n+px) (p=py*2+px).
    w0: [Cout, Cin, 3, 3] raw (un-modulated) weight.
    """
    cout, cin, _, _ = w0.shape
    ff = _fir_effective()
    WF = np.zeros((4, 9, cin, cout), np.float64)
    for py in range(2):
        for px in range(2):
            p = py * 2 + px
            for di in (-1, 0, 1):
                for dj in (-1, 0, 1):
                    q = (di + 1) * 3 + (dj + 1)
                    dy = 2 * di + 3 - py
                    dx = 2 * dj + 3 - px
                    for ky in range(3):
                        for kx in range(3):
                            u, v = dy + ky - 2, dx + kx - 2
                            if 0 <= u < 4 and 0 <= v < 4:
                                WF[p, q] += ff[u, v] * w0[:, :, ky, kx].T
    return WF.reshape(4, 9 * cin, cout).astype(np.float32)


def _phase_fold_skip(ws):
    """Fold the 1x1 skip conv + 4x4 FIR upsample into 4 phases over the same
    3x3 neighbourhood taps used by conv0 (unused taps are zero).
    ws: [Cout, Cin], already scaled by weight_gain."""
    cout, cin = ws.shape
    ff = _fir_effective()
    WS = np.zeros((4, 9, cin, cout), np.float64)
    for py in range(2):
        for px in range(2):
            p = py * 2 + px
            for di in (-1, 0, 1):
                for dj in (-1, 0, 1):
                    dy = 2 * di + 2 - py
                    dx = 2 * dj + 2 - px
                    if 0 <= dy < 4 and 0 <= dx < 4:
                        WS[p, (di + 1) * 3 + (dj + 1)] = ff[dy, dx] * ws.T
    return WS.reshape(4, 9 * cin, cout).astype(np.float32)


def _conv0_A():
    # (36, 9) map from 3x3 conv taps to 6x6 taps over the zero-upsampled input
    # (used by the plain-JAX reference only).
    ff = _fir_effective()
    A = np.zeros((36, 9), np.float64)
    for sp in range(6):
        for tp in range(6):
            for ky in range(3):
                for kx in range(3):
                    u, v = sp + ky - 2, tp + kx - 2
                    if 0 <= u < 4 and 0 <= v < 4:
                        A[sp * 6 + tp, ky * 3 + kx] = ff[u, v]
    return A.astype(np.float32)


# ----------------------------- Pallas kernels --------------------------------

def _const_spec(arr):
    zeros = (0,) * arr.ndim
    return pl.BlockSpec(arr.shape, lambda *args: zeros)


def _make_conv0_skip_kernel(act_gain):
    """conv0 (modulated 3x3, up=2, demod, bias + ReLU + gain) and the skip
    branch (1x1 conv + FIR up, gain folded into the static weight), both
    decomposed into 4 sub-pixel phases over 3x3 patches of the original x.
    Modulation is applied to the patches (per input channel), demodulation to
    the outputs (per output channel)."""
    def kernel(patches_ref, lat_ref, waff_ref, baff_ref, wsq_ref,
               wf_ref, ws_ref, b_ref, h_ref, y_ref):
        # style = affine(latent): [1, L] @ [L, Cin] + [1, Cin]
        s = jnp.dot(lat_ref[0], waff_ref[...],
                    preferred_element_type=jnp.float32) + baff_ref[...]
        # demod coefficients from the modulated 3x3 weight:
        #   d[co] = rsqrt( sum_ci s[ci]^2 * sum_{ky,kx} w0[co,ci,ky,kx]^2 + eps )
        d = jax.lax.rsqrt(jnp.dot(s * s, wsq_ref[...],
                                  preferred_element_type=jnp.float32) + 1e-8)
        srow = jnp.concatenate([s] * 9, axis=1)              # [1, 9*Cin]
        praw = patches_ref[0]                                # [T, 9*Cin] bf16
        mp = (praw * srow).astype(jnp.bfloat16)              # modulated patches
        h_parts = []
        y_parts = []
        for p in range(4):                                   # 4 sub-pixel phases
            conv = jnp.dot(mp, wf_ref[p], preferred_element_type=jnp.float32)
            h_parts.append(jnp.maximum(conv * d + b_ref[...], 0.0) * act_gain)
            y_parts.append(jnp.dot(praw, ws_ref[p],
                                   preferred_element_type=jnp.float32))
        h_ref[0] = jnp.concatenate(h_parts, axis=1).astype(h_ref.dtype)
        y_ref[0] = jnp.concatenate(y_parts, axis=1).astype(y_ref.dtype)
    return kernel


def conv0_skip_call(patches, latent, kp, *, tile):
    B, npix, kcin = patches.shape
    cout = kp['wf0'].shape[-1]
    L = latent.shape[-1]
    grid = (B, npix // tile)
    in_specs = [
        pl.BlockSpec((1, tile, kcin), lambda b, t: (b, t, 0)),
        pl.BlockSpec((1, 1, L), lambda b, t: (b, 0, 0)),
        _const_spec(kp['aff0_w']), _const_spec(kp['aff0_b']),
        _const_spec(kp['wsq0']), _const_spec(kp['wf0']),
        _const_spec(kp['wskip']), _const_spec(kp['b0']),
    ]
    out_specs = (
        pl.BlockSpec((1, tile, 4 * cout), lambda b, t: (b, t, 0)),
        pl.BlockSpec((1, tile, 4 * cout), lambda b, t: (b, t, 0)),
    )
    out_shape = (
        jax.ShapeDtypeStruct((B, npix, 4 * cout), jnp.bfloat16),   # conv0 act
        jax.ShapeDtypeStruct((B, npix, 4 * cout), jnp.float32),    # skip residual
    )
    return pl.pallas_call(
        _make_conv0_skip_kernel(float(np.sqrt(2.0))),
        out_shape=out_shape, grid=grid, in_specs=in_specs, out_specs=out_specs,
        compiler_params=pltpu.CompilerParams(
            dimension_semantics=("parallel", "parallel"),
            vmem_limit_bytes=32 * 1024 * 1024),
    )(patches, latent, kp['aff0_w'], kp['aff0_b'], kp['wsq0'],
      kp['wf0'], kp['wskip'], kp['b0'])


def _make_conv1_kernel(act_gain):
    """conv1 (modulated 3x3, up=1, demod, bias + ReLU + gain) with the skip
    residual added in-kernel."""
    def kernel(patches_ref, lat_ref, waff_ref, baff_ref, wsq_ref,
               w_ref, b_ref, res_ref, out_ref):
        s = jnp.dot(lat_ref[0], waff_ref[...],
                    preferred_element_type=jnp.float32) + baff_ref[...]
        d = jax.lax.rsqrt(jnp.dot(s * s, wsq_ref[...],
                                  preferred_element_type=jnp.float32) + 1e-8)
        srow = jnp.concatenate([s] * 9, axis=1)
        mp = (patches_ref[0] * srow).astype(jnp.bfloat16)
        conv = jnp.dot(mp, w_ref[...], preferred_element_type=jnp.float32)
        conv = jnp.maximum(conv * d + b_ref[...], 0.0) * act_gain
        out_ref[0] = (res_ref[0] + conv).astype(out_ref.dtype)
    return kernel


def conv1_residual_call(patches, latent, residual, kp, *, tile):
    B, npix, kc = patches.shape
    cout = kp['w1'].shape[-1]
    L = latent.shape[-1]
    grid = (B, npix // tile)
    in_specs = [
        pl.BlockSpec((1, tile, kc), lambda b, t: (b, t, 0)),
        pl.BlockSpec((1, 1, L), lambda b, t: (b, 0, 0)),
        _const_spec(kp['aff1_w']), _const_spec(kp['aff1_b']),
        _const_spec(kp['wsq1']), _const_spec(kp['w1']), _const_spec(kp['b1']),
        pl.BlockSpec((1, tile, cout), lambda b, t: (b, t, 0)),
    ]
    return pl.pallas_call(
        _make_conv1_kernel(float(np.sqrt(2.0) * np.sqrt(0.5))),
        out_shape=jax.ShapeDtypeStruct((B, npix, cout), jnp.float32),
        grid=grid, in_specs=in_specs,
        out_specs=pl.BlockSpec((1, tile, cout), lambda b, t: (b, t, 0)),
        compiler_params=pltpu.CompilerParams(
            dimension_semantics=("parallel", "parallel"),
            vmem_limit_bytes=32 * 1024 * 1024),
    )(patches, latent, kp['aff1_w'], kp['aff1_b'], kp['wsq1'],
      kp['w1'], kp['b1'], residual)


# --------------------------------- glue ---------------------------------------

def _extract_patches(xpad, kh, kw, hout, wout):
    cols = [xpad[:, dy:dy + hout, dx:dx + wout, :]
            for dy in range(kh) for dx in range(kw)]
    p = jnp.concatenate(cols, axis=-1)
    return p.reshape(xpad.shape[0], hout * wout, kh * kw * xpad.shape[-1])


def _deinterleave_phases(a, H, W, C):
    # [B, H*W, 4*C] (column = p*C + c, p = py*2 + px)  ->  [B, 2H, 2W, C]
    B = a.shape[0]
    a = a.reshape(B, H, W, 2, 2, C)
    a = jnp.transpose(a, (0, 1, 3, 2, 4, 5))
    return a.reshape(B, 2 * H, 2 * W, C)


def _zero_upsample_nhwc(x):                               # reference path only
    B, H, W, C = x.shape
    up = jnp.zeros((B, 2 * H, 2 * W, C), x.dtype)
    return up.at[:, ::2, ::2, :].set(x)


def _pick_tile(npix, target=512):
    for t in (target, 256, 128, 64, 32, 16, 8):
        if t <= npix and npix % t == 0:
            return t
    return npix


# ------------------------------- parameters -----------------------------------

def init_raw_params(key, cin, cout, app_dim):
    ks = jax.random.split(key, 5)
    return dict(
        w0=jax.random.normal(ks[0], (cout, cin, 3, 3), jnp.float32),
        b0=jnp.zeros((cout,), jnp.float32),
        aff0_w=jax.random.normal(ks[1], (cin, app_dim), jnp.float32),
        aff0_b=jnp.ones((cin,), jnp.float32),                     # bias_init = 1
        w1=jax.random.normal(ks[2], (cout, cout, 3, 3), jnp.float32),
        b1=jnp.zeros((cout,), jnp.float32),
        aff1_w=jax.random.normal(ks[3], (cout, app_dim), jnp.float32),
        aff1_b=jnp.ones((cout,), jnp.float32),
        ws=jax.random.normal(ks[4], (cout, cin), jnp.float32),    # skip 1x1
    )


def prepare_kernel_params(raw):
    w0 = np.asarray(raw['w0'], np.float32)
    w1 = np.asarray(raw['w1'], np.float32)
    ws = np.asarray(raw['ws'], np.float32)
    cout, cin = w0.shape[0], w0.shape[1]
    L0 = raw['aff0_w'].shape[1]
    L1 = raw['aff1_w'].shape[1]
    kp = {}
    # conv0 (up=2): static phase-folded weight (bf16) + demod helper (f32)
    kp['wf0'] = jnp.asarray(_phase_fold_conv0(w0), jnp.bfloat16)          # [4,9Cin,Cout]
    kp['wsq0'] = jnp.asarray(np.sum(w0 ** 2, axis=(2, 3)).T, jnp.float32)  # [Cin,Cout]
    kp['aff0_w'] = jnp.asarray((np.asarray(raw['aff0_w']) / np.sqrt(L0)).T,
                               jnp.float32)                               # [L,Cin]
    kp['aff0_b'] = jnp.asarray(np.asarray(raw['aff0_b'])[None, :], jnp.float32)
    kp['b0'] = jnp.asarray(np.asarray(raw['b0'])[None, :], jnp.float32)
    # skip: weight_gain 1/sqrt(Cin), linear act with gain sqrt(0.5) folded in
    ws_eff = ws * (1.0 / np.sqrt(cin))
    kp['wskip'] = jnp.asarray(_phase_fold_skip(ws_eff) * np.sqrt(0.5), jnp.bfloat16)
    # conv1 (up=1): static weight [9*Cout, Cout] with row t*C + ci
    kp['w1'] = jnp.asarray(np.transpose(w1, (2, 3, 1, 0)).reshape(9 * cout, cout),
                           jnp.bfloat16)
    kp['wsq1'] = jnp.asarray(np.sum(w1 ** 2, axis=(2, 3)).T, jnp.float32)
    kp['aff1_w'] = jnp.asarray((np.asarray(raw['aff1_w']) / np.sqrt(L1)).T,
                               jnp.float32)
    kp['aff1_b'] = jnp.asarray(np.asarray(raw['aff1_b'])[None, :], jnp.float32)
    kp['b1'] = jnp.asarray(np.asarray(raw['b1'])[None, :], jnp.float32)
    return kp


# --------------------------------- forward ------------------------------------

def synthesis_block_forward(kparams, x, latent1, latent2):
    # Configuration: skip=True, use_flow=False, use_noise=False, use_fp16=False.
    del latent1                       # only consumed by the flow layer (unused)
    B, cin, H, W = x.shape
    hout, wout = 2 * H, 2 * W
    cout = kparams['wf0'].shape[-1]

    xn = jnp.transpose(x.astype(jnp.float32), (0, 2, 3, 1)).astype(jnp.bfloat16)
    xpad = jnp.pad(xn, ((0, 0), (1, 1), (1, 1), (0, 0)))
    patches0 = _extract_patches(xpad, 3, 3, H, W)         # [B, H*W, 9*Cin] bf16

    tile0 = _pick_tile(H * W)
    h_ph, y_ph = conv0_skip_call(patches0, latent2[:, 0:1, :], kparams, tile=tile0)
    h0 = _deinterleave_phases(h_ph, H, W, cout)           # [B,2H,2W,Cout] bf16
    y = _deinterleave_phases(y_ph, H, W, cout)            # [B,2H,2W,Cout] f32

    hpad = jnp.pad(h0, ((0, 0), (1, 1), (1, 1), (0, 0)))
    patches1 = _extract_patches(hpad, 3, 3, hout, wout)   # [B, 4HW, 9*Cout] bf16
    yflat = y.reshape(B, hout * wout, cout)

    tile1 = _pick_tile(hout * wout)
    out = conv1_residual_call(patches1, latent2[:, 1:2, :], yflat, kparams,
                              tile=tile1)                 # [B, 4HW, Cout] f32
    out = out.reshape(B, hout, wout, cout).transpose(0, 3, 1, 2)
    flowfield = None                                      # use_flow=False
    return out, flowfield


# ------------------ plain-JAX reference (independent formulation) -------------

def _reference_forward(raw, x, latent2):
    """Dense reference (no phase decomposition): zero-upsampled input, folded
    6x6 taps for conv0, 4x4 FIR taps for the skip, per-sample modulated and
    demodulated weights; all in f32."""
    B, cin, H, W = x.shape
    cout = raw['w0'].shape[0]
    L = raw['aff0_w'].shape[1]
    hout, wout = 2 * H, 2 * W
    xn = jnp.transpose(x.astype(jnp.float32), (0, 2, 3, 1))
    xu = _zero_upsample_nhwc(xn)

    # skip: 1x1 conv + FIR up, gain sqrt(0.5)
    ff = jnp.asarray(_fir_effective(), jnp.float32)
    ws = raw['ws'] * (1.0 / np.sqrt(cin))
    wskip = (ff[:, :, None, None] * ws.T[None, None, :, :]).reshape(16 * cin, cout)
    xps = jnp.pad(xu, ((0, 0), (2, 1), (2, 1), (0, 0)))
    pats = _extract_patches(xps, 4, 4, hout, wout)
    y = jnp.einsum('bpk,ko->bpo', pats, wskip) * np.sqrt(0.5)

    # conv0: modulate/demod 3x3 weight, fold FIR into 6x6, conv on upsampled x
    s0 = latent2[:, 0, :] @ ((raw['aff0_w'] * (1.0 / np.sqrt(L))).T) \
        + raw['aff0_b'][None, :]
    wmod = raw['w0'][None] * s0[:, None, :, None, None]
    d0 = jax.lax.rsqrt(jnp.sum(wmod ** 2, axis=(2, 3, 4)) + 1e-8)
    wdem = wmod * d0[:, :, None, None, None]
    A = jnp.asarray(_conv0_A())
    wdem_t = wdem.reshape(B, cout, cin, 9)
    weff = jnp.einsum('ut,boit->boui', A, wdem_t).reshape(B, cout, 36 * cin)
    xp0 = jnp.pad(xu, ((0, 0), (3, 2), (3, 2), (0, 0)))
    pat0 = _extract_patches(xp0, 6, 6, hout, wout)
    h0 = jnp.einsum('bpk,bok->bpo', pat0, weff)
    h0 = jnp.maximum(h0 + raw['b0'][None, None, :], 0.0) * np.sqrt(2.0)

    # conv1 (up=1), gain sqrt(0.5)
    s1 = latent2[:, 1, :] @ ((raw['aff1_w'] * (1.0 / np.sqrt(L))).T) \
        + raw['aff1_b'][None, :]
    wmod1 = raw['w1'][None] * s1[:, None, :, None, None]
    d1 = jax.lax.rsqrt(jnp.sum(wmod1 ** 2, axis=(2, 3, 4)) + 1e-8)
    wdem1 = wmod1 * d1[:, :, None, None, None]
    w1f = jnp.transpose(wdem1, (0, 1, 3, 4, 2)).reshape(B, cout, 9 * cout)
    h0img = h0.reshape(B, hout, wout, cout)
    hp = jnp.pad(h0img, ((0, 0), (1, 1), (1, 1), (0, 0)))
    pat1 = _extract_patches(hp, 3, 3, hout, wout)
    c1 = jnp.einsum('bpk,bok->bpo', pat1, w1f)
    c1 = jnp.maximum(c1 + raw['b1'][None, None, :], 0.0) * (np.sqrt(2.0) * np.sqrt(0.5))

    out = (y + c1).reshape(B, hout, wout, cout).transpose(0, 3, 1, 2)
    return out


# ---------------------------------- main ---------------------------------------

if __name__ == "__main__":
    B, Cin, Cout, H, W = 2, 4, 8, 16, 16
    APP_DIM, GEO_DIM = 8, 8

    key = jax.random.PRNGKey(0)
    kparam_key, kx, k1, k2 = jax.random.split(key, 4)
    raw = init_raw_params(kparam_key, Cin, Cout, APP_DIM)
    kparams = prepare_kernel_params(raw)

    x = jax.random.normal(kx, (B, Cin, H, W), jnp.float32)
    latent1 = jax.random.normal(k1, (B, 1, GEO_DIM), jnp.float32)   # geo (unused)
    latent2 = jax.random.normal(k2, (B, 2, APP_DIM), jnp.float32)   # app: conv0, conv1

    fwd = jax.jit(synthesis_block_forward)
    out, flow = fwd(kparams, x, latent1, latent2)
    out = jax.block_until_ready(out)

    assert out.shape == (B, Cout, 2 * H, 2 * W) and out.dtype == jnp.float32
    assert flow is None
    assert bool(jnp.all(jnp.isfinite(out)))

    ref = _reference_forward(raw, x, latent2)
    ref = np.asarray(jax.block_until_ready(ref))
    err = float(np.max(np.abs(np.asarray(out) - ref)))
    assert np.allclose(np.asarray(out), ref, atol=5e-2, rtol=5e-2), err

    print("KERNEL_OK")
</pallas_src>

<mosaic_0001>
module attributes {stable_mosaic.version = 11 : i64} {
  func.func @kernel(%arg0: i32, %arg1: i32, %arg2: memref<1x256x36xbf16, #tpu.memory_space<vmem>>, %arg3: memref<1x1x8xf32, #tpu.memory_space<vmem>>, %arg4: memref<8x4xf32, #tpu.memory_space<vmem>>, %arg5: memref<1x4xf32, #tpu.memory_space<vmem>>, %arg6: memref<4x8xf32, #tpu.memory_space<vmem>>, %arg7: memref<4x36x8xbf16, #tpu.memory_space<vmem>>, %arg8: memref<4x36x8xbf16, #tpu.memory_space<vmem>>, %arg9: memref<1x8xf32, #tpu.memory_space<vmem>>, %arg10: memref<1x256x32xbf16, #tpu.memory_space<vmem>>, %arg11: memref<1x256x32xf32, #tpu.memory_space<vmem>>) attributes {dimension_semantics = [#tpu.dimension_semantics<parallel>, #tpu.dimension_semantics<parallel>], iteration_bounds = array<i64: 2, 1>, scalar_prefetch = 0 : i64, scratch_operands = 0 : i64, tpu.core_type = #tpu.core_type<tc>, window_params = [{transform_indices = @transform_0, window_bounds = array<i64: 1, 256, 36>}, {transform_indices = @transform_1, window_bounds = array<i64: 1, 1, 8>}, {pipeline_mode = #tpu.pipeline_mode<synchronous>, transform_indices = @transform_2, window_bounds = array<i64: 8, 4>}, {pipeline_mode = #tpu.pipeline_mode<synchronous>, transform_indices = @transform_3, window_bounds = array<i64: 1, 4>}, {pipeline_mode = #tpu.pipeline_mode<synchronous>, transform_indices = @transform_4, window_bounds = array<i64: 4, 8>}, {pipeline_mode = #tpu.pipeline_mode<synchronous>, transform_indices = @transform_5, window_bounds = array<i64: 4, 36, 8>}, {pipeline_mode = #tpu.pipeline_mode<synchronous>, transform_indices = @transform_6, window_bounds = array<i64: 4, 36, 8>}, {pipeline_mode = #tpu.pipeline_mode<synchronous>, transform_indices = @transform_7, window_bounds = array<i64: 1, 8>}, {transform_indices = @transform_8, window_bounds = array<i64: 1, 256, 32>}, {transform_indices = @transform_9, window_bounds = array<i64: 1, 256, 32>}]} {
    %c0 = arith.constant 0 : index
    %c0_0 = arith.constant 0 : index
    %c0_1 = arith.constant 0 : index
    %0 = vector.load %arg3[%c0, %c0_0, %c0_1] : memref<1x1x8xf32, #tpu.memory_space<vmem>>, vector<1x1x8xf32>
    %1 = vector.shape_cast %0 : vector<1x1x8xf32> to vector<1x8xf32>
    %c0_2 = arith.constant 0 : index
    %c0_3 = arith.constant 0 : index
    %2 = vector.load %arg4[%c0_2, %c0_3] : memref<8x4xf32, #tpu.memory_space<vmem>>, vector<8x4xf32>
    %cst = arith.constant dense<0.000000e+00> : vector<1x4xf32>
    %3 = tpu.matmul %1, %2, %cst {dimension_numbers = #tpu.dot_dimension_numbers<[1], [0], [0], [1], [0, 0, 1, 1], [], []>} : vector<1x8xf32>, vector<8x4xf32>, vector<1x4xf32> -> vector<1x4xf32>
    %c0_4 = arith.constant 0 : index
    %c0_5 = arith.constant 0 : index
    %4 = vector.load %arg5[%c0_4, %c0_5] : memref<1x4xf32, #tpu.memory_space<vmem>>, vector<1x4xf32>
    %5 = arith.addf %3, %4 : vector<1x4xf32>
    %6 = arith.mulf %5, %5 : vector<1x4xf32>
    %c0_6 = arith.constant 0 : index
    %c0_7 = arith.constant 0 : index
    %7 = vector.load %arg6[%c0_6, %c0_7] : memref<4x8xf32, #tpu.memory_space<vmem>>, vector<4x8xf32>
    %cst_8 = arith.constant dense<0.000000e+00> : vector<1x8xf32>
    %8 = tpu.matmul %6, %7, %cst_8 {dimension_numbers = #tpu.dot_dimension_numbers<[1], [0], [0], [1], [0, 0, 1, 1], [], []>} : vector<1x4xf32>, vector<4x8xf32>, vector<1x8xf32> -> vector<1x8xf32>
    %cst_9 = arith.constant 9.99999993E-9 : f32
    %9 = vector.broadcast %cst_9 : f32 to vector<1x8xf32>
    %10 = arith.addf %8, %9 : vector<1x8xf32>
    %11 = math.rsqrt %10 : vector<1x8xf32>
    %12 = tpu.concatenate %5, %5, %5, %5, %5, %5, %5, %5, %5 in 1 : vector<1x4xf32>, vector<1x4xf32>, vector<1x4xf32>, vector<1x4xf32>, vector<1x4xf32>, vector<1x4xf32>, vector<1x4xf32>, vector<1x4xf32>, vector<1x4xf32> -> vector<1x36xf32>
    %c0_10 = arith.constant 0 : index
    %c0_11 = arith.constant 0 : index
    %c0_12 = arith.constant 0 : index
    %13 = vector.load %arg2[%c0_10, %c0_11, %c0_12] : memref<1x256x36xbf16, #tpu.memory_space<vmem>>, vector<1x256x36xbf16>
    %14 = vector.shape_cast %13 : vector<1x256x36xbf16> to vector<256x36xbf16>
    %15 = arith.extf %14 : vector<256x36xbf16> to vector<256x36xf32>
    %16 = vector.broadcast %12 : vector<1x36xf32> to vector<256x36xf32>
    %17 = arith.mulf %15, %16 : vector<256x36xf32>
    %18 = arith.truncf %17 : vector<256x36xf32> to vector<256x36xbf16>
    %c0_13 = arith.constant 0 : index
    %c0_14 = arith.constant 0 : index
    %c0_15 = arith.constant 0 : index
    %19 = vector.load %arg7[%c0_13, %c0_14, %c0_15] : memref<4x36x8xbf16, #tpu.memory_space<vmem>>, vector<1x36x8xbf16>
    %20 = vector.shape_cast %19 : vector<1x36x8xbf16> to vector<36x8xbf16>
    %cst_16 = arith.constant dense<0.000000e+00> : vector<256x8xf32>
    %21 = tpu.matmul %18, %20, %cst_16 {dimension_numbers = #tpu.dot_dimension_numbers<[1], [0], [0], [1], [0, 0, 1, 1], [], []>} : vector<256x36xbf16>, vector<36x8xbf16>, vector<256x8xf32> -> vector<256x8xf32>
    %22 = vector.broadcast %11 : vector<1x8xf32> to vector<256x8xf32>
    %23 = arith.mulf %21, %22 : vector<256x8xf32>
    %c0_17 = arith.constant 0 : index
    %c0_18 = arith.constant 0 : index
    %24 = vector.load %arg9[%c0_17, %c0_18] : memref<1x8xf32, #tpu.memory_space<vmem>>, vector<1x8xf32>
    %25 = vector.broadcast %24 : vector<1x8xf32> to vector<256x8xf32>
    %26 = arith.addf %23, %25 : vector<256x8xf32>
    %cst_19 = arith.constant 0.000000e+00 : f32
    %27 = vector.broadcast %cst_19 : f32 to vector<256x8xf32>
    %28 = arith.maximumf %26, %27 : vector<256x8xf32>
    %cst_20 = arith.constant 1.41421354 : f32
    %29 = vector.broadcast %cst_20 : f32 to vector<256x8xf32>
    %30 = arith.mulf %28, %29 : vector<256x8xf32>
    %c0_21 = arith.constant 0 : index
    %c0_22 = arith.constant 0 : index
    %c0_23 = arith.constant 0 : index
    %31 = vector.load %arg8[%c0_21, %c0_22, %c0_23] : memref<4x36x8xbf16, #tpu.memory_space<vmem>>, vector<1x36x8xbf16>
    %32 = vector.shape_cast %31 : vector<1x36x8xbf16> to vector<36x8xbf16>
    %cst_24 = arith.constant dense<0.000000e+00> : vector<256x8xf32>
    %33 = tpu.matmul %14, %32, %cst_24 {dimension_numbers = #tpu.dot_dimension_numbers<[1], [0], [0], [1], [0, 0, 1, 1], [], []>} : vector<256x36xbf16>, vector<36x8xbf16>, vector<256x8xf32> -> vector<256x8xf32>
    %c1 = arith.constant 1 : index
    %c0_25 = arith.constant 0 : index
    %c0_26 = arith.constant 0 : index
    %34 = vector.load %arg7[%c1, %c0_25, %c0_26] : memref<4x36x8xbf16, #tpu.memory_space<vmem>>, vector<1x36x8xbf16>
    %35 = vector.shape_cast %34 : vector<1x36x8xbf16> to vector<36x8xbf16>
    %cst_27 = arith.constant dense<0.000000e+00> : vector<256x8xf32>
    %36 = tpu.matmul %18, %35, %cst_27 {dimension_numbers = #tpu.dot_dimension_numbers<[1], [0], [0], [1], [0, 0, 1, 1], [], []>} : vector<256x36xbf16>, vector<36x8xbf16>, vector<256x8xf32> -> vector<256x8xf32>
    %37 = vector.broadcast %11 : vector<1x8xf32> to vector<256x8xf32>
    %38 = arith.mulf %36, %37 : vector<256x8xf32>
    %c0_28 = arith.constant 0 : index
    %c0_29 = arith.constant 0 : index
    %39 = vector.load %arg9[%c0_28, %c0_29] : memref<1x8xf32, #tpu.memory_space<vmem>>, vector<1x8xf32>
    %40 = vector.broadcast %39 : vector<1x8xf32> to vector<256x8xf32>
    %41 = arith.addf %38, %40 : vector<256x8xf32>
    %cst_30 = arith.constant 0.000000e+00 : f32
    %42 = vector.broadcast %cst_30 : f32 to vector<256x8xf32>
    %43 = arith.maximumf %41, %42 : vector<256x8xf32>
    %cst_31 = arith.constant 1.41421354 : f32
    %44 = vector.broadcast %cst_31 : f32 to vector<256x8xf32>
    %45 = arith.mulf %43, %44 : vector<256x8xf32>
    %c1_32 = arith.constant 1 : index
    %c0_33 = arith.constant 0 : index
    %c0_34 = arith.constant 0 : index
    %46 = vector.load %arg8[%c1_32, %c0_33, %c0_34] : memref<4x36x8xbf16, #tpu.memory_space<vmem>>, vector<1x36x8xbf16>
    %47 = vector.shape_cast %46 : vector<1x36x8xbf16> to vector<36x8xbf16>
    %cst_35 = arith.constant dense<0.000000e+00> : vector<256x8xf32>
    %48 = tpu.matmul %14, %47, %cst_35 {dimension_numbers = #tpu.dot_dimension_numbers<[1], [0], [0], [1], [0, 0, 1, 1], [], []>} : vector<256x36xbf16>, vector<36x8xbf16>, vector<256x8xf32> -> vector<256x8xf32>
    %c2 = arith.constant 2 : index
    %c0_36 = arith.constant 0 : index
    %c0_37 = arith.constant 0 : index
    %49 = vector.load %arg7[%c2, %c0_36, %c0_37] : memref<4x36x8xbf16, #tpu.memory_space<vmem>>, vector<1x36x8xbf16>
    %50 = vector.shape_cast %49 : vector<1x36x8xbf16> to vector<36x8xbf16>
    %cst_38 = arith.constant dense<0.000000e+00> : vector<256x8xf32>
    %51 = tpu.matmul %18, %50, %cst_38 {dimension_numbers = #tpu.dot_dimension_numbers<[1], [0], [0], [1], [0, 0, 1, 1], [], []>} : vector<256x36xbf16>, vector<36x8xbf16>, vector<256x8xf32> -> vector<256x8xf32>
    %52 = vector.broadcast %11 : vector<1x8xf32> to vector<256x8xf32>
    %53 = arith.mulf %51, %52 : vector<256x8xf32>
    %c0_39 = arith.constant 0 : index
    %c0_40 = arith.constant 0 : index
    %54 = vector.load %arg9[%c0_39, %c0_40] : memref<1x8xf32, #tpu.memory_space<vmem>>, vector<1x8xf32>
    %55 = vector.broadcast %54 : vector<1x8xf32> to vector<256x8xf32>
    %56 = arith.addf %53, %55 : vector<256x8xf32>
    %cst_41 = arith.constant 0.000000e+00 : f32
    %57 = vector.broadcast %cst_41 : f32 to vector<256x8xf32>
    %58 = arith.maximumf %56, %57 : vector<256x8xf32>
    %cst_42 = arith.constant 1.41421354 : f32
    %59 = vector.broadcast %cst_42 : f32 to vector<256x8xf32>
    %60 = arith.mulf %58, %59 : vector<256x8xf32>
    %c2_43 = arith.constant 2 : index
    %c0_44 = arith.constant 0 : index
    %c0_45 = arith.constant 0 : index
    %61 = vector.load %arg8[%c2_43, %c0_44, %c0_45] : memref<4x36x8xbf16, #tpu.memory_space<vmem>>, vector<1x36x8xbf16>
    %62 = vector.shape_cast %61 : vector<1x36x8xbf16> to vector<36x8xbf16>
    %cst_46 = arith.constant dense<0.000000e+00> : vector<256x8xf32>
    %63 = tpu.matmul %14, %62, %cst_46 {dimension_numbers = #tpu.dot_dimension_numbers<[1], [0], [0], [1], [0, 0, 1, 1], [], []>} : vector<256x36xbf16>, vector<36x8xbf16>, vector<256x8xf32> -> vector<256x8xf32>
    %c3 = arith.constant 3 : index
    %c0_47 = arith.constant 0 : index
    %c0_48 = arith.constant 0 : index
    %64 = vector.load %arg7[%c3, %c0_47, %c0_48] : memref<4x36x8xbf16, #tpu.memory_space<vmem>>, vector<1x36x8xbf16>
    %65 = vector.shape_cast %64 : vector<1x36x8xbf16> to vector<36x8xbf16>
    %cst_49 = arith.constant dense<0.000000e+00> : vector<256x8xf32>
    %66 = tpu.matmul %18, %65, %cst_49 {dimension_numbers = #tpu.dot_dimension_numbers<[1], [0], [0], [1], [0, 0, 1, 1], [], []>} : vector<256x36xbf16>, vector<36x8xbf16>, vector<256x8xf32> -> vector<256x8xf32>
    %67 = vector.broadcast %11 : vector<1x8xf32> to vector<256x8xf32>
    %68 = arith.mulf %66, %67 : vector<256x8xf32>
    %c0_50 = arith.constant 0 : index
    %c0_51 = arith.constant 0 : index
    %69 = vector.load %arg9[%c0_50, %c0_51] : memref<1x8xf32, #tpu.memory_space<vmem>>, vector<1x8xf32>
    %70 = vector.broadcast %69 : vector<1x8xf32> to vector<256x8xf32>
    %71 = arith.addf %68, %70 : vector<256x8xf32>
    %cst_52 = arith.constant 0.000000e+00 : f32
    %72 = vector.broadcast %cst_52 : f32 to vector<256x8xf32>
    %73 = arith.maximumf %71, %72 : vector<256x8xf32>
    %cst_53 = arith.constant 1.41421354 : f32
    %74 = vector.broadcast %cst_53 : f32 to vector<256x8xf32>
    %75 = arith.mulf %73, %74 : vector<256x8xf32>
    %c3_54 = arith.constant 3 : index
    %c0_55 = arith.constant 0 : index
    %c0_56 = arith.constant 0 : index
    %76 = vector.load %arg8[%c3_54, %c0_55, %c0_56] : memref<4x36x8xbf16, #tpu.memory_space<vmem>>, vector<1x36x8xbf16>
    %77 = vector.shape_cast %76 : vector<1x36x8xbf16> to vector<36x8xbf16>
    %cst_57 = arith.constant dense<0.000000e+00> : vector<256x8xf32>
    %78 = tpu.matmul %14, %77, %cst_57 {dimension_numbers = #tpu.dot_dimension_numbers<[1], [0], [0], [1], [0, 0, 1, 1], [], []>} : vector<256x36xbf16>, vector<36x8xbf16>, vector<256x8xf32> -> vector<256x8xf32>
    %79 = tpu.concatenate %30, %45, %60, %75 in 1 : vector<256x8xf32>, vector<256x8xf32>, vector<256x8xf32>, vector<256x8xf32> -> vector<256x32xf32>
    %80 = arith.truncf %79 : vector<256x32xf32> to vector<256x32xbf16>
    %c0_58 = arith.constant 0 : index
    %c0_59 = arith.constant 0 : index
    %c0_60 = arith.constant 0 : index
    %81 = vector.load %arg10[%c0_58, %c0_59, %c0_60] : memref<1x256x32xbf16, #tpu.memory_space<vmem>>, vector<1x256x32xbf16>
    %82 = vector.shape_cast %81 : vector<1x256x32xbf16> to vector<256x32xbf16>
    %83 = vector.shape_cast %80 : vector<256x32xbf16> to vector<1x256x32xbf16>
    tpu.vector_store %arg10[%c0_58, %c0_59, %c0_60], %83 {strides = array<i32>} : memref<1x256x32xbf16, #tpu.memory_space<vmem>>, vector<1x256x32xbf16>,
    %84 = tpu.concatenate %33, %48, %63, %78 in 1 : vector<256x8xf32>, vector<256x8xf32>, vector<256x8xf32>, vector<256x8xf32> -> vector<256x32xf32>
    %c0_61 = arith.constant 0 : index
    %c0_62 = arith.constant 0 : index
    %c0_63 = arith.constant 0 : index
    %85 = vector.load %arg11[%c0_61, %c0_62, %c0_63] : memref<1x256x32xf32, #tpu.memory_space<vmem>>, vector<1x256x32xf32>
    %86 = vector.shape_cast %85 : vector<1x256x32xf32> to vector<256x32xf32>
    %87 = vector.shape_cast %84 : vector<256x32xf32> to vector<1x256x32xf32>
    tpu.vector_store %arg11[%c0_61, %c0_62, %c0_63], %87 {strides = array<i32>} : memref<1x256x32xf32, #tpu.memory_space<vmem>>, vector<1x256x32xf32>,
    return
  }
  func.func @transform_0(%arg0: i32, %arg1: i32) -> (i32, i32, i32) {
    %c0_i32 = arith.constant 0 : i32
    %c0_i32_0 = arith.constant 0 : i32
    return %arg0, %arg1, %c0_i32 : i32, i32, i32
  }
  func.func @transform_1(%arg0: i32, %arg1: i32) -> (i32, i32, i32) {
    %c0_i32 = arith.constant 0 : i32
    %c0_i32_0 = arith.constant 0 : i32
    %c0_i32_1 = arith.constant 0 : i32
    return %arg0, %c0_i32, %c0_i32_0 : i32, i32, i32
  }
  func.func @transform_2(%arg0: i32, %arg1: i32) -> (i32, i32) {
    %c0_i32 = arith.constant 0 : i32
    %c0_i32_0 = arith.constant 0 : i32
    %c0_i32_1 = arith.constant 0 : i32
    return %c0_i32, %c0_i32_0 : i32, i32
  }
  func.func @transform_3(%arg0: i32, %arg1: i32) -> (i32, i32) {
    %c0_i32 = arith.constant 0 : i32
    %c0_i32_0 = arith.constant 0 : i32
    %c0_i32_1 = arith.constant 0 : i32
    return %c0_i32, %c0_i32_0 : i32, i32
  }
  func.func @transform_4(%arg0: i32, %arg1: i32) -> (i32, i32) {
    %c0_i32 = arith.constant 0 : i32
    %c0_i32_0 = arith.constant 0 : i32
    %c0_i32_1 = arith.constant 0 : i32
    return %c0_i32, %c0_i32_0 : i32, i32
  }
  func.func @transform_5(%arg0: i32, %arg1: i32) -> (i32, i32, i32) {
    %c0_i32 = arith.constant 0 : i32
    %c0_i32_0 = arith.constant 0 : i32
    %c0_i32_1 = arith.constant 0 : i32
    %c0_i32_2 = arith.constant 0 : i32
    return %c0_i32, %c0_i32_0, %c0_i32_1 : i32, i32, i32
  }
  func.func @transform_6(%arg0: i32, %arg1: i32) -> (i32, i32, i32) {
    %c0_i32 = arith.constant 0 : i32
    %c0_i32_0 = arith.constant 0 : i32
    %c0_i32_1 = arith.constant 0 : i32
    %c0_i32_2 = arith.constant 0 : i32
    return %c0_i32, %c0_i32_0, %c0_i32_1 : i32, i32, i32
  }
  func.func @transform_7(%arg0: i32, %arg1: i32) -> (i32, i32) {
    %c0_i32 = arith.constant 0 : i32
    %c0_i32_0 = arith.constant 0 : i32
    %c0_i32_1 = arith.constant 0 : i32
    return %c0_i32, %c0_i32_0 : i32, i32
  }
  func.func @transform_8(%arg0: i32, %arg1: i32) -> (i32, i32, i32) {
    %c0_i32 = arith.constant 0 : i32
    %c0_i32_0 = arith.constant 0 : i32
    return %arg0, %arg1, %c0_i32 : i32, i32, i32
  }
  func.func @transform_9(%arg0: i32, %arg1: i32) -> (i32, i32, i32) {
    %c0_i32 = arith.constant 0 : i32
    %c0_i32_0 = arith.constant 0 : i32
    return %arg0, %arg1, %c0_i32 : i32, i32, i32
  }
}

module attributes {stable_mosaic.version = 11 : i64} {
  func.func @kernel(%arg0: i32, %arg1: i32, %arg2: memref<1x512x72xbf16, #tpu.memory_space<vmem>>, %arg3: memref<1x1x8xf32, #tpu.memory_space<vmem>>, %arg4: memref<8x8xf32, #tpu.memory_space<vmem>>, %arg5: memref<1x8xf32, #tpu.memory_space<vmem>>, %arg6: memref<8x8xf32, #tpu.memory_space<vmem>>, %arg7: memref<72x8xbf16, #tpu.memory_space<vmem>>, %arg8: memref<1x8xf32, #tpu.memory_space<vmem>>, %arg9: memref<1x512x8xf32, #tpu.memory_space<vmem>>, %arg10: memref<1x512x8xf32, #tpu.memory_space<vmem>>) attributes {dimension_semantics = [#tpu.dimension_semantics<parallel>, #tpu.dimension_semantics<parallel>], iteration_bounds = array<i64: 2, 2>, scalar_prefetch = 0 : i64, scratch_operands = 0 : i64, tpu.core_type = #tpu.core_type<tc>, window_params = [{transform_indices = @transform_0, window_bounds = array<i64: 1, 512, 72>}, {transform_indices = @transform_1, window_bounds = array<i64: 1, 1, 8>}, {pipeline_mode = #tpu.pipeline_mode<synchronous>, transform_indices = @transform_2, window_bounds = array<i64: 8, 8>}, {pipeline_mode = #tpu.pipeline_mode<synchronous>, transform_indices = @transform_3, window_bounds = array<i64: 1, 8>}, {pipeline_mode = #tpu.pipeline_mode<synchronous>, transform_indices = @transform_4, window_bounds = array<i64: 8, 8>}, {pipeline_mode = #tpu.pipeline_mode<synchronous>, transform_indices = @transform_5, window_bounds = array<i64: 72, 8>}, {pipeline_mode = #tpu.pipeline_mode<synchronous>, transform_indices = @transform_6, window_bounds = array<i64: 1, 8>}, {transform_indices = @transform_7, window_bounds = array<i64: 1, 512, 8>}, {transform_indices = @transform_8, window_bounds = array<i64: 1, 512, 8>}]} {
    %c0 = arith.constant 0 : index
    %c0_0 = arith.constant 0 : index
    %c0_1 = arith.constant 0 : index
    %0 = vector.load %arg3[%c0, %c0_0, %c0_1] : memref<1x1x8xf32, #tpu.memory_space<vmem>>, vector<1x1x8xf32>
    %1 = vector.shape_cast %0 : vector<1x1x8xf32> to vector<1x8xf32>
    %c0_2 = arith.constant 0 : index
    %c0_3 = arith.constant 0 : index
    %2 = vector.load %arg4[%c0_2, %c0_3] : memref<8x8xf32, #tpu.memory_space<vmem>>, vector<8x8xf32>
    %cst = arith.constant dense<0.000000e+00> : vector<1x8xf32>
    %3 = tpu.matmul %1, %2, %cst {dimension_numbers = #tpu.dot_dimension_numbers<[1], [0], [0], [1], [0, 0, 1, 1], [], []>} : vector<1x8xf32>, vector<8x8xf32>, vector<1x8xf32> -> vector<1x8xf32>
    %c0_4 = arith.constant 0 : index
    %c0_5 = arith.constant 0 : index
    %4 = vector.load %arg5[%c0_4, %c0_5] : memref<1x8xf32, #tpu.memory_space<vmem>>, vector<1x8xf32>
    %5 = arith.addf %3, %4 : vector<1x8xf32>
    %6 = arith.mulf %5, %5 : vector<1x8xf32>
    %c0_6 = arith.constant 0 : index
    %c0_7 = arith.constant 0 : index
    %7 = vector.load %arg6[%c0_6, %c0_7] : memref<8x8xf32, #tpu.memory_space<vmem>>, vector<8x8xf32>
    %cst_8 = arith.constant dense<0.000000e+00> : vector<1x8xf32>
    %8 = tpu.matmul %6, %7, %cst_8 {dimension_numbers = #tpu.dot_dimension_numbers<[1], [0], [0], [1], [0, 0, 1, 1], [], []>} : vector<1x8xf32>, vector<8x8xf32>, vector<1x8xf32> -> vector<1x8xf32>
    %cst_9 = arith.constant 9.99999993E-9 : f32
    %9 = vector.broadcast %cst_9 : f32 to vector<1x8xf32>
    %10 = arith.addf %8, %9 : vector<1x8xf32>
    %11 = math.rsqrt %10 : vector<1x8xf32>
    %12 = tpu.concatenate %5, %5, %5, %5, %5, %5, %5, %5, %5 in 1 : vector<1x8xf32>, vector<1x8xf32>, vector<1x8xf32>, vector<1x8xf32>, vector<1x8xf32>, vector<1x8xf32>, vector<1x8xf32>, vector<1x8xf32>, vector<1x8xf32> -> vector<1x72xf32>
    %c0_10 = arith.constant 0 : index
    %c0_11 = arith.constant 0 : index
    %c0_12 = arith.constant 0 : index
    %13 = vector.load %arg2[%c0_10, %c0_11, %c0_12] : memref<1x512x72xbf16, #tpu.memory_space<vmem>>, vector<1x512x72xbf16>
    %14 = vector.shape_cast %13 : vector<1x512x72xbf16> to vector<512x72xbf16>
    %15 = arith.extf %14 : vector<512x72xbf16> to vector<512x72xf32>
    %16 = vector.broadcast %12 : vector<1x72xf32> to vector<512x72xf32>
    %17 = arith.mulf %15, %16 : vector<512x72xf32>
    %18 = arith.truncf %17 : vector<512x72xf32> to vector<512x72xbf16>
    %c0_13 = arith.constant 0 : index
    %c0_14 = arith.constant 0 : index
    %19 = vector.load %arg7[%c0_13, %c0_14] : memref<72x8xbf16, #tpu.memory_space<vmem>>, vector<72x8xbf16>
    %cst_15 = arith.constant dense<0.000000e+00> : vector<512x8xf32>
    %20 = tpu.matmul %18, %19, %cst_15 {dimension_numbers = #tpu.dot_dimension_numbers<[1], [0], [0], [1], [0, 0, 1, 1], [], []>} : vector<512x72xbf16>, vector<72x8xbf16>, vector<512x8xf32> -> vector<512x8xf32>
    %21 = vector.broadcast %11 : vector<1x8xf32> to vector<512x8xf32>
    %22 = arith.mulf %20, %21 : vector<512x8xf32>
    %c0_16 = arith.constant 0 : index
    %c0_17 = arith.constant 0 : index
    %23 = vector.load %arg8[%c0_16, %c0_17] : memref<1x8xf32, #tpu.memory_space<vmem>>, vector<1x8xf32>
    %24 = vector.broadcast %23 : vector<1x8xf32> to vector<512x8xf32>
    %25 = arith.addf %22, %24 : vector<512x8xf32>
    %cst_18 = arith.constant 0.000000e+00 : f32
    %26 = vector.broadcast %cst_18 : f32 to vector<512x8xf32>
    %27 = arith.maximumf %25, %26 : vector<512x8xf32>
    %cst_19 = arith.constant 1.000000e+00 : f32
    %28 = vector.broadcast %cst_19 : f32 to vector<512x8xf32>
    %29 = arith.mulf %27, %28 : vector<512x8xf32>
    %c0_20 = arith.constant 0 : index
    %c0_21 = arith.constant 0 : index
    %c0_22 = arith.constant 0 : index
    %30 = vector.load %arg9[%c0_20, %c0_21, %c0_22] : memref<1x512x8xf32, #tpu.memory_space<vmem>>, vector<1x512x8xf32>
    %31 = vector.shape_cast %30 : vector<1x512x8xf32> to vector<512x8xf32>
    %32 = arith.addf %31, %29 : vector<512x8xf32>
    %c0_23 = arith.constant 0 : index
    %c0_24 = arith.constant 0 : index
    %c0_25 = arith.constant 0 : index
    %33 = vector.load %arg10[%c0_23, %c0_24, %c0_25] : memref<1x512x8xf32, #tpu.memory_space<vmem>>, vector<1x512x8xf32>
    %34 = vector.shape_cast %33 : vector<1x512x8xf32> to vector<512x8xf32>
    %35 = vector.shape_cast %32 : vector<512x8xf32> to vector<1x512x8xf32>
    tpu.vector_store %arg10[%c0_23, %c0_24, %c0_25], %35 {strides = array<i32>} : memref<1x512x8xf32, #tpu.memory_space<vmem>>, vector<1x512x8xf32>,
    return
  }
  func.func @transform_0(%arg0: i32, %arg1: i32) -> (i32, i32, i32) {
    %c0_i32 = arith.constant 0 : i32
    %c0_i32_0 = arith.constant 0 : i32
    return %arg0, %arg1, %c0_i32 : i32, i32, i32
  }
  func.func @transform_1(%arg0: i32, %arg1: i32) -> (i32, i32, i32) {
    %c0_i32 = arith.constant 0 : i32
    %c0_i32_0 = arith.constant 0 : i32
    %c0_i32_1 = arith.constant 0 : i32
    return %arg0, %c0_i32, %c0_i32_0 : i32, i32, i32
  }
  func.func @transform_2(%arg0: i32, %arg1: i32) -> (i32, i32) {
    %c0_i32 = arith.constant 0 : i32
    %c0_i32_0 = arith.constant 0 : i32
    %c0_i32_1 = arith.constant 0 : i32
    return %c0_i32, %c0_i32_0 : i32, i32
  }
  func.func @transform_3(%arg0: i32, %arg1: i32) -> (i32, i32) {
    %c0_i32 = arith.constant 0 : i32
    %c0_i32_0 = arith.constant 0 : i32
    %c0_i32_1 = arith.constant 0 : i32
    return %c0_i32, %c0_i32_0 : i32, i32
  }
  func.func @transform_4(%arg0: i32, %arg1: i32) -> (i32, i32) {
    %c0_i32 = arith.constant 0 : i32
    %c0_i32_0 = arith.constant 0 : i32
    %c0_i32_1 = arith.constant 0 : i32
    return %c0_i32, %c0_i32_0 : i32, i32
  }
  func.func @transform_5(%arg0: i32, %arg1: i32) -> (i32, i32) {
    %c0_i32 = arith.constant 0 : i32
    %c0_i32_0 = arith.constant 0 : i32
    %c0_i32_1 = arith.constant 0 : i32
    return %c0_i32, %c0_i32_0 : i32, i32
  }
  func.func @transform_6(%arg0: i32, %arg1: i32) -> (i32, i32) {
    %c0_i32 = arith.constant 0 : i32
    %c0_i32_0 = arith.constant 0 : i32
    %c0_i32_1 = arith.constant 0 : i32
    return %c0_i32, %c0_i32_0 : i32, i32
  }
  func.func @transform_7(%arg0: i32, %arg1: i32) -> (i32, i32, i32) {
    %c0_i32 = arith.constant 0 : i32
    %c0_i32_0 = arith.constant 0 : i32
    return %arg0, %arg1, %c0_i32 : i32, i32, i32
  }
  func.func @transform_8(%arg0: i32, %arg1: i32) -> (i32, i32, i32) {
    %c0_i32 = arith.constant 0 : i32
    %c0_i32_0 = arith.constant 0 : i32
    return %arg0, %arg1, %c0_i32 : i32, i32, i32
  }
}

</mosaic_0001>

<bundles_post_ra>
// kernel: synthesis_block_forward.2
= control target key start
LH: loop header
LB: loop body
LE: loop exit
PB: predicated region body
PF: predicated region fallthrough
CT: control target
= control target key end

     0   :  { %s5379_s30 = smov 0   ;;  %s5381_s10 = smov 0   ;;  %s7436_s0 = inlined_call_operand.vmem [shape: bf16[2,256,36], index: 0, kind: input, shape index: {}]   ;;  %s7437_s1 = inlined_call_operand.vmem [shape: f32[2,1,8], index: 1, kind: input, shape index: {}]   ;;  %s7438_s2 = inlined_call_operand.vmem [shape: f32[8,4], index: 2, kind: input, shape index: {}]   ;;  %s7439_s3 = inlined_call_operand.vmem [shape: f32[1,4], index: 3, kind: input, shape index: {}]   ;;  %s7440_s4 = inlined_call_operand.vmem [shape: f32[4,8], index: 4, kind: input, shape index: {}]   ;;  %s7441_s5 = inlined_call_operand.vmem [shape: bf16[4,36,8], index: 5, kind: input, shape index: {}]   ;;  %s7442_s6 = inlined_call_operand.vmem [shape: bf16[4,36,8], index: 6, kind: input, shape index: {}]   ;;  %s7443_s7 = inlined_call_operand.vmem [shape: f32[1,8], index: 7, kind: input, shape index: {}]   ;;  %s7444_s8 = inlined_call_operand.vmem [shape: bf16[2,256,32], index: 8, kind: output, shape index: {0}]   ;;  %s7445_s9 = inlined_call_operand.vmem [shape: f32[2,256,32], index: 9, kind: output, shape index: {1}]  }
   0x1   :  { %s5383_s11 = smov 0  }
   0x2 LB: > { %s32_s12 = sadd.s32 1, %s5313_s10  ;;  %p4206_p0 = scmp.ge.s32.totalorder %s5317_s11, 1  ;;  %s5317_s11 = sphi %s5383_s11, %s20_s11   ;;  %s5313_s10 = sphi %s5381_s10, %s7636_s10   ;;  %s5309_s30 = sphi %s5379_s30, %s7635_s30  }
   0x3   : > { %p34_p1 = scmp.ge.s32.totalorder %s32_s12, 2  ;;  %p321_p2 = scmp.lt.s32.totalorder %s5317_s11, 3 }
   0x5   : > { %s7638_s12 = smov (%p34_p1, %s32_s12), 0  ;;  %p322_p3 = pnand %p4206_p0, %p321_p2 }
   0x7   : > { %325 = sbr.rel (%p322_p3) target bundleno = 927 (0x39f), region = 52 }
   0xc   : > { %v412_v0 = vld [vmem:[%s7438_s2] sm:$0xff]  ;;  %p378_p4 = scmp.lt.s32.totalorder %s5309_s30, 1  ;;  %v5319_v1 = vmov 0.0   ;;  %vm5320_vm0 = vmmov 0   ;;  %vm414_vm1 = vcmask 64512   ;;  %vm494_vm2 = vcmask 1043456  }
   0xd   : > { %4640 = vmatprep.subr.mxu0 %v5319_v1  ;;  %4642 = vmatprep.mubr.msk.f32.mxu0 %vm5320_vm0, %v5319_v1  ;;  %v489_v3 = vld [vmem:[%s7440_s4] sm:$0xf]  ;;  %vm793_vm3 = vcmask 1041408   ;;  %v5236_v4 = vld [vmem:[%s7442_s6 + $0x10] ss:$0 sps:$4 sm:$0x33]   ;;  %v672_v45 = vlaneseq }
   0xe   : > { %4641 = vmatpush3.msra.mxu0 %v412_v0  ;;  %s7640_s30 = smov (!%p378_p4, %s5309_s30), 1  ;;  %4645 = vmatprep.subr.mxu1 %v5319_v1  ;;  %v413_v5 = vld [vmem:[%s7439_s3] sm:$0x1]  ;;  %v5259_v6 = vld [vmem:[%s7441_s5 + $0x10] ss:$0 sps:$4 sm:$0x33]  }
   0xf   : > { %4647 = vmatprep.mubr.msk.f32.mxu1 %vm5320_vm0, %v5319_v1  ;;  %s389_s17 = scalar_lea.vmem %s7437_s1, %s7640_s30  ;;  %4646 = vmatpush3.msk.msra.mxu1 %vm494_vm2, %v489_v3  ;;  %s4449_s22 = sshll.u32 %s7640_s30, 7  ;;  %v795_v9 = vsel %vm793_vm3, %v5259_v6, 0  ;;  %vm490_vm4 = vcmask 31744   ;;  %v5260_v12 = vld [vmem:[%s7441_s5 + $0x8] sm:$0xff]   ;;  %v1246_v14 = vsel %vm793_vm3, %v5236_v4, 0  ;;  %vm744_vm5 = vcmask 293888  }
  0x10   : > { %v411_v2 = vld [vmem:[%s389_s17] sm:$0x1]  ;;  %4955 = vmatprep.subr.msk.bf16.mxu1 %vm793_vm3, %v5236_v4  ;;  %s5420_s25 = scalar_lea.vmem %s7436_s0, %s4449_s22  ;;  %4954 = vmatprep.subr.msk.bf16.mxu0 %vm793_vm3, %v5259_v6  ;;  %s5321_s15 = smov 12   ;;  %v5237_v15 = vld [vmem:[%s7442_s6 + $0x8] sm:$0xff]   ;;  %v5257_v26 = vld [vmem:[%s7442_s6 + $0x14] sm:$0xff]   ;;  %vm596_vm6 = vcmask 97280  }
  0x11   : > { %4643 = vmatmul.mubr.msk.f32.vlgmr.msra.gmra.mxu0 %vm414_vm1, %v411_v2  ;;  %v5429_v7 = vld [vmem:[%s5420_s25] sm:$0xff]   ;;  %s5322_s16 = smov 4   ;;  %s5323_s21 = smov 16   ;;  %v5460_v18 = vld [vmem:[%s5420_s25 + $0x8] sm:$0xff]   ;;  %v5471_v20 = vld [vmem:[%s5420_s25 + $0x10] sm:$0xff]   ;;  %vm598_vm7 = vcmask 130048  }
  0x12   : > { %4651 = vmatpush3.bf16.msra.mxu0 %v795_v9  ;;  %v5261_v16 = vld [vmem:[%s7441_s5] sm:$0xff]   ;;  %s5324_s23 = smov 8   ;;  %s5325_s29 = smov 24   ;;  %v5490_v24 = vld [vmem:[%s5420_s25 + $0x18] sm:$0xff]   ;;  %v5506_v28 = vld [vmem:[%s5420_s25 + $0x28] sm:$0xff]   ;;  %vm600_vm8 = vcmask 162816   ;;  %v640_v57 = vunpack.c.l.bf16 %v5429_v7  ;;  %v641_v61 = vunpack.c.h.bf16 %v5429_v7  ;;  %v642_v62 = vunpack.c.l.bf16 %v5460_v18 }
  0x13   : > { %4652 = vmatprep.subr.bf16.mxu0 %v5260_v12  ;;  %v5238_v17 = vld [vmem:[%s7442_s6] sm:$0xff]   ;;  %s5326_s13 = smov 20   ;;  %s5328_s17 = smov 28   ;;  %v5258_v27 = vld [vmem:[%s7442_s6 + $0x38] ss:$0 sps:$4 sm:$0x33]   ;;  %v643_v63 = vunpack.c.h.bf16 %v5460_v18  ;;  %v644_v1 = vunpack.c.l.bf16 %v5471_v20  ;;  %v645_v2 = vunpack.c.h.bf16 %v5471_v20 }
  0x14   : > { %v5465_v19 = vld [vmem:[%s7441_s5 + $0x24] ss:$0 sps:$4 sm:$0x33]   ;;  %v5256_v23 = vld [vmem:[%s7442_s6 + $0x1c] sm:$0xff]   ;;  %v5509_v29 = vld [vmem:[%s5420_s25 + $0x30] sm:$0xff]   ;;  %v2242_v39 = vsel %vm793_vm3, %v5258_v27, 0  ;;  %s7229_s18 = scalar_lea.vmem %s7444_s8, %s4449_s22 }
  0x15   : > { %v5249_v21 = vld [vmem:[%s7442_s6 + $0x24] ss:$0 sps:$4 sm:$0x33]   ;;  %v5517_v30 = vld [vmem:[%s5420_s25 + $0x38] sm:$0xff]   ;;  %v5527_v32 = vld [vmem:[%s5420_s25 + $0x48] sm:$0xff]   ;;  %v5605_v52 = vshrl.u32 %v672_v45, 7  ;;  %v651_v45 = vunpack.c.h.bf16 %v5506_v28 }
  0x16   : > { %4653 = vmatpush3.bf16.msra.mxu0 %v5260_v12  ;;  %v1744_v22 = vsel %vm793_vm3, %v5249_v21, 0  ;;  %v5493_v25 = vld [vmem:[%s5420_s25 + $0x20] sm:$0xff]   ;;  %v5530_v33 = vld [vmem:[%s5420_s25 + $0x50] sm:$0xff]   ;;  %v5537_v34 = vld [vmem:[%s5420_s25 + $0x58] sm:$0xff]   ;;  %vm602_vm9 = vcmask 195584   ;;  %vm604_vm10 = vcmask 228352  }
  0x17   : > { %4654 = vmatprep.subr.bf16.mxu0 %v5261_v16  ;;  %v5520_v31 = vld [vmem:[%s5420_s25 + $0x40] sm:$0xff]   ;;  %v5547_v36 = vld [vmem:[%s5420_s25 + $0x68] sm:$0xff]   ;;  %v5550_v37 = vld [vmem:[%s5420_s25 + $0x70] sm:$0xff]   ;;  %vm606_vm11 = vcmask 261120   ;;  %v7446_v56 = vsub.s32 0, %v5605_v52  ;;  %s4451_s14 = sshll.u32 %s7640_s30, 8 }
  0x18   : > { %v5540_v35 = vld [vmem:[%s5420_s25 + $0x60] sm:$0xff]   ;;  %v5557_v38 = vld [vmem:[%s5420_s25 + $0x78] sm:$0xff]   ;;  %v5262_v40 = vld [vmem:[%s7442_s6 + $0x30] sm:$0xff]   ;;  %vm3511_vm12 = vcmask 257024  }
  0x19   : > { %v5264_v41 = vld [vmem:[%s7442_s6 + $0x28] sm:$0xff]  }
  0x1a   : > { %4655 = vmatpush3.bf16.msra.mxu0 %v5261_v16  ;;  %v5577_v42 = vld [vmem:[%s7442_s6 + $0x4c] ss:$0 sps:$4 sm:$0x33]   ;;  %v1431_v16 = vsel %vm793_vm3, %v5465_v19, 0 }
  0x1b   : > { %4956 = vmatprep.subr.msk.bf16.mxu0 %vm793_vm3, %v5465_v19 }
  0xd1   : > { %v484_v8 = vpop.f32.mrf.mxu0 }
  0xd2   : > { %v5433_v10 = vadd.f32 %v484_v8, %v413_v5 }
  0xd3   : > { %v4644_v11 = vpop.f32.mrf.mxu0 }
  0xd4   : > { %576 = vrot.lane.b32.xlu1 %v5433_v10, %s5321_s15  ;;  %570 = vrot.lane.b32.xlu0 %v5433_v10, %s5322_s16  ;;  %v488_v13 = vmul.f32 %v5433_v10, %v5433_v10  ;;  %s5327_s16 = smov 32  }
  0xd6   : > { %4648 = vmatmul.mubr.msk.f32.vlgmr.msra.gmra.mxu1 %vm490_vm4, %v488_v13 }
  0xd7   : > { %4689 = vmatpush3.bf16.msra.mxu1 %v1246_v14  ;;  %4694 = vmatprep.mubr.msk.bf16.mxu1 %vm744_vm5, %v5429_v7  ;;  %v646_v14 = vunpack.c.l.bf16 %v5490_v24 }
  0xd8   : > { %579 = vrot.lane.b32.xlu1 %v5433_v10, %s5323_s21  ;;  %573 = vrot.lane.b32.xlu0 %v5433_v10, %s5324_s23 }
  0xd9   : > { %4690 = vmatprep.subr.bf16.mxu1 %v5237_v15 }
  0xdb   : > { %4691 = vmatpush3.bf16.msra.mxu1 %v5237_v15  ;;  %v647_v15 = vunpack.c.h.bf16 %v5490_v24 }
  0xdc   : > { %585 = vrot.lane.b32.xlu1 %v5433_v10, %s5325_s29  ;;  %582 = vrot.lane.b32.xlu0 %v5433_v10, %s5326_s13 }
  0xdd   : > { %4692 = vmatprep.subr.bf16.mxu1 %v5238_v17 }
  0xdf   : > { %4693 = vmatpush3.bf16.msra.mxu1 %v5238_v17  ;;  %v5265_v17 = vld [vmem:[%s7441_s5 + $0x1c] sm:$0xff]  }
  0xe0   : > { %591 = vrot.lane.b32.xlu1 %v5433_v10, %s5327_s16  ;;  %588 = vrot.lane.b32.xlu0 %v5433_v10, %s5328_s17  ;;  %s6673_s17 = scalar_lea.vmem %s7445_s9, %s4451_s14 }
  0xe1   : > { %4957 = vmatprep.subr.msk.bf16.mxu1 %vm793_vm3, %v5249_v21  ;;  %v648_v21 = vunpack.c.l.bf16 %v5493_v25 }
  0xe2   : > { %4695 = vmatmul.mubr.msk.bf16.vlgmr.msra.gmra.mxu1 %vm744_vm5, %v5460_v18 }
  0xe3   : > { %4698 = vmatprep.mubr.msk.bf16.mxu1 %vm744_vm5, %v5471_v20  ;;  %4765 = vmatpush3.bf16.msra.mxu1 %v1744_v22  ;;  %v649_v22 = vunpack.c.h.bf16 %v5493_v25 }
  0xe4   : > { %4766 = vmatprep.subr.bf16.mxu1 %v5256_v23 }
  0xe7   : > { %4767 = vmatpush3.bf16.msra.mxu1 %v5256_v23 }
  0xe8   : > { %4768 = vmatprep.subr.bf16.mxu1 %v5257_v26 }
  0xea   : > { %4699 = vmatmul.mubr.msk.bf16.gmra.mxu1 %vm744_vm5, %v5490_v24 }
  0xeb   : > { %4702 = vmatprep.mubr.msk.bf16.mxu1 %vm744_vm5, %v5493_v25  ;;  %4769 = vmatpush3.bf16.msra.mxu1 %v5257_v26 }
  0xec   : > { %4959 = vmatprep.subr.msk.bf16.mxu1 %vm793_vm3, %v5258_v27  ;;  %v5266_v27 = vld [vmem:[%s7441_s5 + $0x14] sm:$0xff]  }
  0xf2   : > { %4703 = vmatmul.mubr.msk.bf16.gmra.mxu1 %vm744_vm5, %v5506_v28 }
  0xf3   : > { %4706 = vmatprep.mubr.msk.bf16.mxu1 %vm744_vm5, %v5509_v29 }
  0xfa   : > { %4707 = vmatmul.mubr.msk.bf16.gmra.mxu1 %vm744_vm5, %v5517_v30 }
  0xfb   : > { %4710 = vmatprep.mubr.msk.bf16.mxu1 %vm744_vm5, %v5520_v31 }
 0x102   : > { %4711 = vmatmul.mubr.msk.bf16.gmra.mxu1 %vm744_vm5, %v5527_v32 }
 0x103   : > { %4714 = vmatprep.mubr.msk.bf16.mxu1 %vm744_vm5, %v5530_v33 }
 0x10a   : > { %4715 = vmatmul.mubr.msk.bf16.gmra.mxu1 %vm744_vm5, %v5537_v34 }
 0x10b   : > { %4718 = vmatprep.mubr.msk.bf16.mxu1 %vm744_vm5, %v5540_v35 }
 0x112   : > { %4719 = vmatmul.mubr.msk.bf16.gmra.mxu1 %vm744_vm5, %v5547_v36 }
 0x113   : > { %4722 = vmatprep.mubr.msk.bf16.mxu1 %vm744_vm5, %v5550_v37 }
 0x11a   : > { %4723 = vmatmul.mubr.msk.bf16.gmra.mxu1 %vm744_vm5, %v5557_v38 }
 0x11b   : > { %4770 = vmatprep.mubr.msk.bf16.mxu1 %vm744_vm5, %v5429_v7 }
 0x122   : > { %4771 = vmatmul.mubr.msk.bf16.vlgmr.msra.gmra.mxu1 %vm744_vm5, %v5460_v18 }
 0x123   : > { %4774 = vmatprep.mubr.msk.bf16.mxu1 %vm744_vm5, %v5471_v20  ;;  %4841 = vmatpush3.bf16.msra.mxu1 %v2242_v39 }
 0x124   : > { %4842 = vmatprep.subr.bf16.mxu1 %v5262_v40 }
 0x127   : > { %4843 = vmatpush3.bf16.msra.mxu1 %v5262_v40 }
 0x128   : > { %4844 = vmatprep.subr.bf16.mxu1 %v5264_v41 }
 0x12a   : > { %4775 = vmatmul.mubr.msk.bf16.gmra.mxu1 %vm744_vm5, %v5490_v24 }
 0x12b   : > { %4778 = vmatprep.mubr.msk.bf16.mxu1 %vm744_vm5, %v5493_v25  ;;  %4845 = vmatpush3.bf16.msra.mxu1 %v5264_v41  ;;  %v2740_v41 = vsel %vm793_vm3, %v5577_v42, 0 }
 0x12c   : > { %4961 = vmatprep.subr.msk.bf16.mxu1 %vm793_vm3, %v5577_v42  ;;  %v652_v42 = vunpack.c.l.bf16 %v5509_v29 }
 0x132   : > { %4779 = vmatmul.mubr.msk.bf16.gmra.mxu1 %vm744_vm5, %v5506_v28 }
 0x133   : > { %4782 = vmatprep.mubr.msk.bf16.mxu1 %vm744_vm5, %v5509_v29 }
 0x13a   : > { %4783 = vmatmul.mubr.msk.bf16.gmra.mxu1 %vm744_vm5, %v5517_v30 }
 0x13b   : > { %4786 = vmatprep.mubr.msk.bf16.mxu1 %vm744_vm5, %v5520_v31 }
 0x142   : > { %4787 = vmatmul.mubr.msk.bf16.gmra.mxu1 %vm744_vm5, %v5527_v32 }
 0x143   : > { %4790 = vmatprep.mubr.msk.bf16.mxu1 %vm744_vm5, %v5530_v33 }
 0x146   : > { %v577_v43 = vpop.permute.xlu1 %576  ;;  %v571_v44 = vpop.permute.xlu0 %570 }
 0x147   : > { %v594_v46 = vsel %vm490_vm4, %v5433_v10, %v571_v44  ;;  %v650_v44 = vunpack.c.l.bf16 %v5506_v28 }
 0x14a   : > { %4791 = vmatmul.mubr.msk.bf16.gmra.mxu1 %vm744_vm5, %v5537_v34  ;;  %v580_v47 = vpop.permute.xlu1 %579  ;;  %v574_v48 = vpop.permute.xlu0 %573 }
 0x14b   : > { %v595_v49 = vsel %vm414_vm1, %v594_v46, %v574_v48  ;;  %4794 = vmatprep.mubr.msk.bf16.mxu1 %vm744_vm5, %v5540_v35  ;;  %v653_v48 = vunpack.c.h.bf16 %v5509_v29 }
 0x14c   : > { %v597_v50 = vsel %vm596_vm6, %v595_v49, %v577_v43  ;;  %v5268_v43 = vld [vmem:[%s7442_s6 + $0x44] sm:$0xff]  }
 0x14d   : > { %v599_v51 = vsel %vm598_vm7, %v597_v50, %v580_v47  ;;  %v5676_v47 = vld [vmem:[%s7441_s5 + $0x38] ss:$0 sps:$4 sm:$0x33]   ;;  %v5270_v50 = vld [vmem:[%s7442_s6 + $0x3c] sm:$0xff]  }
 0x14e   : > { %v586_v53 = vpop.permute.xlu1 %585  ;;  %v583_v54 = vpop.permute.xlu0 %582 }
 0x14f   : > { %v601_v55 = vsel %vm600_vm8, %v599_v51, %v583_v54 }
 0x150   : > { %v603_v59 = vsel %vm602_vm9, %v601_v55, %v586_v53 }
 0x152   : > { %4795 = vmatmul.mubr.msk.bf16.gmra.mxu1 %vm744_vm5, %v5547_v36  ;;  %v592_v58 = vpop.permute.xlu1 %591  ;;  %v589_v60 = vpop.permute.xlu0 %588 }
 0x153   : > { %v605_v0 = vsel %vm604_vm10, %v603_v59, %v589_v60  ;;  %4798 = vmatprep.mubr.msk.bf16.mxu1 %vm744_vm5, %v5550_v37  ;;  %v656_v60 = vunpack.c.l.bf16 %v5520_v31 }
 0x154   : > { %v607_v3 = vsel %vm606_vm11, %v605_v0, %v592_v58  ;;  %v655_v58 = vunpack.c.h.bf16 %v5517_v30 }
 0x155   : > { %v5622_v4 = vrot.slane %v607_v3, %v7446_v56  ;;  %v658_v3 = vunpack.c.l.bf16 %v5527_v32 }
 0x157   : > { %v676_v5 = vmul.f32 %v5622_v4, %v640_v57  ;;  %v677_v6 = vmul.f32 %v5622_v4, %v641_v61  ;;  %v678_v8 = vmul.f32 %v5622_v4, %v642_v62  ;;  %v679_v9 = vmul.f32 %v5622_v4, %v643_v63 }
 0x158   : > { %v680_v10 = vmul.f32 %v5622_v4, %v644_v1  ;;  %v681_v11 = vmul.f32 %v5622_v4, %v645_v2  ;;  %v682_v19 = vmul.f32 %v5622_v4, %v646_v14  ;;  %v683_v26 = vmul.f32 %v5622_v4, %v647_v15 }
 0x159   : > { %v5630_v12 = vpack.c.bf16 %v677_v6, %v676_v5  ;;  %v5632_v13 = vpack.c.bf16 %v679_v9, %v678_v8  ;;  %v684_v39 = vmul.f32 %v5622_v4, %v648_v21  ;;  %v685_v40 = vmul.f32 %v5622_v4, %v649_v22 }
 0x15a   : > { %4799 = vmatmul.mubr.msk.bf16.gmra.mxu1 %vm744_vm5, %v5557_v38  ;;  %v5647_v23 = vpack.c.bf16 %v681_v11, %v680_v10  ;;  %v5671_v46 = vpack.c.bf16 %v683_v26, %v682_v19  ;;  %v686_v51 = vmul.f32 %v5622_v4, %v650_v44  ;;  %v687_v53 = vmul.f32 %v5622_v4, %v651_v45 }
 0x15b   : > { %4656 = vmatprep.mubr.msk.bf16.mxu0 %vm744_vm5, %v5630_v12  ;;  %4846 = vmatprep.mubr.msk.bf16.mxu1 %vm744_vm5, %v5429_v7  ;;  %v5680_v49 = vpack.c.bf16 %v685_v40, %v684_v39  ;;  %v688_v54 = vmul.f32 %v5622_v4, %v652_v42  ;;  %v689_v55 = vmul.f32 %v5622_v4, %v653_v48  ;;  %v654_v57 = vunpack.c.l.bf16 %v5517_v30 }
 0x15c   : > { %4657 = vmatmul.mubr.msk.bf16.vlgmr.msra.gmra.mxu0 %vm744_vm5, %v5632_v13  ;;  %v5701_v59 = vpack.c.bf16 %v687_v53, %v686_v51  ;;  %v657_v61 = vunpack.c.h.bf16 %v5520_v31  ;;  %v691_v0 = vmul.f32 %v5622_v4, %v655_v58  ;;  %v692_v1 = vmul.f32 %v5622_v4, %v656_v60 }
 0x15d   : > { %4727 = vmatpush3.bf16.msra.mxu0 %v1431_v16  ;;  %4660 = vmatprep.mubr.msk.bf16.mxu0 %vm744_vm5, %v5647_v23  ;;  %v5705_v62 = vpack.c.bf16 %v689_v55, %v688_v54  ;;  %v690_v63 = vmul.f32 %v5622_v4, %v654_v57  ;;  %v659_v5 = vunpack.c.h.bf16 %v5527_v32  ;;  %v660_v8 = vunpack.c.l.bf16 %v5530_v33 }
 0x15e   : > { %4728 = vmatprep.subr.bf16.mxu0 %v5265_v17  ;;  %v693_v2 = vmul.f32 %v5622_v4, %v657_v61  ;;  %v661_v9 = vunpack.c.h.bf16 %v5530_v33  ;;  %v694_v11 = vmul.f32 %v5622_v4, %v658_v3  ;;  %v663_v21 = vunpack.c.h.bf16 %v5537_v34 }
 0x15f   : > { %v5721_v6 = vpack.c.bf16 %v691_v0, %v690_v63  ;;  %v695_v14 = vmul.f32 %v5622_v4, %v659_v5  ;;  %v696_v15 = vmul.f32 %v5622_v4, %v660_v8  ;;  %v664_v19 = vunpack.c.l.bf16 %v5540_v35  ;;  %v5271_v8 = vld [vmem:[%s7441_s5 + $0x30] sm:$0xff]  }
 0x160   : > { %v5725_v10 = vpack.c.bf16 %v693_v2, %v692_v1  ;;  %v697_v16 = vmul.f32 %v5622_v4, %v661_v9  ;;  %v665_v26 = vunpack.c.h.bf16 %v5540_v35  ;;  %v699_v40 = vmul.f32 %v5622_v4, %v663_v21  ;;  %v5272_v9 = vld [vmem:[%s7441_s5 + $0x28] sm:$0xff]  }
 0x161   : > { %4729 = vmatpush3.bf16.msra.mxu0 %v5265_v17  ;;  %v662_v17 = vunpack.c.l.bf16 %v5537_v34  ;;  %v5741_v22 = vpack.c.bf16 %v695_v14, %v694_v11  ;;  %v666_v44 = vunpack.c.l.bf16 %v5547_v36  ;;  %v667_v45 = vunpack.c.h.bf16 %v5547_v36 }
 0x162   : > { %4847 = vmatmul.mubr.msk.bf16.vlgmr.msra.gmra.mxu1 %vm744_vm5, %v5460_v18  ;;  %4730 = vmatprep.subr.bf16.mxu0 %v5266_v27  ;;  %v668_v48 = vunpack.c.l.bf16 %v5550_v37  ;;  %v670_v58 = vunpack.c.l.bf16 %v5557_v38  ;;  %v671_v60 = vunpack.c.h.bf16 %v5557_v38 }
 0x163   : > { %4850 = vmatprep.mubr.msk.bf16.mxu1 %vm744_vm5, %v5471_v20  ;;  %4917 = vmatpush3.bf16.msra.mxu1 %v2740_v41  ;;  %v698_v39 = vmul.f32 %v5622_v4, %v662_v17  ;;  %v700_v41 = vmul.f32 %v5622_v4, %v664_v19  ;;  %v702_v53 = vmul.f32 %v5622_v4, %v666_v44 }
 0x164   : > { %4661 = vmatmul.mubr.msk.bf16.gmra.mxu0 %vm744_vm5, %v5671_v46  ;;  %4918 = vmatprep.subr.bf16.mxu1 %v5268_v43  ;;  %v703_v54 = vmul.f32 %v5622_v4, %v667_v45  ;;  %v704_v55 = vmul.f32 %v5622_v4, %v668_v48  ;;  %v706_v0 = vmul.f32 %v5622_v4, %v670_v58 }
 0x165   : > { %4664 = vmatprep.mubr.msk.bf16.mxu0 %vm744_vm5, %v5680_v49  ;;  %4731 = vmatpush3.bf16.msra.mxu0 %v5266_v27  ;;  %v5745_v27 = vpack.c.bf16 %v697_v16, %v696_v15  ;;  %v5761_v42 = vpack.c.bf16 %v699_v40, %v698_v39  ;;  %v707_v1 = vmul.f32 %v5622_v4, %v671_v60 }
 0x166   : > { %4958 = vmatprep.subr.msk.bf16.mxu0 %vm793_vm3, %v5676_v47  ;;  %v5781_v61 = vpack.c.bf16 %v703_v54, %v702_v53 }
 0x167   : > { %4919 = vmatpush3.bf16.msra.mxu1 %v5268_v43  ;;  %v701_v43 = vmul.f32 %v5622_v4, %v665_v26  ;;  %v5795_v2 = vpack.c.bf16 %v707_v1, %v706_v0 }
 0x168   : > { %4920 = vmatprep.subr.bf16.mxu1 %v5270_v50 }
 0x169   : > { %v5765_v51 = vpack.c.bf16 %v701_v43, %v700_v41 }
 0x16a   : > { %4851 = vmatmul.mubr.msk.bf16.gmra.mxu1 %vm744_vm5, %v5490_v24 }
 0x16b   : > { %4854 = vmatprep.mubr.msk.bf16.mxu1 %vm744_vm5, %v5493_v25  ;;  %4921 = vmatpush3.bf16.msra.mxu1 %v5270_v50  ;;  %v669_v50 = vunpack.c.h.bf16 %v5550_v37 }
 0x16c   : > { %4665 = vmatmul.mubr.msk.bf16.gmra.mxu0 %vm744_vm5, %v5701_v59 }
 0x16d   : > { %4668 = vmatprep.mubr.msk.bf16.mxu0 %vm744_vm5, %v5705_v62  ;;  %v705_v57 = vmul.f32 %v5622_v4, %v669_v50  ;;  %v1929_v4 = vsel %vm793_vm3, %v5676_v47, 0 }
 0x16f   : > { %v5783_v63 = vpack.c.bf16 %v705_v57, %v704_v55  ;;  %v5275_v55 = vld [vmem:[%s7441_s5 + $0x3c] sm:$0xff]  }
 0x172   : > { %4855 = vmatmul.mubr.msk.bf16.gmra.mxu1 %vm744_vm5, %v5506_v28 }
 0x173   : > { %4858 = vmatprep.mubr.msk.bf16.mxu1 %vm744_vm5, %v5509_v29 }
 0x174   : > { %4669 = vmatmul.mubr.msk.bf16.gmra.mxu0 %vm744_vm5, %v5721_v6 }
 0x175   : > { %4672 = vmatprep.mubr.msk.bf16.mxu0 %vm744_vm5, %v5725_v10 }
 0x17a   : > { %4859 = vmatmul.mubr.msk.bf16.gmra.mxu1 %vm744_vm5, %v5517_v30 }
 0x17b   : > { %4862 = vmatprep.mubr.msk.bf16.mxu1 %vm744_vm5, %v5520_v31 }
 0x17c   : > { %4673 = vmatmul.mubr.msk.bf16.gmra.mxu0 %vm744_vm5, %v5741_v22 }
 0x17d   : > { %4676 = vmatprep.mubr.msk.bf16.mxu0 %vm744_vm5, %v5745_v27 }
 0x182   : > { %4863 = vmatmul.mubr.msk.bf16.gmra.mxu1 %vm744_vm5, %v5527_v32 }
 0x183   : > { %4866 = vmatprep.mubr.msk.bf16.mxu1 %vm744_vm5, %v5530_v33 }
 0x184   : > { %4677 = vmatmul.mubr.msk.bf16.gmra.mxu0 %vm744_vm5, %v5761_v42 }
 0x185   : > { %4680 = vmatprep.mubr.msk.bf16.mxu0 %vm744_vm5, %v5765_v51 }
 0x18a   : > { %4867 = vmatmul.mubr.msk.bf16.gmra.mxu1 %vm744_vm5, %v5537_v34 }
 0x18b   : > { %4870 = vmatprep.mubr.msk.bf16.mxu1 %vm744_vm5, %v5540_v35 }
 0x18c   : > { %4681 = vmatmul.mubr.msk.bf16.gmra.mxu0 %vm744_vm5, %v5781_v61 }
 0x18d   : > { %4684 = vmatprep.mubr.msk.bf16.mxu0 %vm744_vm5, %v5783_v63 }
 0x192   : > { %4871 = vmatmul.mubr.msk.bf16.gmra.mxu1 %vm744_vm5, %v5547_v36 }
 0x193   : > { %4874 = vmatprep.mubr.msk.bf16.mxu1 %vm744_vm5, %v5550_v37 }
 0x194   : > { %4685 = vmatmul.mubr.msk.bf16.gmra.mxu0 %vm744_vm5, %v5795_v2 }
 0x195   : > { %4732 = vmatprep.mubr.msk.bf16.mxu0 %vm744_vm5, %v5630_v12 }
 0x196   : > { %v5803_v3 = vpop.f32.mrf.mxu1 }
 0x198   : > { %v4649_v5 = vpop.f32.mrf.mxu1 }
 0x19a   : > { %4875 = vmatmul.mubr.msk.bf16.gmra.mxu1 %vm744_vm5, %v5557_v38 }
 0x19b   : > { %4922 = vmatprep.mubr.msk.bf16.mxu1 %vm744_vm5, %v5429_v7  ;;  %v5273_v7 = vld [vmem:[%s7441_s5 + $0x4c] ss:$0 sps:$4 sm:$0x33]  }
 0x19c   : > { %4733 = vmatmul.mubr.msk.bf16.vlgmr.msra.gmra.mxu0 %vm744_vm5, %v5632_v13  ;;  %v2427_v53 = vsel %vm793_vm3, %v5273_v7, 0 }
 0x19d   : > { %4803 = vmatpush3.bf16.msra.mxu0 %v1929_v4  ;;  %4736 = vmatprep.mubr.msk.bf16.mxu0 %vm744_vm5, %v5647_v23 }
 0x19e   : > { %4804 = vmatprep.subr.bf16.mxu0 %v5271_v8 }
 0x1a1   : > { %4805 = vmatpush3.bf16.msra.mxu0 %v5271_v8 }
 0x1a2   : > { %v5821_v47 = vpop.f32.mrf.mxu1  ;;  %4923 = vmatmul.mubr.msk.bf16.vlgmr.msra.gmra.mxu1 %vm744_vm5, %v5460_v18  ;;  %4806 = vmatprep.subr.bf16.mxu0 %v5272_v9 }
 0x1a3   : > { %4926 = vmatprep.mubr.msk.bf16.mxu1 %vm744_vm5, %v5471_v20 }
 0x1a4   : > { %v5830_v11 = vpop.f32.mrf.mxu1  ;;  %4737 = vmatmul.mubr.msk.bf16.gmra.mxu0 %vm744_vm5, %v5671_v46 }
 0x1a5   : > { %4740 = vmatprep.mubr.msk.bf16.mxu0 %vm744_vm5, %v5680_v49  ;;  %4807 = vmatpush3.bf16.msra.mxu0 %v5272_v9 }
 0x1a6   : > { %v5836_v14 = vpop.f32.mrf.mxu1  ;;  %4960 = vmatprep.subr.msk.bf16.mxu0 %vm793_vm3, %v5273_v7 }
 0x1a7   : > { %7447 = vst [vmem:[#allocation2_spill] sm:$0xff] %v5836_v14 }
 0x1a8   : > { %v5839_v18 = vpop.f32.mrf.mxu1 }
 0x1a9   : > { %7448 = vst [vmem:[#allocation3_spill] sm:$0xff] %v5839_v18 }
 0x1aa   : > { %v5841_v15 = vpop.f32.mrf.mxu1  ;;  %4927 = vmatmul.mubr.msk.bf16.gmra.mxu1 %vm744_vm5, %v5490_v24 }
 0x1ab   : > { %7449 = vst [vmem:[#allocation4_spill] sm:$0xff] %v5841_v15  ;;  %4930 = vmatprep.mubr.msk.bf16.mxu1 %vm744_vm5, %v5493_v25 }
 0x1ac   : > { %v5847_v20 = vpop.f32.mrf.mxu1  ;;  %4741 = vmatmul.mubr.msk.bf16.gmra.mxu0 %vm744_vm5, %v5701_v59 }
 0x1ad   : > { %7450 = vst [vmem:[#allocation5_spill] sm:$0xff] %v5847_v20  ;;  %4744 = vmatprep.mubr.msk.bf16.mxu0 %vm744_vm5, %v5705_v62 }
 0x1ae   : > { %v5853_v16 = vpop.f32.mrf.mxu1 }
 0x1af   : > { %7451 = vst [vmem:[#allocation6_spill] sm:$0xff] %v5853_v16 }
 0x1b0   : > { %v5855_v17 = vpop.f32.mrf.mxu1 }
 0x1b1   : > { %7452 = vst [vmem:[#allocation7_spill] sm:$0xff] %v5855_v17 }
 0x1b2   : > { %v5857_v21 = vpop.f32.mrf.mxu1  ;;  %4931 = vmatmul.mubr.msk.bf16.gmra.mxu1 %vm744_vm5, %v5506_v28 }
 0x1b3   : > { %7453 = vst [vmem:[#allocation8_spill] sm:$0xff] %v5857_v21  ;;  %4934 = vmatprep.mubr.msk.bf16.mxu1 %vm744_vm5, %v5509_v29 }
 0x1b4   : > { %v5863_v24 = vpop.f32.mrf.mxu1  ;;  %4745 = vmatmul.mubr.msk.bf16.gmra.mxu0 %vm744_vm5, %v5721_v6 }
 0x1b5   : > { %7454 = vst [vmem:[#allocation9_spill] sm:$0xff] %v5863_v24  ;;  %4748 = vmatprep.mubr.msk.bf16.mxu0 %vm744_vm5, %v5725_v10 }
 0x1b6   : > { %v5869_v25 = vpop.f32.mrf.mxu1 }
 0x1b7   : > { %7455 = vst [vmem:[#allocation10_spill] sm:$0xff] %v5869_v25 }
 0x1b8   : > { %v5871_v19 = vpop.f32.mrf.mxu1 }
 0x1b9   : > { %7456 = vst [vmem:[#allocation11_spill] sm:$0xff] %v5871_v19 }
 0x1ba   : > { %v5873_v26 = vpop.f32.mrf.mxu1  ;;  %4935 = vmatmul.mubr.msk.bf16.gmra.mxu1 %vm744_vm5, %v5517_v30 }
 0x1bb   : > { %7457 = vst [vmem:[#allocation12_spill] sm:$0xff] %v5873_v26  ;;  %4938 = vmatprep.mubr.msk.bf16.mxu1 %vm744_vm5, %v5520_v31 }
 0x1bc   : > { %v5879_v28 = vpop.f32.mrf.mxu1  ;;  %4749 = vmatmul.mubr.msk.bf16.gmra.mxu0 %vm744_vm5, %v5741_v22 }
 0x1bd   : > { %7458 = vst [vmem:[#allocation13_spill] sm:$0xff] %v5879_v28  ;;  %4752 = vmatprep.mubr.msk.bf16.mxu0 %vm744_vm5, %v5745_v27 }
 0x1be   : > { %v5885_v29 = vpop.f32.mrf.mxu1 }
 0x1bf   : > { %7459 = vst [vmem:[#allocation14_spill] sm:$0xff] %v5885_v29 }
 0x1c0   : > { %v5887_v39 = vpop.f32.mrf.mxu1 }
 0x1c1   : > { %7460 = vst [vmem:[#allocation15_spill] sm:$0xff] %v5887_v39 }
 0x1c2   : > { %v5889_v40 = vpop.f32.mrf.mxu1  ;;  %4939 = vmatmul.mubr.msk.bf16.gmra.mxu1 %vm744_vm5, %v5527_v32 }
 0x1c3   : > { %7461 = vst [vmem:[#allocation16_spill] sm:$0xff] %v5889_v40  ;;  %4942 = vmatprep.mubr.msk.bf16.mxu1 %vm744_vm5, %v5530_v33 }
 0x1c4   : > { %v5895_v30 = vpop.f32.mrf.mxu1  ;;  %4753 = vmatmul.mubr.msk.bf16.gmra.mxu0 %vm744_vm5, %v5761_v42 }
 0x1c5   : > { %7462 = vst [vmem:[#allocation17_spill] sm:$0xff] %v5895_v30  ;;  %4756 = vmatprep.mubr.msk.bf16.mxu0 %vm744_vm5, %v5765_v51 }
 0x1c6   : > { %v5901_v31 = vpop.f32.mrf.mxu1 }
 0x1c7   : > { %7463 = vst [vmem:[#allocation18_spill] sm:$0xff] %v5901_v31 }
 0x1c8   : > { %v5903_v41 = vpop.f32.mrf.mxu1 }
 0x1c9   : > { %7464 = vst [vmem:[#allocation19_spill] sm:$0xff] %v5903_v41 }
 0x1ca   : > { %v5905_v43 = vpop.f32.mrf.mxu1  ;;  %4943 = vmatmul.mubr.msk.bf16.gmra.mxu1 %vm744_vm5, %v5537_v34 }
 0x1cb   : > { %7465 = vst [vmem:[#allocation20_spill] sm:$0xff] %v5905_v43  ;;  %4946 = vmatprep.mubr.msk.bf16.mxu1 %vm744_vm5, %v5540_v35 }
 0x1cc   : > { %v5911_v32 = vpop.f32.mrf.mxu1  ;;  %4757 = vmatmul.mubr.msk.bf16.gmra.mxu0 %vm744_vm5, %v5781_v61 }
 0x1cd   : > { %7466 = vst [vmem:[#allocation21_spill] sm:$0xff] %v5911_v32  ;;  %4760 = vmatprep.mubr.msk.bf16.mxu0 %vm744_vm5, %v5783_v63 }
 0x1ce   : > { %v5917_v33 = vpop.f32.mrf.mxu1 }
 0x1cf   : > { %7467 = vst [vmem:[#allocation22_spill] sm:$0xff] %v5917_v33 }
 0x1d0   : > { %v5919_v44 = vpop.f32.mrf.mxu1 }
 0x1d1   : > { %7468 = vst [vmem:[#allocation23_spill] sm:$0xff] %v5919_v44 }
 0x1d2   : > { %v5921_v45 = vpop.f32.mrf.mxu1  ;;  %4947 = vmatmul.mubr.msk.bf16.gmra.mxu1 %vm744_vm5, %v5547_v36  ;;  %v5274_v36 = vld [vmem:[%s7441_s5 + $0x44] sm:$0xff]  }
 0x1d3   : > { %7469 = vst [vmem:[#allocation24_spill] sm:$0xff] %v5921_v45  ;;  %4950 = vmatprep.mubr.msk.bf16.mxu1 %vm744_vm5, %v5550_v37 }
 0x1d4   : > { %v5927_v34 = vpop.f32.mrf.mxu1  ;;  %4761 = vmatmul.mubr.msk.bf16.gmra.mxu0 %vm744_vm5, %v5795_v2 }
 0x1d5   : > { %7470 = vst [vmem:[#allocation25_spill] sm:$0xff] %v5927_v34  ;;  %4808 = vmatprep.mubr.msk.bf16.mxu0 %vm744_vm5, %v5630_v12 }
 0x1d6   : > { %v5933_v35 = vpop.f32.mrf.mxu1 }
 0x1d7   : > { %7471 = vst [vmem:[#allocation26_spill] sm:$0xff] %v5933_v35 }
 0x1d8   : > { %v5935_v48 = vpop.f32.mrf.mxu1 }
 0x1d9   : > { %7472 = vst [vmem:[#allocation27_spill] sm:$0xff] %v5935_v48 }
 0x1da   : > { %v5937_v50 = vpop.f32.mrf.mxu1  ;;  %4951 = vmatmul.mubr.msk.bf16.gmra.mxu1 %vm744_vm5, %v5557_v38 }
 0x1db   : > { %7473 = vst [vmem:[#allocation28_spill] sm:$0xff] %v5937_v50 }
 0x1dc   : > { %v5945_v37 = vpop.f32.mrf.mxu1  ;;  %4809 = vmatmul.mubr.msk.bf16.vlgmr.msra.gmra.mxu0 %vm744_vm5, %v5632_v13 }
 0x1dd   : > { %7474 = vst [vmem:[#allocation29_spill] sm:$0xff] %v5945_v37  ;;  %4879 = vmatpush3.bf16.msra.mxu0 %v2427_v53  ;;  %4812 = vmatprep.mubr.msk.bf16.mxu0 %vm744_vm5, %v5647_v23 }
 0x1de   : > { %v5951_v54 = vpop.f32.mrf.mxu1  ;;  %4880 = vmatprep.subr.bf16.mxu0 %v5274_v36 }
 0x1df   : > { %7475 = vst [vmem:[#allocation30_spill] sm:$0xff] %v5951_v54 }
 0x1e0   : > { %v5956_v57 = vpop.f32.mrf.mxu1 }
 0x1e1   : > { %7476 = vst [vmem:[#allocation31_spill] sm:$0xff] %v5956_v57  ;;  %4881 = vmatpush3.bf16.msra.mxu0 %v5274_v36 }
 0x1e2   : > { %v4772_v38 = vpop.f32.mrf.mxu1  ;;  %4882 = vmatprep.subr.bf16.mxu0 %v5275_v55 }
 0x1e3   : > { %3580 = vrot.lane.b32.xlu0 %v4772_v38, %s5324_s23 }
 0x1e4   : > { %v1780_v58 = vpop.f32.mrf.mxu1  ;;  %4813 = vmatmul.mubr.msk.bf16.gmra.mxu0 %vm744_vm5, %v5671_v46 }
 0x1e5   : > { %4816 = vmatprep.mubr.msk.bf16.mxu0 %vm744_vm5, %v5680_v49  ;;  %4883 = vmatpush3.bf16.msra.mxu0 %v5275_v55 }
 0x1e6   : > { %v4773_v60 = vpop.f32.mrf.mxu1 }
 0x1e7   : > { %3576 = vrot.lane.b32.xlu0 %v1780_v58, %s5324_s23  ;;  %3582 = vrot.lane.b32.xlu1 %v4773_v60, %s5324_s23 }
 0x1e8   : > { %v1783_v0 = vpop.f32.mrf.mxu1 }
 0x1ea   : > { %v4776_v1 = vpop.f32.mrf.mxu1 }
 0x1eb   : > { %3578 = vrot.lane.b32.xlu1 %v1783_v0, %s5324_s23  ;;  %3588 = vrot.lane.b32.xlu0 %v4776_v1, %s5324_s23 }
 0x1ec   : > { %v1796_v5 = vpop.f32.mrf.mxu1  ;;  %4817 = vmatmul.mubr.msk.bf16.gmra.mxu0 %vm744_vm5, %v5701_v59 }
 0x1ed   : > { %4820 = vmatprep.mubr.msk.bf16.mxu0 %vm744_vm5, %v5705_v62 }
 0x1ee   : > { %v4777_v4 = vpop.f32.mrf.mxu1 }
 0x1ef   : > { %3584 = vrot.lane.b32.xlu0 %v1796_v5, %s5324_s23  ;;  %3590 = vrot.lane.b32.xlu1 %v4777_v4, %s5324_s23 }
 0x1f0   : > { %v1799_v8 = vpop.f32.mrf.mxu1 }
 0x1f2   : > { %v4780_v9 = vpop.f32.mrf.mxu1 }
 0x1f3   : > { %3586 = vrot.lane.b32.xlu1 %v1799_v8, %s5324_s23  ;;  %3596 = vrot.lane.b32.xlu0 %v4780_v9, %s5324_s23 }
 0x1f4   : > { %v1812_v7 = vpop.f32.mrf.mxu1  ;;  %4821 = vmatmul.mubr.msk.bf16.gmra.mxu0 %vm744_vm5, %v5721_v6 }
 0x1f5   : > { %4824 = vmatprep.mubr.msk.bf16.mxu0 %vm744_vm5, %v5725_v10 }
 0x1f6   : > { %v4781_v53 = vpop.f32.mrf.mxu1 }
 0x1f7   : > { %3592 = vrot.lane.b32.xlu0 %v1812_v7, %s5324_s23  ;;  %3598 = vrot.lane.b32.xlu1 %v4781_v53, %s5324_s23 }
 0x1f8   : > { %v1815_v36 = vpop.f32.mrf.mxu1 }
 0x1fa   : > { %v4784_v55 = vpop.f32.mrf.mxu1 }
 0x1fb   : > { %3594 = vrot.lane.b32.xlu1 %v1815_v36, %s5324_s23  ;;  %3604 = vrot.lane.b32.xlu0 %v4784_v55, %s5324_s23 }
 0x1fc   : > { %v1828_v38 = vpop.f32.mrf.mxu1  ;;  %4825 = vmatmul.mubr.msk.bf16.gmra.mxu0 %vm744_vm5, %v5741_v22 }
 0x1fd   : > { %4828 = vmatprep.mubr.msk.bf16.mxu0 %vm744_vm5, %v5745_v27 }
 0x1fe   : > { %v4785_v58 = vpop.f32.mrf.mxu1 }
 0x1ff   : > { %3600 = vrot.lane.b32.xlu0 %v1828_v38, %s5324_s23  ;;  %3606 = vrot.lane.b32.xlu1 %v4785_v58, %s5324_s23 }
 0x200   : > { %v1831_v60 = vpop.f32.mrf.mxu1 }
 0x202   : > { %v4788_v0 = vpop.f32.mrf.mxu1 }
 0x203   : > { %3602 = vrot.lane.b32.xlu1 %v1831_v60, %s5324_s23  ;;  %3612 = vrot.lane.b32.xlu0 %v4788_v0, %s5324_s23 }
 0x204   : > { %v1844_v1 = vpop.f32.mrf.mxu1  ;;  %4829 = vmatmul.mubr.msk.bf16.gmra.mxu0 %vm744_vm5, %v5761_v42 }
 0x205   : > { %4832 = vmatprep.mubr.msk.bf16.mxu0 %vm744_vm5, %v5765_v51 }
 0x206   : > { %v4789_v5 = vpop.f32.mrf.mxu1 }
 0x207   : > { %3608 = vrot.lane.b32.xlu0 %v1844_v1, %s5324_s23  ;;  %3614 = vrot.lane.b32.xlu1 %v4789_v5, %s5324_s23 }
 0x208   : > { %v1847_v4 = vpop.f32.mrf.mxu1 }
 0x20a   : > { %v4792_v8 = vpop.f32.mrf.mxu1 }
 0x20b   : > { %3610 = vrot.lane.b32.xlu1 %v1847_v4, %s5324_s23  ;;  %3620 = vrot.lane.b32.xlu0 %v4792_v8, %s5324_s23 }
 0x20c   : > { %v1860_v9 = vpop.f32.mrf.mxu1  ;;  %4833 = vmatmul.mubr.msk.bf16.gmra.mxu0 %vm744_vm5, %v5781_v61 }
 0x20d   : > { %4836 = vmatprep.mubr.msk.bf16.mxu0 %vm744_vm5, %v5783_v63 }
 0x20e   : > { %v4793_v7 = vpop.f32.mrf.mxu1 }
 0x20f   : > { %3616 = vrot.lane.b32.xlu0 %v1860_v9, %s5324_s23  ;;  %3622 = vrot.lane.b32.xlu1 %v4793_v7, %s5324_s23 }
 0x210   : > { %v1863_v53 = vpop.f32.mrf.mxu1 }
 0x212   : > { %v4796_v36 = vpop.f32.mrf.mxu1 }
 0x213   : > { %3618 = vrot.lane.b32.xlu1 %v1863_v53, %s5324_s23  ;;  %3628 = vrot.lane.b32.xlu0 %v4796_v36, %s5324_s23 }
 0x214   : > { %v1876_v55 = vpop.f32.mrf.mxu1  ;;  %4837 = vmatmul.mubr.msk.bf16.gmra.mxu0 %vm744_vm5, %v5795_v2 }
 0x215   : > { %4884 = vmatprep.mubr.msk.bf16.mxu0 %vm744_vm5, %v5630_v12 }
 0x216   : > { %v4797_v38 = vpop.f32.mrf.mxu1 }
 0x217   : > { %3624 = vrot.lane.b32.xlu0 %v1876_v55, %s5324_s23  ;;  %3630 = vrot.lane.b32.xlu1 %v4797_v38, %s5324_s23 }
 0x218   : > { %v1879_v58 = vpop.f32.mrf.mxu1 }
 0x21a   : > { %v4800_v60 = vpop.f32.mrf.mxu1 }
 0x21b   : > { %3626 = vrot.lane.b32.xlu1 %v1879_v58, %s5324_s23  ;;  %3636 = vrot.lane.b32.xlu0 %v4800_v60, %s5324_s23 }
 0x21c   : > { %v1892_v0 = vpop.f32.mrf.mxu1  ;;  %v6015_v1 = vpop.f32.mrf.mxu0  ;;  %4885 = vmatmul.mubr.msk.bf16.vlgmr.msra.gmra.mxu0 %vm744_vm5, %v5632_v13 }
 0x21d   : > { %4888 = vmatprep.mubr.msk.bf16.mxu0 %vm744_vm5, %v5647_v23 }
 0x21e   : > { %v4801_v12 = vpop.f32.mrf.mxu1  ;;  %v6021_v5 = vpop.f32.mrf.mxu0 }
 0x21f   : > { %3632 = vrot.lane.b32.xlu0 %v1892_v0, %s5324_s23  ;;  %3638 = vrot.lane.b32.xlu1 %v4801_v12, %s5324_s23 }
 0x220   : > { %v1895_v4 = vpop.f32.mrf.mxu1  ;;  %v6025_v8 = vpop.f32.mrf.mxu0 }
 0x222   : > { %v4848_v9 = vpop.f32.mrf.mxu1  ;;  %v6027_v7 = vpop.f32.mrf.mxu0 }
 0x223   : > { %3634 = vrot.lane.b32.xlu1 %v1895_v4, %s5324_s23  ;;  %3708 = vrot.lane.b32.xlu0 %v4848_v9, %s5323_s21 }
 0x224   : > { %v2278_v13 = vpop.f32.mrf.mxu1  ;;  %v6031_v53 = vpop.f32.mrf.mxu0  ;;  %4889 = vmatmul.mubr.msk.bf16.gmra.mxu0 %vm744_vm5, %v5671_v46 }
 0x225   : > { %4892 = vmatprep.mubr.msk.bf16.mxu0 %vm744_vm5, %v5680_v49 }
 0x226   : > { %v4849_v23 = vpop.f32.mrf.mxu1  ;;  %v6037_v36 = vpop.f32.mrf.mxu0 }
 0x227   : > { %3704 = vrot.lane.b32.xlu0 %v2278_v13, %s5323_s21  ;;  %3710 = vrot.lane.b32.xlu1 %v4849_v23, %s5323_s21 }
 0x228   : > { %v2281_v55 = vpop.f32.mrf.mxu1  ;;  %v6041_v38 = vpop.f32.mrf.mxu0 }
 0x22a   : > { %v4852_v58 = vpop.f32.mrf.mxu1  ;;  %v6043_v60 = vpop.f32.mrf.mxu0 }
 0x22b   : > { %3706 = vrot.lane.b32.xlu1 %v2281_v55, %s5323_s21  ;;  %3716 = vrot.lane.b32.xlu0 %v4852_v58, %s5323_s21 }
 0x22c   : > { %v2294_v46 = vpop.f32.mrf.mxu1  ;;  %v6047_v0 = vpop.f32.mrf.mxu0  ;;  %4893 = vmatmul.mubr.msk.bf16.gmra.mxu0 %vm744_vm5, %v5701_v59 }
 0x22d   : > { %4896 = vmatprep.mubr.msk.bf16.mxu0 %vm744_vm5, %v5705_v62 }
 0x22e   : > { %v4853_v49 = vpop.f32.mrf.mxu1  ;;  %v6053_v12 = vpop.f32.mrf.mxu0 }
 0x22f   : > { %3712 = vrot.lane.b32.xlu0 %v2294_v46, %s5323_s21  ;;  %3718 = vrot.lane.b32.xlu1 %v4853_v49, %s5323_s21 }
 0x230   : > { %v2297_v4 = vpop.f32.mrf.mxu1  ;;  %v6057_v9 = vpop.f32.mrf.mxu0 }
 0x232   : > { %v4856_v13 = vpop.f32.mrf.mxu1  ;;  %v6059_v23 = vpop.f32.mrf.mxu0 }
 0x233   : > { %3714 = vrot.lane.b32.xlu1 %v2297_v4, %s5323_s21  ;;  %3724 = vrot.lane.b32.xlu0 %v4856_v13, %s5323_s21 }
 0x234   : > { %v2310_v59 = vpop.f32.mrf.mxu1  ;;  %v6063_v55 = vpop.f32.mrf.mxu0  ;;  %4897 = vmatmul.mubr.msk.bf16.gmra.mxu0 %vm744_vm5, %v5721_v6 }
 0x235   : > { %4900 = vmatprep.mubr.msk.bf16.mxu0 %vm744_vm5, %v5725_v10 }
 0x236   : > { %v4857_v62 = vpop.f32.mrf.mxu1  ;;  %v6069_v58 = vpop.f32.mrf.mxu0 }
 0x237   : > { %3720 = vrot.lane.b32.xlu0 %v2310_v59, %s5323_s21  ;;  %3726 = vrot.lane.b32.xlu1 %v4857_v62, %s5323_s21 }
 0x238   : > { %v2313_v46 = vpop.f32.mrf.mxu1  ;;  %v6073_v49 = vpop.f32.mrf.mxu0 }
 0x23a   : > { %v4860_v4 = vpop.f32.mrf.mxu1  ;;  %v6075_v13 = vpop.f32.mrf.mxu0 }
 0x23b   : > { %3722 = vrot.lane.b32.xlu1 %v2313_v46, %s5323_s21  ;;  %3732 = vrot.lane.b32.xlu0 %v4860_v4, %s5323_s21 }
 0x23c   : > { %v2326_v6 = vpop.f32.mrf.mxu1  ;;  %v6079_v56 = vpop.f32.mrf.mxu0  ;;  %4901 = vmatmul.mubr.msk.bf16.gmra.mxu0 %vm744_vm5, %v5741_v22 }
 0x23d   : > { %4904 = vmatprep.mubr.msk.bf16.mxu0 %vm744_vm5, %v5745_v27 }
 0x23e   : > { %v4861_v10 = vpop.f32.mrf.mxu1  ;;  %v6085_v59 = vpop.f32.mrf.mxu0 }
 0x23f   : > { %3728 = vrot.lane.b32.xlu0 %v2326_v6, %s5323_s21  ;;  %3734 = vrot.lane.b32.xlu1 %v4861_v10, %s5323_s21  ;;  %v565_v10 = vadd.f32 1e-08, %v5803_v3 }
 0x240   : > { %v2329_v62 = vpop.f32.mrf.mxu1  ;;  %v6089_v46 = vpop.f32.mrf.mxu0 }
 0x241   : > { %5292 = vrsqrt.f32 %v565_v10 }
 0x242   : > { %v4864_v4 = vpop.f32.mrf.mxu1  ;;  %v6091_v50 = vpop.f32.mrf.mxu0 }
 0x243   : > { %3730 = vrot.lane.b32.xlu1 %v2329_v62, %s5323_s21  ;;  %3740 = vrot.lane.b32.xlu0 %v4864_v4, %s5323_s21 }
 0x244   : > { %v2342_v22 = vpop.f32.mrf.mxu1  ;;  %v6095_v54 = vpop.f32.mrf.mxu0  ;;  %4905 = vmatmul.mubr.msk.bf16.gmra.mxu0 %vm744_vm5, %v5761_v42 }
 0x245   : > { %4908 = vmatprep.mubr.msk.bf16.mxu0 %vm744_vm5, %v5765_v51 }
 0x246   : > { %v4865_v27 = vpop.f32.mrf.mxu1  ;;  %v6101_v6 = vpop.f32.mrf.mxu0 }
 0x247   : > { %3736 = vrot.lane.b32.xlu0 %v2342_v22, %s5323_s21  ;;  %3742 = vrot.lane.b32.xlu1 %v4865_v27, %s5323_s21 }
 0x248   : > { %v2345_v62 = vpop.f32.mrf.mxu1  ;;  %v6106_v4 = vpop.f32.mrf.mxu0 }
 0x24a   : > { %v4868_v57 = vpop.f32.mrf.mxu1  ;;  %v6108_v48 = vpop.f32.mrf.mxu0 }
 0x24b   : > { %3738 = vrot.lane.b32.xlu1 %v2345_v62, %s5323_s21  ;;  %3748 = vrot.lane.b32.xlu0 %v4868_v57, %s5323_s21 }
 0x24c   : > { %v2358_v42 = vpop.f32.mrf.mxu1  ;;  %v6112_v51 = vpop.f32.mrf.mxu0  ;;  %4909 = vmatmul.mubr.msk.bf16.gmra.mxu0 %vm744_vm5, %v5781_v61 }
 0x24d   : > { %4912 = vmatprep.mubr.msk.bf16.mxu0 %vm744_vm5, %v5783_v63 }
 0x24e   : > { %v4869_v3 = vpop.f32.mrf.mxu1  ;;  %v6118_v22 = vpop.f32.mrf.mxu0 }
 0x24f   : > { %7477 = vst [vmem:[#allocation32_spill] sm:$0xff] %v6118_v22  ;;  %3744 = vrot.lane.b32.xlu0 %v2358_v42, %s5323_s21  ;;  %3750 = vrot.lane.b32.xlu1 %v4869_v3, %s5323_s21  ;;  %v5293_v35 = vpop.eup %5292 }
 0x250   : > { %v2361_v27 = vpop.f32.mrf.mxu1  ;;  %v6122_v10 = vpop.f32.mrf.mxu0 }
 0x251   : > { %7478 = vst [vmem:[#allocation33_spill] sm:$0xff] %v6122_v10 }
 0x252   : > { %v4872_v57 = vpop.f32.mrf.mxu1  ;;  %v6124_v62 = vpop.f32.mrf.mxu0 }
 0x253   : > { %7479 = vst [vmem:[#allocation34_spill] sm:$0xff] %v6124_v62  ;;  %3746 = vrot.lane.b32.xlu1 %v2361_v27, %s5323_s21  ;;  %3756 = vrot.lane.b32.xlu0 %v4872_v57, %s5323_s21 }
 0x254   : > { %v2374_v61 = vpop.f32.mrf.mxu1  ;;  %v6128_v37 = vpop.f32.mrf.mxu0  ;;  %4913 = vmatmul.mubr.msk.bf16.gmra.mxu0 %vm744_vm5, %v5795_v2  ;;  %v7485_v2 = vsub.s32 0, %v5605_v52  ;;  %v6160_v52 = vld [vmem:[%s7443_s7] ss:$0 sm:$0xff] }
 0x255   : > { %7480 = vst [vmem:[#allocation35_spill] sm:$0xff] %v6128_v37  ;;  %v6132_v63 = vpop.permute.xlu0 %3580 }
 0x256   : > { %v4873_v42 = vpop.f32.mrf.mxu1  ;;  %v6134_v3 = vpop.f32.mrf.mxu0  ;;  %v6148_v33 = vrot.slane %v5293_v35, %v7485_v2 }
 0x257   : > { %7481 = vst [vmem:[#allocation36_spill] sm:$0xff] %v6134_v3  ;;  %3752 = vrot.lane.b32.xlu0 %v2374_v61, %s5323_s21  ;;  %3758 = vrot.lane.b32.xlu1 %v4873_v42, %s5323_s21 }
 0x258   : > { %v2377_v34 = vpop.f32.mrf.mxu1  ;;  %v6138_v27 = vpop.f32.mrf.mxu0 }
 0x259   : > { %7482 = vst [vmem:[#allocation37_spill] sm:$0xff] %v6138_v27  ;;  %v6140_v57 = vpop.permute.xlu0 %3576  ;;  %v6142_v44 = vpop.permute.xlu1 %3582 }
 0x25a   : > { %7483 = vst [vmem:[#allocation38_spill] sm:$0xff] %v6142_v44  ;;  %v4876_v37 = vpop.f32.mrf.mxu1  ;;  %v6144_v45 = vpop.f32.mrf.mxu0 }
 0x25b   : > { %7484 = vst [vmem:[#allocation39_spill] sm:$0xff] %v6144_v45  ;;  %3754 = vrot.lane.b32.xlu1 %v2377_v34, %s5323_s21  ;;  %3764 = vrot.lane.b32.xlu0 %v4876_v37, %s5323_s21 }
 0x25c   : > { %v2390_v61 = vpop.f32.mrf.mxu1  ;;  %v4734_v42 = vpop.f32.mrf.mxu0 }
 0x25d   : > { %v6152_v3 = vpop.permute.xlu1 %3578  ;;  %v6154_v27 = vpop.permute.xlu0 %3588  ;;  %v1596_v32 = vmul.f32 %v4734_v42, %v6148_v33 }
 0x25e   : > { %7486 = vst [vmem:[#allocation40_spill] sm:$0xff] %v6152_v3  ;;  %7487 = vst [vmem:[#allocation41_spill] sm:$0xff] %v6154_v27  ;;  %v4877_v43 = vpop.f32.mrf.mxu1  ;;  %v1467_v41 = vpop.f32.mrf.mxu0 }
 0x25f   : > { %3760 = vrot.lane.b32.xlu0 %v2390_v61, %s5323_s21  ;;  %3766 = vrot.lane.b32.xlu1 %v4877_v43, %s5323_s21  ;;  %v1594_v34 = vmul.f32 %v1467_v41, %v6148_v33  ;;  %v1628_v35 = vadd.f32 %v6160_v52, %v1596_v32 }
 0x260   : > { %v2393_v37 = vpop.f32.mrf.mxu1  ;;  %v4735_v2 = vpop.f32.mrf.mxu0 }
 0x261   : > { %v6166_v45 = vpop.permute.xlu0 %3584  ;;  %v6168_v42 = vpop.permute.xlu1 %3590  ;;  %v1597_v31 = vmul.f32 %v4735_v2, %v6148_v33  ;;  %v1626_v62 = vadd.f32 %v6160_v52, %v1594_v34  ;;  %v1660_v43 = vmax.f32 %v1628_v35, 0.0 }
 0x262   : > { %7488 = vst [vmem:[#allocation42_spill] sm:$0xff] %v6166_v45  ;;  %7489 = vst [vmem:[#allocation43_spill] sm:$0xff] %v6168_v42  ;;  %v4924_v10 = vpop.f32.mrf.mxu1  ;;  %v1470_v30 = vpop.f32.mrf.mxu0 }
 0x263   : > { %v1629_v61 = vadd.f32 %v6160_v52, %v1597_v31  ;;  %3762 = vrot.lane.b32.xlu1 %v2393_v37, %s5323_s21  ;;  %3836 = vrot.lane.b32.xlu0 %v4924_v10, %s5325_s29  ;;  %v1595_v41 = vmul.f32 %v1470_v30, %v6148_v33  ;;  %v1658_v34 = vmax.f32 %v1626_v62, 0.0  ;;  %v1692_v10 = vmul.f32 1.4142135, %v1660_v43 }
 0x264   : > { %v4738_v32 = vpop.f32.mrf.mxu0  ;;  %v2776_v40 = vpop.f32.mrf.mxu1 }
 0x265   : > { %v1661_v39 = vmax.f32 %v1629_v61, 0.0  ;;  %v1627_v29 = vadd.f32 %v6160_v52, %v1595_v41  ;;  %v6177_v28 = vpop.permute.xlu1 %3586  ;;  %v6179_v2 = vpop.permute.xlu0 %3596  ;;  %v1600_v30 = vmul.f32 %v4738_v32, %v6148_v33  ;;  %v1690_v21 = vmul.f32 1.4142135, %v1658_v34 }
 0x266   : > { %7490 = vst [vmem:[#allocation44_spill] sm:$0xff] %v6177_v28  ;;  %7491 = vst [vmem:[#allocation45_spill] sm:$0xff] %v6179_v2  ;;  %v1483_v22 = vpop.f32.mrf.mxu0  ;;  %v4925_v26 = vpop.f32.mrf.mxu1 }
 0x267   : > { %v1693_v31 = vmul.f32 1.4142135, %v1661_v39  ;;  %v1659_v19 = vmax.f32 %v1627_v29, 0.0  ;;  %3832 = vrot.lane.b32.xlu0 %v2776_v40, %s5325_s29  ;;  %v1598_v62 = vmul.f32 %v1483_v22, %v6148_v33  ;;  %v1632_v32 = vadd.f32 %v6160_v52, %v1600_v30 }
 0x268   : > { %v4739_v35 = vpop.f32.mrf.mxu0  ;;  %v2779_v37 = vpop.f32.mrf.mxu1 }
 0x269   : > { %v1691_v25 = vmul.f32 1.4142135, %v1659_v19  ;;  %v6183_v61 = vpop.permute.xlu0 %3592  ;;  %v6185_v41 = vpop.permute.xlu1 %3598  ;;  %v1601_v24 = vmul.f32 %v4739_v35, %v6148_v33  ;;  %v4996_v39 = vpack.i.bf16 %v1693_v31, %v1692_v10  ;;  %v1630_v22 = vadd.f32 %v6160_v52, %v1598_v62 }
 0x26a   : > { %7492 = vst [vmem:[#allocation46_spill] sm:$0xff] %v6183_v61  ;;  %7493 = vst [vmem:[#allocation47_spill] sm:$0xff] %v6185_v41  ;;  %v1486_v2 = vpop.f32.mrf.mxu0  ;;  %v4928_v29 = vpop.f32.mrf.mxu1  ;;  %v1664_v10 = vmax.f32 %v1632_v32, 0.0 }
 0x26b   : > { %v1633_v40 = vadd.f32 %v6160_v52, %v1601_v24  ;;  %v1599_v43 = vmul.f32 %v1486_v2, %v6148_v33  ;;  %4997 = vrot.lane.b32.xlu1 %v4996_v39, %s5324_s23  ;;  %v5001_v61 = vpack.i.bf16 %v1691_v25, %v1690_v21 }
 0x26c   : > { %v4742_v19 = vpop.f32.mrf.mxu0  ;;  %v2792_v17 = vpop.f32.mrf.mxu1 }
 0x26d   : > { %v1631_v41 = vadd.f32 %v6160_v52, %v1599_v43  ;;  %v6194_v35 = vpop.permute.xlu1 %3594  ;;  %v6196_v34 = vpop.permute.xlu0 %3604  ;;  %v1665_v31 = vmax.f32 %v1633_v40, 0.0  ;;  %5002 = vrot.lane.b32.xlu0 %v5001_v61, %s5324_s23  ;;  %v1696_v61 = vmul.f32 1.4142135, %v1664_v10  ;;  %v1604_v32 = vmul.f32 %v4742_v19, %v6148_v33 }
 0x26e   : > { %7494 = vst [vmem:[#allocation48_spill] sm:$0xff] %v6194_v35  ;;  %7495 = vst [vmem:[#allocation49_spill] sm:$0xff] %v6196_v34  ;;  %v1499_v24 = vpop.f32.mrf.mxu0  ;;  %v4929_v2 = vpop.f32.mrf.mxu1  ;;  %v1662_v35 = vmax.f32 %v1630_v22, 0.0 }
 0x26f   : > { %v1663_v30 = vmax.f32 %v1631_v41, 0.0  ;;  %3838 = vrot.lane.b32.xlu1 %v4925_v26, %s5325_s29  ;;  %v1697_v28 = vmul.f32 1.4142135, %v1665_v31  ;;  %v1602_v31 = vmul.f32 %v1499_v24, %v6148_v33 }
 0x270   : > { %v4743_v39 = vpop.f32.mrf.mxu0  ;;  %v2795_v21 = vpop.f32.mrf.mxu1  ;;  %v1694_v22 = vmul.f32 1.4142135, %v1662_v35 }
 0x271   : > { %v6201_v25 = vpop.permute.xlu0 %3600  ;;  %v6203_v43 = vpop.permute.xlu1 %3606  ;;  %v1605_v34 = vmul.f32 %v4743_v39, %v6148_v33  ;;  %3844 = vrot.lane.b32.xlu0 %v4928_v29, %s5325_s29  ;;  %v1695_v40 = vmul.f32 1.4142135, %v1663_v30  ;;  %v5006_v30 = vpack.i.bf16 %v1697_v28, %v1696_v61  ;;  %v1636_v39 = vadd.f32 %v6160_v52, %v1604_v32 }
 0x272   : > { %7496 = vst [vmem:[#allocation50_spill] sm:$0xff] %v6201_v25  ;;  %7497 = vst [vmem:[#allocation51_spill] sm:$0xff] %v6203_v43  ;;  %v1502_v62 = vpop.f32.mrf.mxu0  ;;  %v4932_v16 = vpop.f32.mrf.mxu1 }
 0x273   : > { %v1603_v41 = vmul.f32 %v1502_v62, %v6148_v33  ;;  %3834 = vrot.lane.b32.xlu1 %v2779_v37, %s5325_s29  ;;  %v1637_v29 = vadd.f32 %v6160_v52, %v1605_v34  ;;  %v1634_v34 = vadd.f32 %v6160_v52, %v1602_v31  ;;  %v1668_v28 = vmax.f32 %v1636_v39, 0.0 }
 0x274   : > { %v4746_v26 = vpop.f32.mrf.mxu0  ;;  %v2808_v19 = vpop.f32.mrf.mxu1 }
 0x275   : > { %v6210_v25 = vpop.permute.xlu1 %3602  ;;  %v6212_v43 = vpop.permute.xlu0 %3612  ;;  %3840 = vrot.lane.b32.xlu0 %v2792_v17, %s5325_s29  ;;  %v1635_v37 = vadd.f32 %v6160_v52, %v1603_v41  ;;  %v1669_v24 = vmax.f32 %v1637_v29, 0.0  ;;  %v1700_v29 = vmul.f32 1.4142135, %v1668_v28  ;;  %v1608_v39 = vmul.f32 %v4746_v26, %v6148_v33 }
 0x276   : > { %7498 = vst [vmem:[#allocation52_spill] sm:$0xff] %v6210_v25  ;;  %7499 = vst [vmem:[#allocation53_spill] sm:$0xff] %v6212_v43  ;;  %v1515_v10 = vpop.f32.mrf.mxu0  ;;  %v5011_v25 = vpack.i.bf16 %v1695_v40, %v1694_v22  ;;  %v4933_v42 = vpop.f32.mrf.mxu1  ;;  %v1666_v22 = vmax.f32 %v1634_v34, 0.0 }
 0x277   : > { %5007 = vrot.lane.b32.xlu1 %v5006_v30, %s5324_s23  ;;  %v1667_v61 = vmax.f32 %v1635_v37, 0.0 }
 0x278   : > { %v4747_v62 = vpop.f32.mrf.mxu0  ;;  %v2811_v41 = vpop.f32.mrf.mxu1  ;;  %v1698_v34 = vmul.f32 1.4142135, %v1666_v22 }
 0x279   : > { %v6220_v43 = vpop.permute.xlu0 %3608  ;;  %v6222_v35 = vpop.permute.xlu1 %3614  ;;  %5012 = vrot.lane.b32.xlu0 %v5011_v25, %s5324_s23  ;;  %v1699_v25 = vmul.f32 1.4142135, %v1667_v61 }
 0x27a   : > { %7500 = vst [vmem:[#allocation54_spill] sm:$0xff] %v6220_v43  ;;  %7501 = vst [vmem:[#allocation55_spill] sm:$0xff] %v6222_v35  ;;  %v1518_v17 = vpop.f32.mrf.mxu0  ;;  %v1701_v43 = vmul.f32 1.4142135, %v1669_v24  ;;  %v1609_v35 = vmul.f32 %v4747_v62, %v6148_v33  ;;  %v4936_v20 = vpop.f32.mrf.mxu1  ;;  %v1606_v62 = vmul.f32 %v1515_v10, %v6148_v33 }
 0x27b   : > { %3846 = vrot.lane.b32.xlu1 %v4929_v2, %s5325_s29  ;;  %v1607_v37 = vmul.f32 %v1518_v17, %v6148_v33  ;;  %v1640_v17 = vadd.f32 %v6160_v52, %v1608_v39 }
 0x27c   : > { %v4750_v32 = vpop.f32.mrf.mxu0  ;;  %v5016_v28 = vpack.i.bf16 %v1701_v43, %v1700_v29  ;;  %v2824_v26 = vpop.f32.mrf.mxu1 }
 0x27d   : > { %v6227_v30 = vpop.permute.xlu1 %3610  ;;  %v6229_v40 = vpop.permute.xlu0 %3620  ;;  %3852 = vrot.lane.b32.xlu0 %v4932_v16, %s5325_s29  ;;  %v1641_v16 = vadd.f32 %v6160_v52, %v1609_v35  ;;  %v1638_v35 = vadd.f32 %v6160_v52, %v1606_v62  ;;  %v1672_v29 = vmax.f32 %v1640_v17, 0.0  ;;  %v1612_v17 = vmul.f32 %v4750_v32, %v6148_v33 }
 0x27e   : > { %7502 = vst [vmem:[#allocation56_spill] sm:$0xff] %v6227_v30  ;;  %7503 = vst [vmem:[#allocation57_spill] sm:$0xff] %v6229_v40  ;;  %v1531_v31 = vpop.f32.mrf.mxu0 }
 0x27f   : > { %3842 = vrot.lane.b32.xlu1 %v2795_v21, %s5325_s29  ;;  %v1639_v21 = vadd.f32 %v6160_v52, %v1607_v37 }
 0x280   : > { %v4751_v2 = vpop.f32.mrf.mxu0 }
 0x281   : > { %v6236_v30 = vpop.permute.xlu0 %3616  ;;  %v6238_v40 = vpop.permute.xlu1 %3622  ;;  %3848 = vrot.lane.b32.xlu0 %v2808_v19, %s5325_s29  ;;  %v1673_v19 = vmax.f32 %v1641_v16, 0.0  ;;  %v1671_v39 = vmax.f32 %v1639_v21, 0.0  ;;  %v1613_v62 = vmul.f32 %v4751_v2, %v6148_v33  ;;  %v1704_v16 = vmul.f32 1.4142135, %v1672_v29 }
 0x282   : > { %7504 = vst [vmem:[#allocation58_spill] sm:$0xff] %v6236_v30  ;;  %7505 = vst [vmem:[#allocation59_spill] sm:$0xff] %v6238_v40  ;;  %v1534_v24 = vpop.f32.mrf.mxu0  ;;  %v5021_v30 = vpack.i.bf16 %v1699_v25, %v1698_v34  ;;  %v4937_v40 = vpop.f32.mrf.mxu1  ;;  %v1610_v29 = vmul.f32 %v1531_v31, %v6148_v33  ;;  %v962_v31 = vmul.f32 %v6148_v33, %v6021_v5 }
 0x283   : > { %5017 = vrot.lane.b32.xlu1 %v5016_v28, %s5324_s23  ;;  %v1703_v45 = vmul.f32 1.4142135, %v1671_v39  ;;  %v1645_v39 = vadd.f32 %v6160_v52, %v1613_v62  ;;  %v968_v5 = vmul.f32 %v6031_v53, %v6148_v33 }
 0x284   : > { %v6246_v61 = vpop.f32.mrf.mxu0  ;;  %v6257_v28 = vpop.f32.mrf.mxu1 }
 0x285   : > { %v6248_v22 = vpop.permute.xlu1 %3618  ;;  %v6250_v10 = vpop.permute.xlu0 %3628  ;;  %5022 = vrot.lane.b32.xlu0 %v5021_v30, %s5324_s23  ;;  %v1007_v27 = vadd.f32 %v6160_v52, %v968_v5 }
 0x286   : > { %7506 = vst [vmem:[#allocation60_spill] sm:$0xff] %v6248_v22  ;;  %7507 = vst [vmem:[#allocation61_spill] sm:$0xff] %v6250_v10  ;;  %v6254_v43 = vpop.f32.mrf.mxu0  ;;  %v1670_v22 = vmax.f32 %v1638_v35, 0.0  ;;  %v1705_v10 = vmul.f32 1.4142135, %v1673_v19  ;;  %v964_v35 = vmul.f32 %v6015_v1, %v6148_v33 }
 0x287   : > { %3854 = vrot.lane.b32.xlu1 %v4933_v42, %s5325_s29  ;;  %v1611_v42 = vmul.f32 %v1534_v24, %v6148_v33 }
 0x288   : > { %v4755_v37 = vpop.f32.mrf.mxu0 }
 0x289   : > { %v6259_v25 = vpop.permute.xlu0 %3624  ;;  %v6261_v34 = vpop.permute.xlu1 %3630  ;;  %3860 = vrot.lane.b32.xlu0 %v4936_v20, %s5325_s29  ;;  %v1702_v20 = vmul.f32 1.4142135, %v1670_v22  ;;  %v1643_v15 = vadd.f32 %v6160_v52, %v1611_v42  ;;  %v1642_v42 = vadd.f32 %v6160_v52, %v1610_v29 }
 0x28a   : > { %7508 = vst [vmem:[#allocation62_spill] sm:$0xff] %v6259_v25  ;;  %7509 = vst [vmem:[#allocation63_spill] sm:$0xff] %v6261_v34  ;;  %v1550_v30 = vpop.f32.mrf.mxu0  ;;  %v4940_v25 = vpop.f32.mrf.mxu1  ;;  %v1644_v34 = vadd.f32 %v6160_v52, %v1612_v17  ;;  %v1003_v17 = vadd.f32 %v6160_v52, %v964_v35 }
 0x28b   : > { %3850 = vrot.lane.b32.xlu1 %v2811_v41, %s5325_s29  ;;  %v5026_v41 = vpack.i.bf16 %v1705_v10, %v1704_v16  ;;  %v963_v10 = vmul.f32 %v6148_v33, %v6027_v7  ;;  %v969_v7 = vmul.f32 %v6041_v38, %v6148_v33 }
 0x28c   : > { %v6268_v21 = vpop.f32.mrf.mxu0  ;;  %v2840_v24 = vpop.f32.mrf.mxu1  ;;  %v1676_v35 = vmax.f32 %v1644_v34, 0.0 }
 0x28d   : > { %v6272_v19 = vpop.permute.xlu1 %3626  ;;  %v6274_v2 = vpop.permute.xlu0 %3636  ;;  %3856 = vrot.lane.b32.xlu0 %v2824_v26, %s5325_s29  ;;  %v965_v26 = vmul.f32 %v6025_v8, %v6148_v33  ;;  %v966_v8 = vmul.f32 %v6148_v33, %v6037_v36  ;;  %v1002_v36 = vadd.f32 %v6160_v52, %v963_v10 }
 0x28e   : > { %7510 = vst [vmem:[#allocation64_spill] sm:$0xff] %v6272_v19  ;;  %7511 = vst [vmem:[#allocation65_spill] sm:$0xff] %v6274_v2  ;;  %v6279_v32 = vpop.f32.mrf.mxu0  ;;  %v5031_v2 = vpack.i.bf16 %v1703_v45, %v1702_v20  ;;  %v6286_v22 = vpop.f32.mrf.mxu1  ;;  %v1677_v45 = vmax.f32 %v1645_v39, 0.0  ;;  %v1001_v39 = vadd.f32 %v6160_v52, %v962_v31 }
 0x28f   : > { %5027 = vrot.lane.b32.xlu1 %v5026_v41, %s5324_s23  ;;  %v967_v41 = vmul.f32 %v6148_v33, %v6043_v60  ;;  %v1004_v53 = vadd.f32 %v6160_v52, %v965_v26  ;;  %v1674_v60 = vmax.f32 %v1642_v42, 0.0  ;;  %v1005_v31 = vadd.f32 %v6160_v52, %v966_v8 }
 0x290   : > { %v6284_v1 = vpop.f32.mrf.mxu0  ;;  %v1709_v34 = vmul.f32 1.4142135, %v1677_v45  ;;  %v1008_v26 = vadd.f32 %v6160_v52, %v969_v7  ;;  %v1615_v42 = vmul.f32 %v1550_v30, %v6148_v33  ;;  %v1033_v45 = vmax.f32 %v1001_v39, 0.0 }
 0x291   : > { %v6294_v62 = vpop.permute.xlu0 %3632  ;;  %v6296_v16 = vpop.permute.xlu1 %3638  ;;  %5032 = vrot.lane.b32.xlu0 %v5031_v2, %s5324_s23  ;;  %v1006_v10 = vadd.f32 %v6160_v52, %v967_v41  ;;  %v1036_v5 = vmax.f32 %v1004_v53, 0.0  ;;  %v1034_v8 = vmax.f32 %v1002_v36, 0.0  ;;  %v972_v7 = vmul.f32 %v6047_v0, %v6148_v33 }
 0x292   : > { %7512 = vst [vmem:[#allocation66_spill] sm:$0xff] %v6294_v62  ;;  %7513 = vst [vmem:[#allocation67_spill] sm:$0xff] %v6296_v16  ;;  %v6301_v20 = vpop.f32.mrf.mxu0  ;;  %v1675_v16 = vmax.f32 %v1643_v15, 0.0  ;;  %v6314_v2 = vpop.f32.mrf.mxu1  ;;  %v1035_v62 = vmax.f32 %v1003_v17, 0.0  ;;  %v1617_v15 = vmul.f32 %v4755_v37, %v6148_v33  ;;  %v1616_v17 = vmul.f32 %v6246_v61, %v6148_v33 }
 0x293   : > { %3862 = vrot.lane.b32.xlu1 %v4937_v40, %s5325_s29  ;;  %v1614_v61 = vmul.f32 %v6254_v43, %v6148_v33  ;;  %v1039_v0 = vmax.f32 %v1007_v27, 0.0  ;;  %v1037_v3 = vmax.f32 %v1005_v31, 0.0  ;;  %v1040_v14 = vmax.f32 %v1008_v26, 0.0 }
 0x294   : > { %v6312_v29 = vpop.f32.mrf.mxu0  ;;  %v1707_v18 = vmul.f32 1.4142135, %v1675_v16  ;;  %v1649_v30 = vadd.f32 %v6160_v52, %v1617_v15  ;;  %v6352_v36 = vmul.f32 1.4142135, %v1035_v62  ;;  %v1038_v44 = vmax.f32 %v1006_v10, 0.0 }
 0x295   : > { %v6319_v19 = vpop.permute.xlu1 %3634  ;;  %v6321_v38 = vpop.permute.xlu0 %3708  ;;  %3868 = vrot.lane.b32.xlu0 %v4940_v25, %s5325_s29  ;;  %v1647_v43 = vadd.f32 %v6160_v52, %v1615_v42  ;;  %v970_v27 = vmul.f32 %v6148_v33, %v6053_v12  ;;  %v6373_v26 = vmul.f32 1.4142135, %v1034_v8  ;;  %v1011_v10 = vadd.f32 %v6160_v52, %v972_v7 }
 0x296   : > { %7514 = vst [vmem:[#allocation68_spill] sm:$0xff] %v6319_v19  ;;  %v6325_v40 = vpop.f32.mrf.mxu0  ;;  %v1708_v19 = vmul.f32 1.4142135, %v1676_v35  ;;  %v4944_v25 = vpop.f32.mrf.mxu1  ;;  %v1706_v35 = vmul.f32 1.4142135, %v1674_v60  ;;  %v1648_v60 = vadd.f32 %v6160_v52, %v1616_v17  ;;  %v1646_v17 = vadd.f32 %v6160_v52, %v1614_v61 }
 0x297   : > { %3858 = vrot.lane.b32.xlu1 %v6257_v28, %s5325_s29  ;;  %v1681_v42 = vmax.f32 %v1649_v30, 0.0  ;;  %v6382_v12 = vmul.f32 1.4142135, %v1037_v3  ;;  %v976_v8 = vmul.f32 %v6063_v55, %v6148_v33  ;;  %v6390_v7 = vmul.f32 1.4142135, %v1038_v44 }
 0x298   : > { %v6336_v37 = vpop.f32.mrf.mxu0  ;;  %v5036_v39 = vpack.i.bf16 %v1709_v34, %v1708_v19  ;;  %v6350_v53 = vpop.f32.mrf.mxu1  ;;  %v6361_v19 = vmul.f32 1.4142135, %v1033_v45  ;;  %v6363_v34 = vmul.f32 1.4142135, %v1036_v5  ;;  %v6380_v5 = vmul.f32 1.4142135, %v1039_v0 }
 0x299   : > { %v6340_v41 = vpop.permute.xlu0 %3704  ;;  %v6342_v16 = vpop.permute.xlu1 %3710  ;;  %3864 = vrot.lane.b32.xlu0 %v2840_v24, %s5325_s29  ;;  %7517 = vst [vmem:[#allocation71_spill] sm:$0xff] %v6382_v12  ;;  %7519 = vst [vmem:[#allocation73_spill] sm:$0xff] %v6390_v7  ;;  %v1680_v61 = vmax.f32 %v1648_v60, 0.0  ;;  %v1679_v30 = vmax.f32 %v1647_v43, 0.0  ;;  %v1009_v3 = vadd.f32 %v6160_v52, %v970_v27  ;;  %v974_v55 = vmul.f32 %v6148_v33, %v6069_v58 }
 0x29a   : > { %7515 = vst [vmem:[#allocation69_spill] sm:$0xff] %v6342_v16  ;;  %v6348_v28 = vpop.f32.mrf.mxu0  ;;  %v5041_v16 = vpack.i.bf16 %v1707_v18, %v1706_v35  ;;  %v6359_v24 = vpop.f32.mrf.mxu1  ;;  %v973_v18 = vmul.f32 %v6057_v9, %v6148_v33  ;;  %7516 = vst [vmem:[#allocation70_spill] sm:$0xff] %v6380_v5  ;;  %v971_v9 = vmul.f32 %v6148_v33, %v6059_v23  ;;  %v6388_v35 = vmul.f32 1.4142135, %v1040_v14 }
 0x29b   : > { %5037 = vrot.lane.b32.xlu1 %v5036_v39, %s5324_s23  ;;  %v977_v14 = vmul.f32 %v6073_v49, %v6148_v33  ;;  %v1043_v60 = vmax.f32 %v1011_v10, 0.0  ;;  %v1713_v43 = vmul.f32 1.4142135, %v1681_v42  ;;  %v1621_v12 = vmul.f32 %v6284_v1, %v6148_v33 }
 0x29c   : > { %v6357_v15 = vpop.f32.mrf.mxu0  ;;  %7518 = vst [vmem:[#allocation72_spill] sm:$0xff] %v6388_v35  ;;  %v6396_v39 = vpop.f32.mrf.mxu1  ;;  %v1012_v23 = vadd.f32 %v6160_v52, %v973_v18  ;;  %v1010_v18 = vadd.f32 %v6160_v52, %v971_v9  ;;  %v1015_v58 = vadd.f32 %v6160_v52, %v976_v8  ;;  %v975_v49 = vmul.f32 %v6148_v33, %v6075_v13 }
 0x29d   : > { %v6369_v62 = vpop.permute.xlu1 %3706  ;;  %v6371_v31 = vpop.permute.xlu0 %3716  ;;  %5042 = vrot.lane.b32.xlu0 %v5041_v16, %s5324_s23  ;;  %v980_v7 = vmul.f32 %v6079_v56, %v6148_v33  ;;  %v1712_v10 = vmul.f32 1.4142135, %v1680_v61  ;;  %v1620_v42 = vmul.f32 %v6268_v21, %v6148_v33  ;;  %v1619_v1 = vmul.f32 %v6301_v20, %v6148_v33 }
 0x29e   : > { %v6378_v45 = vpop.f32.mrf.mxu0  ;;  %v4948_v9 = vpop.f32.mrf.mxu1  ;;  %v1041_v8 = vmax.f32 %v1009_v3, 0.0  ;;  %v1044_v5 = vmax.f32 %v1012_v23, 0.0  ;;  %v1013_v13 = vadd.f32 %v6160_v52, %v974_v55  ;;  %v1016_v56 = vadd.f32 %v6160_v52, %v977_v14 }
 0x29f   : > { %3870 = vrot.lane.b32.xlu1 %v6286_v22, %s5325_s29  ;;  %v1678_v22 = vmax.f32 %v1646_v17, 0.0  ;;  %v1711_v17 = vmul.f32 1.4142135, %v1679_v30  ;;  %v5046_v35 = vpack.i.bf16 %v1713_v43, %v1712_v10  ;;  %v1618_v20 = vmul.f32 %v6279_v32, %v6148_v33 }
 0x2a0   : > { %v6394_v16 = vpop.f32.mrf.mxu0  ;;  %v6440_v23 = vmul.f32 1.4142135, %v1043_v60  ;;  %v1042_v55 = vmax.f32 %v1010_v18, 0.0  ;;  %v1014_v14 = vadd.f32 %v6160_v52, %v975_v49  ;;  %v1652_v32 = vadd.f32 %v6160_v52, %v1620_v42 }
 0x2a1   : > { %v6404_v44 = vpop.permute.xlu0 %3712  ;;  %v6406_v0 = vpop.permute.xlu1 %3718  ;;  %3876 = vrot.lane.b32.xlu0 %v4944_v25, %s5325_s29  ;;  %v1710_v21 = vmul.f32 1.4142135, %v1678_v22  ;;  %v1047_v22 = vmax.f32 %v1015_v58, 0.0  ;;  %v6451_v10 = vmul.f32 1.4142135, %v1041_v8  ;;  %v1045_v60 = vmax.f32 %v1013_v13, 0.0 }
 0x2a2   : > { %v6411_v27 = vpop.f32.mrf.mxu0  ;;  %7522 = vst [vmem:[#allocation76_spill] sm:$0xff] %v6440_v23  ;;  %v978_v18 = vmul.f32 %v6148_v33, %v6085_v59  ;;  %v1048_v42 = vmax.f32 %v1016_v56, 0.0  ;;  %v6465_v13 = vmul.f32 1.4142135, %v1042_v55  ;;  %v1684_v56 = vmax.f32 %v1652_v32, 0.0 }
 0x2a3   : > { %3866 = vrot.lane.b32.xlu1 %v6314_v2, %s5325_s29  ;;  %v1653_v2 = vadd.f32 %v6160_v52, %v1621_v12  ;;  %v5051_v43 = vpack.i.bf16 %v1711_v17, %v1710_v21  ;;  %v1651_v12 = vadd.f32 %v6160_v52, %v1619_v1  ;;  %7523 = vst [vmem:[#allocation77_spill] sm:$0xff] %v6451_v10  ;;  %v6461_v17 = vmul.f32 1.4142135, %v1044_v5 }
 0x2a4   : > { %v6425_v25 = vpop.f32.mrf.mxu0  ;;  %v1046_v21 = vmax.f32 %v1014_v14, 0.0  ;;  %v6471_v23 = vmul.f32 1.4142135, %v1047_v22  ;;  %v979_v5 = vmul.f32 %v6148_v33, %v6091_v50  ;;  %v6479_v55 = vmul.f32 1.4142135, %v1045_v60 }
 0x2a5   : > { %v6429_v61 = vpop.permute.xlu1 %3714  ;;  %v6431_v30 = vpop.permute.xlu0 %3724  ;;  %3872 = vrot.lane.b32.xlu0 %v6350_v53, %s5325_s29  ;;  %v1685_v1 = vmax.f32 %v1653_v2, 0.0  ;;  %v1622_v14 = vmul.f32 %v6325_v40, %v6148_v33  ;;  %v6489_v50 = vmul.f32 1.4142135, %v1048_v42  ;;  %v1624_v40 = vmul.f32 %v6312_v29, %v6148_v33 }
 0x2a6   : > { %7520 = vst [vmem:[#allocation74_spill] sm:$0xff] %v6429_v61  ;;  %7521 = vst [vmem:[#allocation75_spill] sm:$0xff] %v6431_v30  ;;  %v6438_v3 = vpop.f32.mrf.mxu0  ;;  %v1019_v61 = vadd.f32 %v6160_v52, %v980_v7  ;;  %v6444_v30 = vpop.f32.mrf.mxu1  ;;  %v981_v7 = vmul.f32 %v6089_v46, %v6148_v33  ;;  %v1623_v46 = vmul.f32 %v6348_v28, %v6148_v33 }
 0x2a7   : > { %5047 = vrot.lane.b32.xlu1 %v5046_v35, %s5324_s23  ;;  %v1650_v35 = vadd.f32 %v6160_v52, %v1618_v20  ;;  %7524 = vst [vmem:[#allocation78_spill] sm:$0xff] %v6471_v23  ;;  %v1683_v20 = vmax.f32 %v1651_v12, 0.0  ;;  %7525 = vst [vmem:[#allocation79_spill] sm:$0xff] %v6479_v55  ;;  %v1717_v12 = vmul.f32 1.4142135, %v1685_v1  ;;  %v984_v29 = vmul.f32 %v6095_v54, %v6148_v33 }
 0x2a8   : > { %v6449_v53 = vpop.f32.mrf.mxu0  ;;  %v1051_v59 = vmax.f32 %v1019_v61, 0.0  ;;  %v6469_v10 = vpop.f32.mrf.mxu1  ;;  %v1017_v61 = vadd.f32 %v6160_v52, %v978_v18  ;;  %v1020_v28 = vadd.f32 %v6160_v52, %v981_v7  ;;  %7526 = vst [vmem:[#allocation80_spill] sm:$0xff] %v6489_v50  ;;  %v6496_v18 = vmul.f32 1.4142135, %v1046_v21 }
 0x2a9   : > { %v6457_v49 = vpop.permute.xlu0 %3720  ;;  %v6459_v58 = vpop.permute.xlu1 %3726  ;;  %5052 = vrot.lane.b32.xlu0 %v5051_v43, %s5324_s23  ;;  %v1682_v32 = vmax.f32 %v1650_v35, 0.0  ;;  %v1655_v55 = vadd.f32 %v6160_v52, %v1623_v46  ;;  %v1018_v35 = vadd.f32 %v6160_v52, %v979_v5  ;;  %v1716_v1 = vmul.f32 1.4142135, %v1684_v56 }
 0x2aa   : > { %v1984_v8 = vpop.f32.mrf.mxu0  ;;  %7527 = vst [vmem:[#allocation81_spill] sm:$0xff] %v6496_v18  ;;  %v6498_v7 = vmul.f32 1.4142135, %v1051_v59  ;;  %v6503_v42 = vpop.f32.mrf.mxu1  ;;  %v1715_v23 = vmul.f32 1.4142135, %v1683_v20  ;;  %v1049_v21 = vmax.f32 %v1017_v61, 0.0  ;;  %v1654_v46 = vadd.f32 %v6160_v52, %v1622_v14 }
 0x2ab   : > { %3878 = vrot.lane.b32.xlu1 %v6359_v24, %s5325_s29  ;;  %v1625_v24 = vmul.f32 %v6336_v37, %v6148_v33  ;;  %v2093_v37 = vmul.f32 %v6411_v27, %v6148_v33  ;;  %v1052_v59 = vmax.f32 %v1020_v28, 0.0  ;;  %v1714_v56 = vmul.f32 1.4142135, %v1682_v32 }
 0x2ac   : > { %v6477_v2 = vpop.f32.mrf.mxu0  ;;  %7528 = vst [vmem:[#allocation82_spill] sm:$0xff] %v6498_v7  ;;  %v5056_v20 = vpack.i.bf16 %v1717_v12, %v1716_v1  ;;  %v1656_v28 = vadd.f32 %v6160_v52, %v1624_v40  ;;  %v1687_v54 = vmax.f32 %v1655_v55, 0.0  ;;  %v2094_v14 = vmul.f32 %v6357_v15, %v6148_v33  ;;  %v6529_v32 = vpop.f32.mrf.mxu1 }
 0x2ad   : > { %v6485_v22 = vpop.permute.xlu1 %3722  ;;  %v6487_v43 = vpop.permute.xlu0 %3732  ;;  %3884 = vrot.lane.b32.xlu0 %v4948_v9, %s5325_s29  ;;  %v1657_v27 = vadd.f32 %v6160_v52, %v1625_v24  ;;  %v2095_v18 = vmul.f32 %v6394_v16, %v6148_v33  ;;  %7529 = vst [vmem:[#allocation83_spill] sm:$0xff] %v6529_v32  ;;  %v1050_v12 = vmax.f32 %v1018_v35, 0.0  ;;  %v5061_v24 = vpack.i.bf16 %v1715_v23, %v1714_v56 }
 0x2ae   : > { %v6494_v60 = vpop.f32.mrf.mxu0  ;;  %v2125_v1 = vadd.f32 %v6160_v52, %v2093_v37  ;;  %v6536_v40 = vmul.f32 1.4142135, %v1049_v21  ;;  %v6538_v55 = vmul.f32 1.4142135, %v1052_v59  ;;  %v1686_v15 = vmax.f32 %v1654_v46, 0.0  ;;  %v2888_v32 = vpop.f32.mrf.mxu1 }
 0x2af   : > { %3874 = vrot.lane.b32.xlu1 %v6396_v39, %s5325_s29  ;;  %v2092_v39 = vmul.f32 %v6378_v45, %v6148_v33  ;;  %v2097_v45 = vmul.f32 %v1984_v8, %v6148_v33  ;;  %v2096_v16 = vmul.f32 %v6438_v3, %v6148_v33  ;;  %v6547_v23 = vadd.f32 %v6160_v52, %v984_v29 }
 0x2b0   : > { %v6510_v9 = vpop.f32.mrf.mxu0  ;;  %7530 = vst [vmem:[#allocation84_spill] sm:$0xff] %v6536_v40  ;;  %7531 = vst [vmem:[#allocation85_spill] sm:$0xff] %v6538_v55  ;;  %v982_v8 = vmul.f32 %v6148_v33, %v6101_v6  ;;  %v1689_v37 = vmax.f32 %v1657_v27, 0.0  ;;  %v1688_v46 = vmax.f32 %v1656_v28, 0.0  ;;  %v1719_v56 = vmul.f32 1.4142135, %v1687_v54 }
 0x2b1   : > { %v6515_v7 = vpop.permute.xlu0 %3728  ;;  %v6517_v5 = vpop.permute.xlu1 %3734  ;;  %3880 = vrot.lane.b32.xlu0 %v6444_v30, %s5325_s29  ;;  %v2124_v21 = vadd.f32 %v6160_v52, %v2092_v39  ;;  %v2126_v3 = vadd.f32 %v6160_v52, %v2094_v14  ;;  %v6555_v40 = vmul.f32 1.4142135, %v1050_v12  ;;  %v2157_v29 = vmax.f32 %v2125_v1, 0.0 }
 0x2b2   : > { %v2000_v61 = vpop.f32.mrf.mxu0  ;;  %v2129_v55 = vadd.f32 %v6160_v52, %v2097_v45  ;;  %v1718_v39 = vmul.f32 1.4142135, %v1686_v15  ;;  %v2098_v28 = vmul.f32 %v6425_v25, %v6148_v33  ;;  %v2128_v54 = vadd.f32 %v6160_v52, %v2096_v16 }
 0x2b3   : > { %5057 = vrot.lane.b32.xlu1 %v5056_v20, %s5324_s23  ;;  %v2127_v20 = vadd.f32 %v6160_v52, %v2095_v18  ;;  %7533 = vst [vmem:[#allocation87_spill] sm:$0xff] %v6555_v40  ;;  %v2101_v6 = vmul.f32 %v2000_v61, %v6148_v33  ;;  %v2099_v18 = vmul.f32 %v6449_v53, %v6148_v33  ;;  %v1721_v61 = vmul.f32 1.4142135, %v1689_v37 }
 0x2b4   : > { %v6534_v30 = vpop.f32.mrf.mxu0  ;;  %v2156_v1 = vmax.f32 %v2124_v21, 0.0  ;;  %v1720_v25 = vmul.f32 1.4142135, %v1688_v46  ;;  %v5071_v15 = vpack.i.bf16 %v1719_v56, %v1718_v39  ;;  %v2158_v16 = vmax.f32 %v2126_v3, 0.0  ;;  %v6578_v21 = vpop.f32.mrf.mxu1 }
 0x2b5   : > { %v6542_v50 = vpop.permute.xlu1 %3730  ;;  %v6544_v35 = vpop.permute.xlu0 %3740  ;;  %5062 = vrot.lane.b32.xlu0 %v5061_v24, %s5324_s23  ;;  %v2159_v40 = vmax.f32 %v2127_v20, 0.0  ;;  %v2161_v53 = vmax.f32 %v2129_v55, 0.0  ;;  %7536 = vst [vmem:[#allocation90_spill] sm:$0xff] %v6578_v21  ;;  %v2131_v46 = vadd.f32 %v6160_v52, %v2099_v18  ;;  %v2103_v56 = vmul.f32 %v6510_v9, %v6148_v33 }
 0x2b6   : > { %7532 = vst [vmem:[#allocation86_spill] sm:$0xff] %v6542_v50  ;;  %v2013_v59 = vpop.f32.mrf.mxu0  ;;  %v2189_v50 = vmul.f32 1.4142135, %v2157_v29  ;;  %v5066_v20 = vpack.i.bf16 %v1721_v61, %v1720_v25  ;;  %v2188_v29 = vmul.f32 1.4142135, %v2156_v1  ;;  %v2102_v9 = vmul.f32 %v6477_v2, %v6148_v33 }
 0x2b7   : > { %3886 = vrot.lane.b32.xlu1 %v6469_v10, %s5325_s29  ;;  %v2100_v10 = vmul.f32 %v6494_v60, %v6148_v33  ;;  %v2130_v60 = vadd.f32 %v6160_v52, %v2098_v28  ;;  %v6592_v28 = vadd.f32 %v6160_v52, %v982_v8  ;;  %v2191_v18 = vmul.f32 1.4142135, %v2159_v40 }
 0x2b8   : > { %v4823_v27 = vpop.f32.mrf.mxu0  ;;  %v2193_v24 = vmul.f32 1.4142135, %v2161_v53  ;;  %v2135_v8 = vadd.f32 %v6160_v52, %v2103_v56 }
 0x2b9   : > { %v6566_v14 = vpop.permute.xlu0 %3736  ;;  %v6568_v12 = vpop.permute.xlu1 %3742  ;;  %3888 = vrot.lane.b32.xlu0 %v2888_v32, %s5325_s29  ;;  %v2160_v32 = vmax.f32 %v2128_v54, 0.0  ;;  %v2190_v54 = vmul.f32 1.4142135, %v2158_v16 }
 0x2ba   : > { %7534 = vst [vmem:[#allocation88_spill] sm:$0xff] %v6566_v14  ;;  %7535 = vst [vmem:[#allocation89_spill] sm:$0xff] %v6568_v12  ;;  %v2016_v45 = vpop.f32.mrf.mxu0  ;;  %v2133_v14 = vadd.f32 %v6160_v52, %v2101_v6  ;;  %v2132_v6 = vadd.f32 %v6160_v52, %v2100_v10  ;;  %v2162_v10 = vmax.f32 %v2130_v60, 0.0  ;;  %v2134_v60 = vadd.f32 %v6160_v52, %v2102_v9 }
 0x2bb   : > { %v2105_v12 = vmul.f32 %v2016_v45, %v6148_v33  ;;  %3882 = vrot.lane.b32.xlu1 %v6503_v42, %s5325_s29  ;;  %v2104_v42 = vmul.f32 %v2013_v59, %v6148_v33  ;;  %v5081_v45 = vpack.i.bf16 %v2189_v50, %v2188_v29  ;;  %v2891_v59 = vpop.f32.mrf.mxu1  ;;  %v2192_v25 = vmul.f32 1.4142135, %v2160_v32 }
 0x2bc   : > { %v4826_v37 = vpop.f32.mrf.mxu0  ;;  %v2165_v21 = vmax.f32 %v2133_v14, 0.0  ;;  %v2164_v16 = vmax.f32 %v2132_v6, 0.0  ;;  %v2107_v50 = vmul.f32 %v4823_v27, %v6148_v33  ;;  %v5076_v53 = vpack.i.bf16 %v2191_v18, %v2190_v54 }
 0x2bd   : > { %v6584_v3 = vpop.permute.xlu1 %3738  ;;  %v6586_v55 = vpop.permute.xlu0 %3748  ;;  %5072 = vrot.lane.b32.xlu0 %v5071_v15, %s5324_s23  ;;  %v2137_v61 = vadd.f32 %v6160_v52, %v2105_v12  ;;  %v2163_v15 = vmax.f32 %v2131_v46, 0.0  ;;  %v2136_v2 = vadd.f32 %v6160_v52, %v2104_v42  ;;  %v2106_v32 = vmul.f32 %v6534_v30, %v6148_v33 }
 0x2be   : > { %7537 = vst [vmem:[#allocation91_spill] sm:$0xff] %v6584_v3  ;;  %v2029_v39 = vpop.f32.mrf.mxu0  ;;  %v5091_v56 = vpack.i.bf16 %v2193_v24, %v2192_v25  ;;  %v2194_v42 = vmul.f32 1.4142135, %v2162_v10  ;;  %v2196_v30 = vmul.f32 1.4142135, %v2164_v16  ;;  %v2139_v24 = vadd.f32 %v6160_v52, %v2107_v50 }
 0x2bf   : > { %5067 = vrot.lane.b32.xlu1 %v5066_v20, %s5324_s23  ;;  %v2108_v14 = vmul.f32 %v2029_v39, %v6148_v33  ;;  %v2197_v20 = vmul.f32 1.4142135, %v2165_v21  ;;  %v2169_v29 = vmax.f32 %v2137_v61, 0.0  ;;  %v2195_v39 = vmul.f32 1.4142135, %v2163_v15 }
 0x2c0   : > { %v4827_v1 = vpop.f32.mrf.mxu0  ;;  %v2110_v10 = vmul.f32 %v4826_v37, %v6148_v33  ;;  %v985_v50 = vmul.f32 %v6106_v4, %v6148_v33 }
 0x2c1   : > { %v6599_v3 = vpop.permute.xlu0 %3744  ;;  %v6601_v40 = vpop.permute.xlu1 %3750  ;;  %5082 = vrot.lane.b32.xlu0 %v5081_v45, %s5323_s21  ;;  %v2111_v6 = vmul.f32 %v4827_v1, %v6148_v33  ;;  %v2167_v45 = vmax.f32 %v2135_v8, 0.0  ;;  %v2140_v21 = vadd.f32 %v6160_v52, %v2108_v14  ;;  %v2166_v1 = vmax.f32 %v2134_v60, 0.0 }
 0x2c2   : > { %7538 = vst [vmem:[#allocation92_spill] sm:$0xff] %v6601_v40  ;;  %v2032_v12 = vpop.f32.mrf.mxu0  ;;  %v2168_v40 = vmax.f32 %v2136_v2, 0.0  ;;  %v5101_v15 = vpack.i.bf16 %v2197_v20, %v2196_v30  ;;  %v2201_v8 = vmul.f32 1.4142135, %v2169_v29  ;;  %v5086_v14 = vpack.i.bf16 %v2195_v39, %v2194_v42 }
 0x2c3   : > { %v2109_v46 = vmul.f32 %v2032_v12, %v6148_v33  ;;  %3890 = vrot.lane.b32.xlu1 %v2891_v59, %s5325_s29  ;;  %v2138_v59 = vadd.f32 %v6160_v52, %v2106_v32  ;;  %v2143_v12 = vadd.f32 %v6160_v52, %v2111_v6  ;;  %v2171_v20 = vmax.f32 %v2139_v24, 0.0 }
 0x2c4   : > { %v4830_v27 = vpop.f32.mrf.mxu0  ;;  %v2172_v29 = vmax.f32 %v2140_v21, 0.0  ;;  %v2142_v30 = vadd.f32 %v6160_v52, %v2110_v10  ;;  %v7539_v24 = vmax.f32 %v6547_v23, 0.0  ;;  %v1053_v10 = vmax.f32 %v6592_v28, 0.0 }
 0x2c5   : > { %v2141_v54 = vadd.f32 %v6160_v52, %v2109_v46  ;;  %v6614_v18 = vpop.permute.xlu1 %3746  ;;  %v6616_v9 = vpop.permute.xlu0 %3756  ;;  %5092 = vrot.lane.b32.xlu0 %v5091_v56, %s5323_s21  ;;  %v2199_v46 = vmul.f32 1.4142135, %v2167_v45  ;;  %v2200_v56 = vmul.f32 1.4142135, %v2168_v40  ;;  %v2114_v4 = vmul.f32 %v4830_v27, %v6148_v33 }
 0x2c6   : > { %v2045_v61 = vpop.f32.mrf.mxu0  ;;  %v2170_v39 = vmax.f32 %v2138_v59, 0.0  ;;  %v6641_v21 = vmul.f32 1.4142135, %v7539_v24  ;;  %v2204_v23 = vmul.f32 1.4142135, %v2172_v29 }
 0x2c7   : > { %v2112_v25 = vmul.f32 %v2045_v61, %v6148_v33  ;;  %v2173_v16 = vmax.f32 %v2141_v54, 0.0  ;;  %5077 = vrot.lane.b32.xlu1 %v5076_v53, %s5323_s21  ;;  %v2198_v54 = vmul.f32 1.4142135, %v2166_v1  ;;  %v5111_v45 = vpack.i.bf16 %v2201_v8, %v2200_v56 }
 0x2c8   : > { %v4831_v2 = vpop.f32.mrf.mxu0  ;;  %v2175_v61 = vmax.f32 %v2143_v12, 0.0  ;;  %v2203_v12 = vmul.f32 1.4142135, %v2171_v20 }
 0x2c9   : > { %v2144_v60 = vadd.f32 %v6160_v52, %v2112_v25  ;;  %v6629_v32 = vpop.permute.xlu0 %3752  ;;  %v6631_v37 = vpop.permute.xlu1 %3758  ;;  %v2115_v6 = vmul.f32 %v4831_v2, %v6148_v33  ;;  %5102 = vrot.lane.b32.xlu0 %v5101_v15, %s5323_s21  ;;  %v2205_v25 = vmul.f32 1.4142135, %v2173_v16  ;;  %v6646_v52 = vld [vmem:[%s7443_s7] ss:$0 sm:$0xff]  ;;  %v5096_v8 = vpack.i.bf16 %v2199_v46, %v2198_v54 }
 0x2ca   : > { %v2048_v53 = vpop.f32.mrf.mxu0 }
 0x2cb   : > { %v2113_v42 = vmul.f32 %v2048_v53, %v6148_v33  ;;  %5087 = vrot.lane.b32.xlu1 %v5086_v14, %s5323_s21  ;;  %v2176_v15 = vmax.f32 %v2144_v60, 0.0  ;;  %v2147_v27 = vadd.f32 %v6646_v52, %v2115_v6  ;;  %v2174_v14 = vmax.f32 %v2142_v30, 0.0 }
 0x2cc   : > { %v4834_v40 = vpop.f32.mrf.mxu0  ;;  %v2146_v60 = vadd.f32 %v6646_v52, %v2114_v4  ;;  %v2202_v53 = vmul.f32 1.4142135, %v2170_v39  ;;  %v5121_v24 = vpack.i.bf16 %v2205_v25, %v2204_v23  ;;  %v1024_v4 = vadd.f32 %v6646_v52, %v985_v50 }
 0x2cd   : > { %v2145_v1 = vadd.f32 %v6646_v52, %v2113_v42  ;;  %v6650_v59 = vpop.permute.xlu0 %3764  ;;  %v6653_v16 = vpop.permute.xlu1 %3754  ;;  %5112 = vrot.lane.b32.xlu0 %v5111_v45, %s5323_s21  ;;  %v2207_v42 = vmul.f32 1.4142135, %v2175_v61  ;;  %v2118_v28 = vmul.f32 %v4834_v40, %v6148_v33  ;;  %v2208_v20 = vmul.f32 1.4142135, %v2176_v15 }
 0x2ce   : > { %7540 = vst [vmem:[#allocation93_spill] sm:$0xff] %v6650_v59  ;;  %v2061_v2 = vpop.f32.mrf.mxu0  ;;  %v2179_v29 = vmax.f32 %v2147_v27, 0.0  ;;  %v983_v39 = vmul.f32 %v6148_v33, %v6108_v48  ;;  %v5106_v61 = vpack.i.bf16 %v2203_v12, %v2202_v53  ;;  %v6675_v50 = vmul.f32 1.4142135, %v1053_v10 }
 0x2cf   : > { %v2177_v56 = vmax.f32 %v2145_v1, 0.0  ;;  %v2116_v6 = vmul.f32 %v2061_v2, %v6148_v33  ;;  %5097 = vrot.lane.b32.xlu1 %v5096_v8, %s5323_s21  ;;  %v2206_v1 = vmul.f32 1.4142135, %v2174_v14  ;;  %v2178_v8 = vmax.f32 %v2146_v60, 0.0 }
 0x2d0   : > { %v4835_v46 = vpop.f32.mrf.mxu0  ;;  %v3930_v48 = vsel %vm414_vm1, %v5821_v47, %v6132_v63  ;;  %v2150_v12 = vadd.f32 %v6646_v52, %v2118_v28  ;;  %v2211_v10 = vmul.f32 1.4142135, %v2179_v29  ;;  %v6696_v29 = vadd.f32 %v6646_v52, %v983_v39 }
 0x2d1   : > { %v2209_v54 = vmul.f32 1.4142135, %v2177_v56  ;;  %v6661_v45 = vpop.permute.xlu0 %3760  ;;  %v2119_v30 = vmul.f32 %v4835_v46, %v6148_v33  ;;  %v2148_v25 = vadd.f32 %v6646_v52, %v2116_v6  ;;  %5122 = vrot.lane.b32.xlu0 %v5121_v24, %s5323_s21  ;;  %v6681_v23 = vpop.permute.xlu1 %3766  ;;  %v3962_v60 = vsel %vm598_vm7, %v3930_v48, %v6321_v38 }
 0x2d2   : > { %v2064_v40 = vpop.f32.mrf.mxu0  ;;  %v5116_v56 = vpack.i.bf16 %v2207_v42, %v2206_v1 }
 0x2d3   : > { %v5131_v15 = vpack.i.bf16 %v2209_v54, %v2208_v20  ;;  %v2151_v27 = vadd.f32 %v6646_v52, %v2119_v30  ;;  %v2117_v2 = vmul.f32 %v2064_v40, %v6148_v33  ;;  %5107 = vrot.lane.b32.xlu1 %v5106_v61, %s5323_s21  ;;  %v2180_v24 = vmax.f32 %v2148_v25, 0.0 }
 0x2d4   : > { %v4838_v14 = vpop.f32.mrf.mxu0  ;;  %v1056_v20 = vmax.f32 %v1024_v4, 0.0  ;;  %v2210_v54 = vmul.f32 1.4142135, %v2178_v8  ;;  %v3928_v30 = vsel %vm414_vm1, %v5830_v11, %v6140_v57  ;;  %v2182_v61 = vmax.f32 %v2150_v12, 0.0 }
 0x2d5   : > { %v3837_v6 = vpop.permute.xlu0 %3836  ;;  %v2122_v53 = vmul.f32 %v4838_v14, %v6148_v33  ;;  %v2183_v47 = vmax.f32 %v2151_v27, 0.0  ;;  %v2149_v63 = vadd.f32 %v6646_v52, %v2117_v2  ;;  %5132 = vrot.lane.b32.xlu0 %v5131_v15, %s5323_s21  ;;  %v3960_v40 = vsel %vm598_vm7, %v3928_v30, %v6340_v41  ;;  %v6706_v14 = vpop.permute.xlu1 %3762  ;;  %v7543_v30 = vld [vmem:[#allocation40_spill] sm:$0xff] }
 0x2d6   : > { %v3994_v28 = vsel %vm602_vm9, %v3962_v60, %v3837_v6  ;;  %v2077_v46 = vpop.f32.mrf.mxu0  ;;  %v5126_v1 = vpack.i.bf16 %v2211_v10, %v2210_v54  ;;  %v2212_v27 = vmul.f32 1.4142135, %v2180_v24  ;;  %v6711_v12 = vmul.f32 %v6112_v51, %v6148_v33  ;;  %v7541_v54 = vld [vmem:[#allocation38_spill] sm:$0xff] }
 0x2d7   : > { %4026 = vst.msk [vmem:[%s6673_s17 + $0x10] sm:$0xff] %vm606_vm11, %v3994_v28  ;;  %v2154_v38 = vadd.f32 %v6646_v52, %v2122_v53  ;;  %v2120_v42 = vmul.f32 %v2077_v46, %v6148_v33  ;;  %v2181_v25 = vmax.f32 %v2149_v63, 0.0  ;;  %5117 = vrot.lane.b32.xlu1 %v5116_v56, %s5323_s21  ;;  %v2215_v48 = vmul.f32 1.4142135, %v2183_v47 }
 0x2d8   : > { %v4839_v4 = vpop.f32.mrf.mxu0  ;;  %v6717_v10 = vmul.f32 1.4142135, %v1056_v20  ;;  %v2214_v6 = vmul.f32 1.4142135, %v2182_v61  ;;  %v1054_v63 = vmax.f32 %v6696_v29, 0.0  ;;  %v7544_v20 = vld [vmem:[#allocation3_spill] sm:$0xff] }
 0x2d9   : > { %v2152_v8 = vadd.f32 %v6646_v52, %v2120_v42  ;;  %v3833_v15 = vpop.permute.xlu0 %3832  ;;  %v2123_v39 = vmul.f32 %v4839_v4, %v6148_v33  ;;  %v2213_v2 = vmul.f32 1.4142135, %v2181_v25  ;;  %v2186_v60 = vmax.f32 %v2154_v38, 0.0  ;;  %v7542_v38 = vld [vmem:[#allocation2_spill] sm:$0xff]  ;;  %v7545_v25 = vld [vmem:[#allocation41_spill] sm:$0xff]  ;;  %v7546_v4 = vld [vmem:[#allocation4_spill] sm:$0xff] }
 0x2da   : > { %v3992_v11 = vsel %vm602_vm9, %v3960_v40, %v3833_v15  ;;  %v2080_v57 = vpop.f32.mrf.mxu0  ;;  %v3931_v42 = vsel %vm414_vm1, %v7542_v38, %v7541_v54  ;;  %v3929_v61 = vsel %vm414_vm1, %v7544_v20, %v7543_v30  ;;  %v3934_v40 = vsel %vm414_vm1, %v7546_v4, %v7545_v25  ;;  %v7548_v4 = vld [vmem:[#allocation42_spill] sm:$0xff] }
 0x2db   : > { %4024 = vst.msk [vmem:[%s6673_s17] sm:$0xff] %vm606_vm11, %v3992_v11  ;;  %v2155_v41 = vadd.f32 %v6646_v52, %v2123_v39  ;;  %v2121_v56 = vmul.f32 %v2080_v57, %v6148_v33  ;;  %v5141_v53 = vpack.i.bf16 %v2213_v2, %v2212_v27  ;;  %v2184_v24 = vmax.f32 %v2152_v8, 0.0  ;;  %5127 = vrot.lane.b32.xlu1 %v5126_v1, %s5323_s21  ;;  %v7547_v57 = vld [vmem:[#allocation69_spill] sm:$0xff] }
 0x2dc   : > { %v4886_v47 = vpop.f32.mrf.mxu0  ;;  %v5136_v1 = vpack.i.bf16 %v2215_v48, %v2214_v6  ;;  %v2218_v39 = vmul.f32 1.4142135, %v2186_v60 }
 0x2dd   : > { %v2187_v28 = vmax.f32 %v2155_v41, 0.0  ;;  %v2153_v51 = vadd.f32 %v6646_v52, %v2121_v56  ;;  %v2592_v46 = vmul.f32 %v4886_v47, %v6148_v33  ;;  %v4998_v8 = vpop.permute.xlu1 %4997  ;;  %5142 = vrot.lane.b32.xlu0 %v5141_v53, %s5323_s21  ;;  %v3963_v41 = vsel %vm598_vm7, %v3931_v42, %v7547_v57 }
 0x2de   : > { %v2463_v15 = vpop.f32.mrf.mxu0  ;;  %v5000_v11 = vunpack.i.h.bf16 %v4998_v8  ;;  %v2216_v56 = vmul.f32 1.4142135, %v2184_v24  ;;  %v4999_v47 = vunpack.i.l.bf16 %v4998_v8 }
 0x2df   : > { %v2219_v27 = vmul.f32 1.4142135, %v2187_v28  ;;  %v2185_v2 = vmax.f32 %v2153_v51, 0.0  ;;  %v2590_v54 = vmul.f32 %v2463_v15, %v6148_v33  ;;  %v5003_v38 = vpop.permute.xlu0 %5002  ;;  %5137 = vrot.lane.b32.xlu1 %v5136_v1, %s5323_s21  ;;  %v2624_v53 = vadd.f32 %v6646_v52, %v2592_v46  ;;  %v7549_v1 = vld [vmem:[#allocation5_spill] sm:$0xff] }
 0x2e0   : > { %v4887_v30 = vpop.f32.mrf.mxu0  ;;  %v6740_v60 = vsel %vm414_vm1, %v6363_v34, %v5000_v11  ;;  %v6744_v28 = vsel %vm414_vm1, %v6352_v36, %v4999_v47  ;;  %v5005_v51 = vunpack.i.h.bf16 %v5003_v38  ;;  %v5004_v42 = vunpack.i.l.bf16 %v5003_v38 }
 0x2e1   : > { %v5146_v48 = vpack.i.bf16 %v2219_v27, %v2218_v39  ;;  %v2217_v6 = vmul.f32 1.4142135, %v2185_v2  ;;  %v2622_v24 = vadd.f32 %v6646_v52, %v2590_v54  ;;  %v3839_v20 = vpop.permute.xlu1 %3838  ;;  %v3932_v8 = vsel %vm414_vm1, %v7549_v1, %v7548_v4  ;;  %v7553_v4 = vld [vmem:[#allocation7_spill] sm:$0xff] }
 0x2e2   : > { %v2466_v25 = vpop.f32.mrf.mxu0  ;;  %v2593_v46 = vmul.f32 %v4887_v30, %v6148_v33  ;;  %v3995_v34 = vsel %vm602_vm9, %v3963_v41, %v3839_v20  ;;  %v3966_v39 = vsel %vm598_vm7, %v3934_v40, %v6371_v31  ;;  %v6756_v36 = vsel %vm414_vm1, %v6373_v26, %v5005_v51 }
 0x2e3   : > { %v5151_v15 = vpack.i.bf16 %v2217_v6, %v2216_v56  ;;  %v6760_v27 = vsel %vm414_vm1, %v6361_v19, %v5004_v42  ;;  %4027 = vst.msk [vmem:[%s6673_s17 + $0x18] sm:$0xff] %vm606_vm11, %v3995_v34  ;;  %v2591_v2 = vmul.f32 %v2466_v25, %v6148_v33  ;;  %v3845_v11 = vpop.permute.xlu0 %3844  ;;  %5147 = vrot.lane.b32.xlu1 %v5146_v48, %s5323_s21  ;;  %v2656_v41 = vmax.f32 %v2624_v53, 0.0  ;;  %v7550_v56 = vld [vmem:[#allocation43_spill] sm:$0xff]  ;;  %v7551_v19 = vld [vmem:[#allocation6_spill] sm:$0xff]  ;;  %v7552_v25 = vld [vmem:[#allocation44_spill] sm:$0xff] }
 0x2e4   : > { %v4890_v57 = vpop.f32.mrf.mxu0  ;;  %v2625_v31 = vadd.f32 %v6646_v52, %v2593_v46  ;;  %v3998_v40 = vsel %vm602_vm9, %v3966_v39, %v3845_v11  ;;  %v3935_v47 = vsel %vm414_vm1, %v7551_v19, %v7550_v56  ;;  %v3961_v54 = vsel %vm598_vm7, %v3929_v61, %v6369_v62  ;;  %v7554_v62 = vld [vmem:[#allocation45_spill] sm:$0xff]  ;;  %v7555_v61 = vld [vmem:[#allocation8_spill] sm:$0xff] }
 0x2e5   : > { %v2596_v26 = vmul.f32 %v4890_v57, %v6148_v33  ;;  %5152 = vrot.lane.b32.xlu0 %v5151_v15, %s5323_s21  ;;  %v2654_v38 = vmax.f32 %v2622_v24, 0.0  ;;  %v2623_v30 = vadd.f32 %v6646_v52, %v2591_v2  ;;  %4030 = vst.msk [vmem:[%s6673_s17 + $0x30] sm:$0xff] %vm606_vm11, %v3998_v40  ;;  %v3835_v48 = vpop.permute.xlu1 %3834  ;;  %v3933_v1 = vsel %vm414_vm1, %v7553_v4, %v7552_v25  ;;  %v7557_v4 = vld [vmem:[#allocation72_spill] sm:$0xff] }
 0x2e6   : > { %v2479_v6 = vpop.f32.mrf.mxu0  ;;  %v2657_v53 = vmax.f32 %v2625_v31, 0.0  ;;  %v3993_v42 = vsel %vm602_vm9, %v3961_v54, %v3835_v48  ;;  %v3938_v24 = vsel %vm414_vm1, %v7555_v61, %v7554_v62  ;;  %v3964_v15 = vsel %vm598_vm7, %v3932_v8, %v6404_v44  ;;  %v7556_v54 = vld [vmem:[#allocation75_spill] sm:$0xff] }
 0x2e7   : > { %v2628_v51 = vadd.f32 %v6646_v52, %v2596_v26  ;;  %v2594_v20 = vmul.f32 %v2479_v6, %v6148_v33  ;;  %v2655_v46 = vmax.f32 %v2623_v30, 0.0  ;;  %4025 = vst.msk [vmem:[%s6673_s17 + $0x8] sm:$0xff] %vm606_vm11, %v3993_v42  ;;  %v3841_v34 = vpop.permute.xlu0 %3840  ;;  %v2688_v2 = vmul.f32 1.4142135, %v2656_v41 }
 0x2e8   : > { %v4891_v39 = vpop.f32.mrf.mxu0  ;;  %v2689_v11 = vmul.f32 1.4142135, %v2657_v53  ;;  %v3996_v31 = vsel %vm602_vm9, %v3964_v15, %v3841_v34  ;;  %v3967_v40 = vsel %vm598_vm7, %v3935_v47, %v6406_v0  ;;  %v2686_v26 = vmul.f32 1.4142135, %v2654_v38 }
 0x2e9   : > { %v2626_v57 = vadd.f32 %v6646_v52, %v2594_v20  ;;  %v2687_v56 = vmul.f32 1.4142135, %v2655_v46  ;;  %4028 = vst.msk [vmem:[%s6673_s17 + $0x20] sm:$0xff] %vm606_vm11, %v3996_v31  ;;  %v2597_v44 = vmul.f32 %v4891_v39, %v6148_v33  ;;  %v5008_v8 = vpop.permute.xlu1 %5007  ;;  %v3970_v30 = vsel %vm598_vm7, %v3938_v24, %v7556_v54  ;;  %v7558_v24 = vld [vmem:[#allocation70_spill] sm:$0xff] }
 0x2ea   : > { %v2482_v19 = vpop.f32.mrf.mxu0  ;;  %v5156_v41 = vpack.i.bf16 %v2689_v11, %v2688_v2  ;;  %v2660_v48 = vmax.f32 %v2628_v51, 0.0  ;;  %v5010_v6 = vunpack.i.h.bf16 %v5008_v8  ;;  %v5009_v20 = vunpack.i.l.bf16 %v5008_v8 }
 0x2eb   : > { %v5161_v53 = vpack.i.bf16 %v2687_v56, %v2686_v26  ;;  %v2629_v42 = vadd.f32 %v6646_v52, %v2597_v44  ;;  %v2595_v0 = vmul.f32 %v2482_v19, %v6148_v33  ;;  %v5013_v47 = vpop.permute.xlu0 %5012  ;;  %v2658_v25 = vmax.f32 %v2626_v57, 0.0  ;;  %v7559_v57 = vld [vmem:[#allocation73_spill] sm:$0xff]  ;;  %v7560_v26 = vld [vmem:[#allocation71_spill] sm:$0xff] }
 0x2ec   : > { %v4894_v38 = vpop.f32.mrf.mxu0  ;;  %v6804_v62 = vsel %vm414_vm1, %v7557_v4, %v5010_v6  ;;  %v5015_v61 = vunpack.i.h.bf16 %v5013_v47  ;;  %v5014_v15 = vunpack.i.l.bf16 %v5013_v47  ;;  %5157 = vrot.lane.b32.xlu1 %v5156_v41, %s5325_s29  ;;  %v6809_v46 = vsel %vm414_vm1, %v7558_v24, %v5009_v20  ;;  %v7561_v20 = vld [vmem:[#allocation74_spill] sm:$0xff] }
 0x2ed   : > { %v2661_v51 = vmax.f32 %v2629_v42, 0.0  ;;  %v2627_v34 = vadd.f32 %v6646_v52, %v2595_v0  ;;  %v2600_v39 = vmul.f32 %v4894_v38, %v6148_v33  ;;  %v3847_v2 = vpop.permute.xlu1 %3846  ;;  %5162 = vrot.lane.b32.xlu0 %v5161_v53, %s5325_s29  ;;  %v2692_v19 = vmul.f32 1.4142135, %v2660_v48 }
 0x2ee   : > { %v2495_v11 = vpop.f32.mrf.mxu0  ;;  %v6816_v31 = vsel %vm414_vm1, %v7559_v57, %v5015_v61  ;;  %v6820_v56 = vsel %vm414_vm1, %v7560_v26, %v5014_v15  ;;  %v3999_v44 = vsel %vm602_vm9, %v3967_v40, %v3847_v2  ;;  %v3965_v0 = vsel %vm598_vm7, %v3933_v1, %v7561_v20  ;;  %v7566_v20 = vld [vmem:[#allocation48_spill] sm:$0xff] }
 0x2ef   : > { %v2598_v8 = vmul.f32 %v2495_v11, %v6148_v33  ;;  %v2693_v54 = vmul.f32 1.4142135, %v2661_v51  ;;  %v2659_v41 = vmax.f32 %v2627_v34, 0.0  ;;  %v2632_v6 = vadd.f32 %v6646_v52, %v2600_v39  ;;  %4031 = vst.msk [vmem:[%s6673_s17 + $0x38] sm:$0xff] %vm606_vm11, %v3999_v44  ;;  %v3853_v53 = vpop.permute.xlu0 %3852  ;;  %v7562_v34 = vld [vmem:[#allocation46_spill] sm:$0xff]  ;;  %v7563_v39 = vld [vmem:[#allocation9_spill] sm:$0xff] }
 0x2f0   : > { %v4895_v42 = vpop.f32.mrf.mxu0  ;;  %v4002_v38 = vsel %vm602_vm9, %v3970_v30, %v3853_v53  ;;  %v2690_v4 = vmul.f32 1.4142135, %v2658_v25  ;;  %v3936_v2 = vsel %vm414_vm1, %v7563_v39, %v7562_v34  ;;  %v6842_v25 = vadd.f32 %v6646_v52, %v6711_v12 }
 0x2f1   : > { %v2630_v47 = vadd.f32 %v6646_v52, %v2598_v8  ;;  %v2601_v40 = vmul.f32 %v4895_v42, %v6148_v33  ;;  %v5166_v48 = vpack.i.bf16 %v2693_v54, %v2692_v19  ;;  %v2691_v61 = vmul.f32 1.4142135, %v2659_v41  ;;  %4034 = vst.msk [vmem:[%s6673_s17 + $0x50] sm:$0xff] %vm606_vm11, %v4002_v38  ;;  %v3843_v51 = vpop.permute.xlu1 %3842  ;;  %v7564_v54 = vld [vmem:[#allocation47_spill] sm:$0xff]  ;;  %v7565_v41 = vld [vmem:[#allocation10_spill] sm:$0xff]  ;;  %v7569_v38 = vld [vmem:[#allocation12_spill] sm:$0xff] }
 0x2f2   : > { %v2664_v15 = vmax.f32 %v2632_v6, 0.0  ;;  %v2498_v24 = vpop.f32.mrf.mxu0  ;;  %v3997_v11 = vsel %vm602_vm9, %v3965_v0, %v3843_v51  ;;  %v3968_v57 = vsel %vm598_vm7, %v3936_v2, %v6457_v49  ;;  %v3939_v6 = vsel %vm414_vm1, %v7565_v41, %v7564_v54  ;;  %v7567_v0 = vld [vmem:[#allocation11_spill] sm:$0xff]  ;;  %v7570_v41 = vld [vmem:[#allocation76_spill] sm:$0xff] }
 0x2f3   : > { %v2633_v1 = vadd.f32 %v6646_v52, %v2601_v40  ;;  %v2599_v30 = vmul.f32 %v2498_v24, %v6148_v33  ;;  %v5171_v26 = vpack.i.bf16 %v2691_v61, %v2690_v4  ;;  %v2662_v44 = vmax.f32 %v2630_v47, 0.0  ;;  %4029 = vst.msk [vmem:[%s6673_s17 + $0x28] sm:$0xff] %vm606_vm11, %v3997_v11  ;;  %v3849_v8 = vpop.permute.xlu0 %3848  ;;  %5167 = vrot.lane.b32.xlu1 %v5166_v48, %s5325_s29  ;;  %v7568_v47 = vld [vmem:[#allocation49_spill] sm:$0xff] }
 0x2f4   : > { %v4898_v19 = vpop.f32.mrf.mxu0  ;;  %v4000_v12 = vsel %vm602_vm9, %v3968_v57, %v3849_v8  ;;  %v3937_v49 = vsel %vm414_vm1, %v7567_v0, %v7566_v20  ;;  %v3942_v40 = vsel %vm414_vm1, %v7569_v38, %v7568_v47  ;;  %v2696_v4 = vmul.f32 1.4142135, %v2664_v15 }
 0x2f5   : > { %v2665_v53 = vmax.f32 %v2633_v1, 0.0  ;;  %v2631_v42 = vadd.f32 %v6646_v52, %v2599_v30  ;;  %4032 = vst.msk [vmem:[%s6673_s17 + $0x40] sm:$0xff] %vm606_vm11, %v4000_v12  ;;  %v2604_v48 = vmul.f32 %v4898_v19, %v6148_v33  ;;  %v5018_v61 = vpop.permute.xlu1 %5017  ;;  %5172 = vrot.lane.b32.xlu0 %v5171_v26, %s5325_s29  ;;  %v3971_v1 = vsel %vm598_vm7, %v3939_v6, %v6459_v58 }
 0x2f6   : > { %v2511_v51 = vpop.f32.mrf.mxu0  ;;  %v5020_v39 = vunpack.i.h.bf16 %v5018_v61  ;;  %v5019_v2 = vunpack.i.l.bf16 %v5018_v61  ;;  %v2694_v11 = vmul.f32 1.4142135, %v2662_v44  ;;  %v3974_v58 = vsel %vm598_vm7, %v3942_v40, %v6487_v43  ;;  %v7571_v40 = vld [vmem:[#allocation77_spill] sm:$0xff] }
 0x2f7   : > { %v2697_v24 = vmul.f32 1.4142135, %v2665_v53  ;;  %v2663_v34 = vmax.f32 %v2631_v42, 0.0  ;;  %v2636_v30 = vadd.f32 %v6646_v52, %v2604_v48  ;;  %v2602_v15 = vmul.f32 %v2511_v51, %v6148_v33  ;;  %v5023_v57 = vpop.permute.xlu0 %5022 }
 0x2f8   : > { %v4899_v8 = vpop.f32.mrf.mxu0  ;;  %v6870_v26 = vsel %vm414_vm1, %v6461_v17, %v5020_v39  ;;  %v6874_v53 = vsel %vm414_vm1, %v7570_v41, %v5019_v2  ;;  %v5025_v6 = vunpack.i.h.bf16 %v5023_v57  ;;  %v5024_v42 = vunpack.i.l.bf16 %v5023_v57 }
 0x2f9   : > { %v5176_v54 = vpack.i.bf16 %v2697_v24, %v2696_v4  ;;  %v2695_v19 = vmul.f32 1.4142135, %v2663_v34  ;;  %v2634_v44 = vadd.f32 %v6646_v52, %v2602_v15  ;;  %v3855_v12 = vpop.permute.xlu1 %3854  ;;  %v2605_v47 = vmul.f32 %v4899_v8, %v6148_v33  ;;  %v7574_v15 = vld [vmem:[#allocation13_spill] sm:$0xff]  ;;  %v7575_v8 = vld [vmem:[#allocation51_spill] sm:$0xff] }
 0x2fa   : > { %v2514_v20 = vpop.f32.mrf.mxu0  ;;  %v4003_v17 = vsel %vm602_vm9, %v3971_v1, %v3855_v12  ;;  %v2668_v4 = vmax.f32 %v2636_v30, 0.0  ;;  %v6885_v43 = vsel %vm414_vm1, %v6465_v13, %v5025_v6  ;;  %v6889_v61 = vsel %vm414_vm1, %v7571_v40, %v5024_v42  ;;  %v7572_v13 = vld [vmem:[#allocation32_spill] sm:$0xff]  ;;  %v7573_v30 = vld [vmem:[#allocation50_spill] sm:$0xff]  ;;  %v7578_v42 = vld [vmem:[#allocation15_spill] sm:$0xff] }
 0x2fb   : > { %v5181_v0 = vpack.i.bf16 %v2695_v19, %v2694_v11  ;;  %v2603_v38 = vmul.f32 %v2514_v20, %v6148_v33  ;;  %5177 = vrot.lane.b32.xlu1 %v5176_v54, %s5325_s29  ;;  %v2666_v48 = vmax.f32 %v2634_v44, 0.0  ;;  %4035 = vst.msk [vmem:[%s6673_s17 + $0x58] sm:$0xff] %vm606_vm11, %v4003_v17  ;;  %v3861_v51 = vpop.permute.xlu0 %3860  ;;  %v2637_v34 = vadd.f32 %v6646_v52, %v2605_v47  ;;  %v7576_v54 = vld [vmem:[#allocation14_spill] sm:$0xff]  ;;  %v7577_v6 = vld [vmem:[#allocation52_spill] sm:$0xff] }
 0x2fc   : > { %v4902_v24 = vpop.f32.mrf.mxu0  ;;  %v4006_v2 = vsel %vm602_vm9, %v3974_v58, %v3861_v51  ;;  %v6900_v11 = vmul.f32 %v6148_v33, %v7572_v13  ;;  %v3940_v57 = vsel %vm414_vm1, %v7574_v15, %v7573_v30  ;;  %v3943_v19 = vsel %vm414_vm1, %v7576_v54, %v7575_v8  ;;  %v7580_v30 = vld [vmem:[#allocation16_spill] sm:$0xff] }
 0x2fd   : > { %v2635_v39 = vadd.f32 %v6646_v52, %v2603_v38  ;;  %v2608_v1 = vmul.f32 %v4902_v24, %v6148_v33  ;;  %5182 = vrot.lane.b32.xlu0 %v5181_v0, %s5325_s29  ;;  %v3969_v41 = vsel %vm598_vm7, %v3937_v49, %v6485_v22  ;;  %4038 = vst.msk [vmem:[%s6673_s17 + $0x70] sm:$0xff] %vm606_vm11, %v4006_v2  ;;  %v3851_v58 = vpop.permute.xlu1 %3850  ;;  %v2669_v20 = vmax.f32 %v2637_v34, 0.0 }
 0x2fe   : > { %v2527_v44 = vpop.f32.mrf.mxu0  ;;  %v3941_v12 = vsel %vm414_vm1, %v7578_v42, %v7577_v6  ;;  %v4001_v47 = vsel %vm602_vm9, %v3969_v41, %v3851_v58  ;;  %v3972_v17 = vsel %vm598_vm7, %v3940_v57, %v6515_v7  ;;  %v2700_v38 = vmul.f32 1.4142135, %v2668_v4 }
 0x2ff   : > { %v2667_v0 = vmax.f32 %v2635_v39, 0.0  ;;  %v2640_v40 = vadd.f32 %v6646_v52, %v2608_v1  ;;  %4033 = vst.msk [vmem:[%s6673_s17 + $0x48] sm:$0xff] %vm606_vm11, %v4001_v47  ;;  %v2606_v22 = vmul.f32 %v2527_v44, %v6148_v33  ;;  %v3857_v49 = vpop.permute.xlu0 %3856  ;;  %v2698_v24 = vmul.f32 1.4142135, %v2666_v48  ;;  %v7579_v39 = vld [vmem:[#allocation53_spill] sm:$0xff] }
 0x300   : > { %v4903_v51 = vpop.f32.mrf.mxu0  ;;  %v2701_v2 = vmul.f32 1.4142135, %v2669_v20  ;;  %v4004_v34 = vsel %vm602_vm9, %v3972_v17, %v3857_v49  ;;  %v3946_v15 = vsel %vm414_vm1, %v7580_v30, %v7579_v39  ;;  %v3975_v7 = vsel %vm598_vm7, %v3943_v19, %v6517_v5  ;;  %v7582_v49 = vld [vmem:[#allocation78_spill] sm:$0xff]  ;;  %v7584_v30 = vld [vmem:[#allocation79_spill] sm:$0xff] }
 0x301   : > { %v2699_v13 = vmul.f32 1.4142135, %v2667_v0  ;;  %v2638_v4 = vadd.f32 %v6646_v52, %v2606_v22  ;;  %4036 = vst.msk [vmem:[%s6673_s17 + $0x60] sm:$0xff] %vm606_vm11, %v4004_v34  ;;  %v2609_v1 = vmul.f32 %v4903_v51, %v6148_v33  ;;  %v5028_v57 = vpop.permute.xlu1 %5027  ;;  %v3978_v48 = vsel %vm598_vm7, %v3946_v15, %v6544_v35  ;;  %v7581_v0 = vld [vmem:[#allocation80_spill] sm:$0xff]  ;;  %v7583_v34 = vld [vmem:[#allocation81_spill] sm:$0xff] }
 0x302   : > { %v2530_v8 = vpop.f32.mrf.mxu0  ;;  %v5186_v54 = vpack.i.bf16 %v2701_v2, %v2700_v38  ;;  %v5030_v58 = vunpack.i.h.bf16 %v5028_v57  ;;  %v2672_v44 = vmax.f32 %v2640_v40, 0.0  ;;  %v5029_v42 = vunpack.i.l.bf16 %v5028_v57 }
 0x303   : > { %v5191_v41 = vpack.i.bf16 %v2699_v13, %v2698_v24  ;;  %v2641_v6 = vadd.f32 %v6646_v52, %v2609_v1  ;;  %v2607_v5 = vmul.f32 %v2530_v8, %v6148_v33  ;;  %v5033_v19 = vpop.permute.xlu0 %5032  ;;  %v2670_v38 = vmax.f32 %v2638_v4, 0.0 }
 0x304   : > { %v4906_v20 = vpop.f32.mrf.mxu0  ;;  %v6938_v47 = vsel %vm414_vm1, %v7581_v0, %v5030_v58  ;;  %v5035_v17 = vunpack.i.h.bf16 %v5033_v19  ;;  %v5034_v22 = vunpack.i.l.bf16 %v5033_v19  ;;  %5187 = vrot.lane.b32.xlu1 %v5186_v54, %s5325_s29  ;;  %v6945_v51 = vsel %vm414_vm1, %v7582_v49, %v5029_v42  ;;  %v7585_v42 = vld [vmem:[#allocation54_spill] sm:$0xff] }
 0x305   : > { %v2612_v35 = vmul.f32 %v4906_v20, %v6148_v33  ;;  %5192 = vrot.lane.b32.xlu0 %v5191_v41, %s5325_s29  ;;  %v2673_v40 = vmax.f32 %v2641_v6, 0.0  ;;  %v2639_v24 = vadd.f32 %v6646_v52, %v2607_v5  ;;  %v3863_v2 = vpop.permute.xlu1 %3862  ;;  %v2704_v57 = vmul.f32 1.4142135, %v2672_v44  ;;  %v7586_v5 = vld [vmem:[#allocation17_spill] sm:$0xff]  ;;  %v7587_v20 = vld [vmem:[#allocation86_spill] sm:$0xff] }
 0x306   : > { %v2543_v13 = vpop.f32.mrf.mxu0  ;;  %v6950_v39 = vsel %vm414_vm1, %v7583_v34, %v5035_v17  ;;  %v6954_v15 = vsel %vm414_vm1, %v7584_v30, %v5034_v22  ;;  %v4007_v4 = vsel %vm602_vm9, %v3975_v7, %v3863_v2  ;;  %v3944_v19 = vsel %vm414_vm1, %v7586_v5, %v7585_v42  ;;  %v7590_v42 = vld [vmem:[#allocation34_spill] sm:$0xff] }
 0x307   : > { %v2644_v1 = vadd.f32 %v6646_v52, %v2612_v35  ;;  %v2705_v8 = vmul.f32 1.4142135, %v2673_v40  ;;  %v2671_v54 = vmax.f32 %v2639_v24, 0.0  ;;  %4039 = vst.msk [vmem:[%s6673_s17 + $0x78] sm:$0xff] %vm606_vm11, %v4007_v4  ;;  %v2610_v41 = vmul.f32 %v2543_v13, %v6148_v33  ;;  %v3869_v58 = vpop.permute.xlu0 %3868 }
 0x308   : > { %v4907_v6 = vpop.f32.mrf.mxu0  ;;  %v3973_v0 = vsel %vm598_vm7, %v3941_v12, %v7587_v20  ;;  %v4010_v17 = vsel %vm602_vm9, %v3978_v48, %v3869_v58  ;;  %v2702_v44 = vmul.f32 1.4142135, %v2670_v38  ;;  %v6976_v48 = vmul.f32 1.4142135, %v1054_v63  ;;  %v7588_v38 = vld [vmem:[#allocation88_spill] sm:$0xff]  ;;  %v7589_v63 = vld [vmem:[#allocation33_spill] sm:$0xff] }
 0x309   : > { %v2613_v7 = vmul.f32 %v4907_v6, %v6148_v33  ;;  %v5196_v22 = vpack.i.bf16 %v2705_v8, %v2704_v57  ;;  %v2703_v35 = vmul.f32 1.4142135, %v2671_v54  ;;  %v2642_v40 = vadd.f32 %v6646_v52, %v2610_v41  ;;  %4042 = vst.msk [vmem:[%s6673_s17 + $0x90] sm:$0xff] %vm606_vm11, %v4010_v17  ;;  %v3859_v49 = vpop.permute.xlu1 %3858  ;;  %v7592_v20 = vld [vmem:[#allocation18_spill] sm:$0xff]  ;;  %v7593_v17 = vld [vmem:[#allocation56_spill] sm:$0xff] }
 0x30a   : > { %v2546_v24 = vpop.f32.mrf.mxu0  ;;  %v2676_v2 = vmax.f32 %v2644_v1, 0.0  ;;  %v4005_v34 = vsel %vm602_vm9, %v3973_v0, %v3859_v49  ;;  %v3976_v30 = vsel %vm598_vm7, %v3944_v19, %v7588_v38  ;;  %v989_v6 = vmul.f32 %v7589_v63, %v6148_v33  ;;  %v7591_v19 = vld [vmem:[#allocation55_spill] sm:$0xff] }
 0x30b   : > { %v2645_v13 = vadd.f32 %v6646_v52, %v2613_v7  ;;  %v2611_v12 = vmul.f32 %v2546_v24, %v6148_v33  ;;  %v5201_v4 = vpack.i.bf16 %v2703_v35, %v2702_v44  ;;  %v2674_v57 = vmax.f32 %v2642_v40, 0.0  ;;  %4037 = vst.msk [vmem:[%s6673_s17 + $0x68] sm:$0xff] %vm606_vm11, %v4005_v34  ;;  %v3865_v8 = vpop.permute.xlu0 %3864  ;;  %5197 = vrot.lane.b32.xlu1 %v5196_v22, %s5325_s29  ;;  %v7594_v7 = vld [vmem:[#allocation19_spill] sm:$0xff]  ;;  %v7595_v34 = vld [vmem:[#allocation89_spill] sm:$0xff] }
 0x30c   : > { %v4910_v1 = vpop.f32.mrf.mxu0  ;;  %v4008_v58 = vsel %vm602_vm9, %v3976_v30, %v3865_v8  ;;  %v987_v5 = vmul.f32 %v6148_v33, %v7590_v42  ;;  %v3947_v0 = vsel %vm414_vm1, %v7592_v20, %v7591_v19  ;;  %v3945_v44 = vsel %vm414_vm1, %v7594_v7, %v7593_v17  ;;  %v7596_v20 = vld [vmem:[#allocation85_spill] sm:$0xff] }
 0x30d   : > { %v2677_v54 = vmax.f32 %v2645_v13, 0.0  ;;  %v2643_v41 = vadd.f32 %v6646_v52, %v2611_v12  ;;  %v2616_v29 = vmul.f32 %v4910_v1, %v6148_v33  ;;  %4040 = vst.msk [vmem:[%s6673_s17 + $0x80] sm:$0xff] %vm606_vm11, %v4008_v58  ;;  %v5038_v22 = vpop.permute.xlu1 %5037  ;;  %5202 = vrot.lane.b32.xlu0 %v5201_v4, %s5325_s29  ;;  %v2708_v40 = vmul.f32 1.4142135, %v2676_v2  ;;  %v7597_v4 = vld [vmem:[#allocation82_spill] sm:$0xff] }
 0x30e   : > { %v2559_v35 = vpop.f32.mrf.mxu0  ;;  %v5040_v13 = vunpack.i.h.bf16 %v5038_v22  ;;  %v3979_v12 = vsel %vm598_vm7, %v3947_v0, %v7595_v34  ;;  %v2706_v38 = vmul.f32 1.4142135, %v2674_v57  ;;  %v5039_v30 = vunpack.i.l.bf16 %v5038_v22  ;;  %v7598_v22 = vld [vmem:[#allocation57_spill] sm:$0xff]  ;;  %v7600_v34 = vld [vmem:[#allocation87_spill] sm:$0xff] }
 0x30f   : > { %v2709_v49 = vmul.f32 1.4142135, %v2677_v54  ;;  %v2675_v24 = vmax.f32 %v2643_v41, 0.0  ;;  %v2614_v8 = vmul.f32 %v2559_v35, %v6148_v33  ;;  %v5043_v1 = vpop.permute.xlu0 %5042  ;;  %v2648_v58 = vadd.f32 %v6646_v52, %v2616_v29  ;;  %v7599_v35 = vld [vmem:[#allocation20_spill] sm:$0xff] }
 0x310   : > { %v4911_v63 = vpop.f32.mrf.mxu0  ;;  %v7005_v2 = vsel %vm414_vm1, %v7596_v20, %v5040_v13  ;;  %v7009_v54 = vsel %vm414_vm1, %v7597_v4, %v5039_v30  ;;  %v5045_v41 = vunpack.i.h.bf16 %v5043_v1  ;;  %v5044_v0 = vunpack.i.l.bf16 %v5043_v1  ;;  %v7602_v4 = vld [vmem:[#allocation58_spill] sm:$0xff] }
 0x311   : > { %v5206_v42 = vpack.i.bf16 %v2709_v49, %v2708_v40  ;;  %v2707_v19 = vmul.f32 1.4142135, %v2675_v24  ;;  %v2646_v57 = vadd.f32 %v6646_v52, %v2614_v8  ;;  %v3871_v17 = vpop.permute.xlu1 %3870  ;;  %v3950_v40 = vsel %vm414_vm1, %v7599_v35, %v7598_v22  ;;  %v7601_v8 = vld [vmem:[#allocation84_spill] sm:$0xff] }
 0x312   : > { %v2562_v7 = vpop.f32.mrf.mxu0  ;;  %v2617_v49 = vmul.f32 %v4911_v63, %v6148_v33  ;;  %v4011_v24 = vsel %vm602_vm9, %v3979_v12, %v3871_v17  ;;  %v3982_v13 = vsel %vm598_vm7, %v3950_v40, %v6586_v55  ;;  %v7022_v30 = vsel %vm414_vm1, %v7600_v34, %v5045_v41  ;;  %v7603_v41 = vld [vmem:[#allocation21_spill] sm:$0xff]  ;;  %v7604_v17 = vld [vmem:[#allocation91_spill] sm:$0xff] }
 0x313   : > { %v5211_v29 = vpack.i.bf16 %v2707_v19, %v2706_v38  ;;  %5207 = vrot.lane.b32.xlu1 %v5206_v42, %s5325_s29  ;;  %v7026_v1 = vsel %vm414_vm1, %v7601_v8, %v5044_v0  ;;  %4043 = vst.msk [vmem:[%s6673_s17 + $0x98] sm:$0xff] %vm606_vm11, %v4011_v24  ;;  %v2615_v38 = vmul.f32 %v2562_v7, %v6148_v33  ;;  %v3877_v63 = vpop.permute.xlu0 %3876  ;;  %v2680_v19 = vmax.f32 %v2648_v58, 0.0 }
 0x314   : > { %v4914_v12 = vpop.f32.mrf.mxu0  ;;  %v2649_v42 = vadd.f32 %v6646_v52, %v2617_v49  ;;  %v4014_v55 = vsel %vm602_vm9, %v3982_v13, %v3877_v63  ;;  %v3948_v0 = vsel %vm414_vm1, %v7603_v41, %v7602_v4  ;;  %v3977_v22 = vsel %vm598_vm7, %v3945_v44, %v7604_v17  ;;  %v7605_v17 = vld [vmem:[#allocation59_spill] sm:$0xff] }
 0x315   : > { %v2620_v20 = vmul.f32 %v4914_v12, %v6148_v33  ;;  %5212 = vrot.lane.b32.xlu0 %v5211_v29, %s5325_s29  ;;  %v2678_v7 = vmax.f32 %v2646_v57, 0.0  ;;  %v2647_v35 = vadd.f32 %v6646_v52, %v2615_v38  ;;  %4046 = vst.msk [vmem:[%s6673_s17 + $0xb0] sm:$0xff] %vm606_vm11, %v4014_v55  ;;  %v3867_v58 = vpop.permute.xlu1 %3866  ;;  %v7048_v34 = vadd.f32 %v6646_v52, %v6900_v11 }
 0x316   : > { %v2575_v40 = vpop.f32.mrf.mxu0  ;;  %v2681_v49 = vmax.f32 %v2649_v42, 0.0  ;;  %v4009_v29 = vsel %vm602_vm9, %v3977_v22, %v3867_v58  ;;  %v7051_v44 = vadd.f32 %v6646_v52, %v989_v6  ;;  %v3980_v57 = vsel %vm598_vm7, %v3948_v0, %v6599_v3  ;;  %v7606_v22 = vld [vmem:[#allocation22_spill] sm:$0xff] }
 0x317   : > { %v2652_v24 = vadd.f32 %v6646_v52, %v2620_v20  ;;  %v2618_v13 = vmul.f32 %v2575_v40, %v6148_v33  ;;  %v2679_v8 = vmax.f32 %v2647_v35, 0.0  ;;  %4041 = vst.msk [vmem:[%s6673_s17 + $0x88] sm:$0xff] %vm606_vm11, %v4009_v29  ;;  %v3873_v38 = vpop.permute.xlu0 %3872  ;;  %v7058_v12 = vadd.f32 %v6646_v52, %v987_v5 }
 0x318   : > { %v4915_v63 = vpop.f32.mrf.mxu0  ;;  %v2712_v42 = vmul.f32 1.4142135, %v2680_v19  ;;  %v2713_v55 = vmul.f32 1.4142135, %v2681_v49  ;;  %v4012_v20 = vsel %vm602_vm9, %v3980_v57, %v3873_v38  ;;  %v2710_v11 = vmul.f32 1.4142135, %v2678_v7 }
 0x319   : > { %v2711_v4 = vmul.f32 1.4142135, %v2679_v8  ;;  %v2650_v6 = vadd.f32 %v6646_v52, %v2618_v13  ;;  %4044 = vst.msk [vmem:[%s6673_s17 + $0xa0] sm:$0xff] %vm606_vm11, %v4012_v20  ;;  %v2621_v3 = vmul.f32 %v4915_v63, %v6148_v33  ;;  %v5048_v41 = vpop.permute.xlu1 %5047  ;;  %v3951_v35 = vsel %vm414_vm1, %v7606_v22, %v7605_v17  ;;  %v7607_v57 = vld [vmem:[#allocation92_spill] sm:$0xff] }
 0x31a   : > { %v2578_v0 = vpop.f32.mrf.mxu0  ;;  %v5216_v5 = vpack.i.bf16 %v2713_v55, %v2712_v42  ;;  %v2684_v58 = vmax.f32 %v2652_v24, 0.0  ;;  %v5050_v19 = vunpack.i.h.bf16 %v5048_v41  ;;  %v5049_v7 = vunpack.i.l.bf16 %v5048_v41  ;;  %v7609_v41 = vld [vmem:[#allocation24_spill] sm:$0xff] }
 0x31b   : > { %v5221_v40 = vpack.i.bf16 %v2711_v4, %v2710_v11  ;;  %v2653_v49 = vadd.f32 %v6646_v52, %v2621_v3  ;;  %v2619_v29 = vmul.f32 %v2578_v0, %v6148_v33  ;;  %v5053_v13 = vpop.permute.xlu0 %5052  ;;  %v3983_v8 = vsel %vm598_vm7, %v3951_v35, %v7607_v57  ;;  %v7608_v3 = vld [vmem:[#allocation61_spill] sm:$0xff] }
 0x31c   : > { %v7074_v38 = vsel %vm414_vm1, %v6717_v10, %v5050_v19  ;;  %v5055_v63 = vunpack.i.h.bf16 %v5053_v13  ;;  %v5054_v20 = vunpack.i.l.bf16 %v5053_v13  ;;  %5217 = vrot.lane.b32.xlu1 %v5216_v5, %s5325_s29  ;;  %v2682_v24 = vmax.f32 %v2650_v6, 0.0 }
 0x31d   : > { %v2685_v42 = vmax.f32 %v2653_v49, 0.0  ;;  %v7079_v55 = vsel %vm414_vm1, %v6641_v21, %v5049_v7  ;;  %v2651_v11 = vadd.f32 %v6646_v52, %v2619_v29  ;;  %v3879_v4 = vpop.permute.xlu1 %3878  ;;  %5222 = vrot.lane.b32.xlu0 %v5221_v40, %s5325_s29  ;;  %v3954_v10 = vsel %vm414_vm1, %v7609_v41, %v7608_v3  ;;  %v7610_v49 = vld [vmem:[#allocation60_spill] sm:$0xff]  ;;  %v7611_v7 = vld [vmem:[#allocation23_spill] sm:$0xff] }
 0x31e   : > { %v7088_v0 = vsel %vm414_vm1, %v6976_v48, %v5055_v63  ;;  %v7092_v6 = vsel %vm414_vm1, %v6675_v50, %v5054_v20  ;;  %v4015_v21 = vsel %vm602_vm9, %v3983_v8, %v3879_v4  ;;  %v3986_v17 = vsel %vm598_vm7, %v3954_v10, %v6616_v9  ;;  %v7612_v63 = vld [vmem:[#allocation62_spill] sm:$0xff]  ;;  %v7613_v20 = vld [vmem:[#allocation25_spill] sm:$0xff]  ;;  %v7614_v4 = vld [vmem:[#allocation36_spill] sm:$0xff] }
 0x31f   : > { %v2716_v22 = vmul.f32 1.4142135, %v2684_v58  ;;  %v2717_v35 = vmul.f32 1.4142135, %v2685_v42  ;;  %v2683_v5 = vmax.f32 %v2651_v11, 0.0  ;;  %4047 = vst.msk [vmem:[%s6673_s17 + $0xb8] sm:$0xff] %vm606_vm11, %v4015_v21  ;;  %v3885_v19 = vpop.permute.xlu0 %3884  ;;  %v3949_v50 = vsel %vm414_vm1, %v7611_v7, %v7610_v49 }
 0x320   : > { %v1059_v40 = vmax.f32 %v6842_v25, 0.0  ;;  %v1057_v48 = vmax.f32 %v7048_v34, 0.0  ;;  %v4018_v29 = vsel %vm602_vm9, %v3986_v17, %v3885_v19  ;;  %v3981_v9 = vsel %vm598_vm7, %v3949_v50, %v6614_v18  ;;  %v7616_v17 = vld [vmem:[#allocation35_spill] sm:$0xff] }
 0x321   : > { %v2714_v58 = vmul.f32 1.4142135, %v2682_v24  ;;  %v5226_v13 = vpack.i.bf16 %v2717_v35, %v2716_v22  ;;  %v2715_v57 = vmul.f32 1.4142135, %v2683_v5  ;;  %4050 = vst.msk [vmem:[%s6673_s17 + $0xd0] sm:$0xff] %vm606_vm11, %v4018_v29  ;;  %v3875_v8 = vpop.permute.xlu1 %3874  ;;  %v1060_v25 = vmax.f32 %v7051_v44, 0.0 }
 0x322   : > { %v1058_v34 = vmax.f32 %v7058_v12, 0.0  ;;  %v3952_v42 = vsel %vm414_vm1, %v7613_v20, %v7612_v63  ;;  %v4013_v11 = vsel %vm602_vm9, %v3981_v9, %v3875_v8  ;;  %v990_v18 = vmul.f32 %v6148_v33, %v7614_v4  ;;  %v7615_v24 = vld [vmem:[#allocation39_spill] sm:$0xff]  ;;  %v7617_v35 = vld [vmem:[#allocation37_spill] sm:$0xff] }
 0x323   : > { %v991_v3 = vmul.f32 %v6148_v33, %v7615_v24  ;;  %v3984_v41 = vsel %vm598_vm7, %v3952_v42, %v6629_v32  ;;  %v5231_v10 = vpack.i.bf16 %v2715_v57, %v2714_v58  ;;  %4045 = vst.msk [vmem:[%s6673_s17 + $0xa8] sm:$0xff] %vm606_vm11, %v4013_v11  ;;  %v3881_v44 = vpop.permute.xlu0 %3880  ;;  %5227 = vrot.lane.b32.xlu1 %v5226_v13, %s5325_s29  ;;  %v1091_v21 = vmul.f32 1.4142135, %v1059_v40  ;;  %v7618_v58 = vld [vmem:[#allocation63_spill] sm:$0xff]  ;;  %v7619_v13 = vld [vmem:[#allocation26_spill] sm:$0xff] }
 0x324   : > { %v4016_v12 = vsel %vm602_vm9, %v3984_v41, %v3881_v44  ;;  %v992_v22 = vmul.f32 %v7616_v17, %v6148_v33  ;;  %v993_v5 = vmul.f32 %v7617_v35, %v6148_v33  ;;  %v1089_v32 = vmul.f32 1.4142135, %v1057_v48  ;;  %v7620_v33 = vld [vmem:[#allocation90_spill] sm:$0xff]  ;;  %v7625_v35 = vld [vmem:[#allocation27_spill] sm:$0xff] }
 0x325   : > { %4048 = vst.msk [vmem:[%s6673_s17 + $0xc0] sm:$0xff] %vm606_vm11, %v4016_v12  ;;  %v5058_v19 = vpop.permute.xlu1 %5057  ;;  %5232 = vrot.lane.b32.xlu0 %v5231_v10, %s5325_s29  ;;  %v1092_v49 = vmul.f32 1.4142135, %v1060_v25  ;;  %v1090_v29 = vmul.f32 1.4142135, %v1058_v34  ;;  %v1029_v9 = vadd.f32 %v6646_v52, %v990_v18  ;;  %v1030_v40 = vadd.f32 %v6646_v52, %v991_v3  ;;  %v7621_v18 = vld [vmem:[#allocation83_spill] sm:$0xff] }
 0x326   : > { %v5060_v7 = vunpack.i.h.bf16 %v5058_v19  ;;  %v5059_v50 = vunpack.i.l.bf16 %v5058_v19  ;;  %v3955_v57 = vsel %vm414_vm1, %v7619_v13, %v7618_v58  ;;  %v1031_v20 = vadd.f32 %v6646_v52, %v992_v22  ;;  %v7622_v24 = vld [vmem:[#allocation66_spill] sm:$0xff]  ;;  %v7623_v3 = vld [vmem:[#allocation29_spill] sm:$0xff]  ;;  %v7624_v22 = vld [vmem:[#allocation64_spill] sm:$0xff] }
 0x327   : > { %v5063_v8 = vpop.permute.xlu0 %5062  ;;  %3894 = vrot.lane.b32.xlu1 %v7620_v33, %s5325_s29  ;;  %v1032_v42 = vadd.f32 %v6646_v52, %v993_v5  ;;  %v3987_v11 = vsel %vm598_vm7, %v3955_v57, %v6631_v37  ;;  %v3956_v41 = vsel %vm414_vm1, %v7623_v3, %v7622_v24  ;;  %v1062_v17 = vmax.f32 %v1030_v40, 0.0 }
 0x328   : > { %v7140_v63 = vsel %vm414_vm1, %v1092_v49, %v5060_v7  ;;  %v7143_v48 = vsel %vm414_vm1, %v1091_v21, %v5059_v50  ;;  %v5065_v25 = vunpack.i.h.bf16 %v5063_v8  ;;  %v5064_v34 = vunpack.i.l.bf16 %v5063_v8 }
 0x329   : > { %v3887_v4 = vpop.permute.xlu1 %3886  ;;  %3892 = vrot.lane.b32.xlu0 %v7621_v18, %s5325_s29  ;;  %v3988_v37 = vsel %vm598_vm7, %v3956_v41, %v6661_v45  ;;  %v1061_v21 = vmax.f32 %v1029_v9, 0.0  ;;  %v3953_v5 = vsel %vm414_vm1, %v7625_v35, %v7624_v22  ;;  %v1063_v49 = vmax.f32 %v1031_v20, 0.0 }
 0x32a   : > { %v7155_v10 = vsel %vm414_vm1, %v1090_v29, %v5065_v25  ;;  %v7158_v44 = vsel %vm414_vm1, %v1089_v32, %v5064_v34  ;;  %v4019_v52 = vsel %vm602_vm9, %v3987_v11, %v3887_v4  ;;  %v1064_v7 = vmax.f32 %v1032_v42, 0.0  ;;  %v7627_v42 = vld [vmem:[#allocation68_spill] sm:$0xff]  ;;  %v7628_v11 = vld [vmem:[#allocation31_spill] sm:$0xff] }
 0x32b   : > { %4051 = vst.msk [vmem:[%s6673_s17 + $0xd8] sm:$0xff] %vm606_vm11, %v4019_v52  ;;  %v3889_v12 = vpop.permute.xlu0 %3888  ;;  %v3985_v32 = vsel %vm598_vm7, %v3953_v5, %v6653_v16  ;;  %v1093_v9 = vmul.f32 1.4142135, %v1061_v21  ;;  %v1094_v40 = vmul.f32 1.4142135, %v1062_v17  ;;  %v3957_v4 = vsel %vm414_vm1, %v7628_v11, %v7627_v42 }
 0x32c   : > { %v4020_v19 = vsel %vm602_vm9, %v3988_v37, %v3889_v12  ;;  %v1095_v57 = vmul.f32 1.4142135, %v1063_v49  ;;  %v1096_v8 = vmul.f32 1.4142135, %v1064_v7  ;;  %v3989_v3 = vsel %vm598_vm7, %v3957_v4, %v6706_v14 }
 0x32d   : > { %4052 = vst.msk [vmem:[%s6673_s17 + $0xe0] sm:$0xff] %vm606_vm11, %v4020_v19  ;;  %v3883_v50 = vpop.permute.xlu1 %3882 }
 0x32e   : > { %v4017_v45 = vsel %vm602_vm9, %v3985_v32, %v3883_v50 }
 0x32f   : > { %4049 = vst.msk [vmem:[%s6673_s17 + $0xc8] sm:$0xff] %vm606_vm11, %v4017_v45  ;;  %v5073_v29 = vpop.permute.xlu0 %5072 }
 0x330   : > { %v5075_v58 = vunpack.i.h.bf16 %v5073_v29  ;;  %v5074_v13 = vunpack.i.l.bf16 %v5073_v29 }
 0x331   : > { %v5068_v33 = vpop.permute.xlu1 %5067 }
 0x332   : > { %v7177_v25 = vsel %vm414_vm1, %v1093_v9, %v5074_v13  ;;  %v7180_v16 = vsel %vm414_vm1, %v1094_v40, %v5075_v58  ;;  %v5070_v34 = vunpack.i.h.bf16 %v5068_v33  ;;  %v5069_v20 = vunpack.i.l.bf16 %v5068_v33 }
 0x333   : > { %7626 = vst [vmem:[#allocation38_spill] sm:$0xff] %v7180_v16  ;;  %v5083_v41 = vpop.permute.xlu0 %5082 }
 0x334   : > { %v7186_v18 = vsel %vm414_vm1, %v1096_v8, %v5070_v34  ;;  %v7189_v24 = vsel %vm414_vm1, %v1095_v57, %v5069_v20  ;;  %v5085_v13 = vunpack.i.h.bf16 %v5083_v41  ;;  %v5084_v57 = vunpack.i.l.bf16 %v5083_v41 }
 0x335   : > { %v3891_v52 = vpop.permute.xlu1 %3890 }
 0x336   : > { %v4021_v37 = vsel %vm602_vm9, %v3989_v3, %v3891_v52  ;;  %v3320_v41 = vsel %vm598_vm7, %v6756_v36, %v5085_v13 }
 0x337   : > { %4053 = vst.msk [vmem:[%s6673_s17 + $0xe8] sm:$0xff] %vm606_vm11, %v4021_v37  ;;  %v5093_v21 = vpop.permute.xlu0 %5092 }
 0x338   : > { %v5095_v36 = vunpack.i.h.bf16 %v5093_v21 }
 0x339   : > { %v5078_v12 = vpop.permute.xlu1 %5077 }
 0x33a   : > { %v5080_v40 = vunpack.i.h.bf16 %v5078_v12  ;;  %v5079_v58 = vunpack.i.l.bf16 %v5078_v12 }
 0x33b   : > { %v7196_v22 = vpop.permute.xlu0 %5102 }
 0x33c   : > { %v3322_v42 = vsel %vm598_vm7, %v6740_v60, %v5080_v40  ;;  %v3321_v11 = vsel %vm598_vm7, %v6744_v28, %v5079_v58  ;;  %v3319_v60 = vsel %vm598_vm7, %v6760_v27, %v5084_v57  ;;  %v5094_v27 = vunpack.i.l.bf16 %v5093_v21 }
 0x33d   : > { %v5088_v17 = vpop.permute.xlu1 %5087 }
 0x33f   : > { %v7202_v19 = vpop.permute.xlu0 %5112 }
 0x341   : > { %v7198_v35 = vpop.permute.xlu1 %5097 }
 0x343   : > { %v7206_v14 = vpop.permute.xlu0 %5122 }
 0x345   : > { %v7200_v5 = vpop.permute.xlu1 %5107 }
 0x347   : > { %v7210_v32 = vpop.permute.xlu0 %5132 }
 0x349   : > { %v7204_v49 = vpop.permute.xlu1 %5117 }
 0x34d   : > { %v7208_v7 = vpop.permute.xlu1 %5127 }
 0x34f   : > { %v7214_v45 = vpop.permute.xlu0 %5142 }
 0x351   : > { %v7212_v50 = vpop.permute.xlu1 %5137 }
 0x355   : > { %v7216_v29 = vpop.permute.xlu1 %5147 }
 0x357   : > { %v7218_v9 = vpop.permute.xlu0 %5152 }
 0x35e   : > { %v5158_v8 = vpop.permute.xlu1 %5157 }
 0x35f   : > { %v5160_v33 = vunpack.i.h.bf16 %v5158_v8  ;;  %v5159_v34 = vunpack.i.l.bf16 %v5158_v8  ;;  %v5163_v20 = vpop.permute.xlu0 %5162  ;;  %v5090_v8 = vunpack.i.h.bf16 %v5088_v17 }
 0x360   : > { %v5165_v4 = vunpack.i.h.bf16 %v5163_v20  ;;  %v5164_v3 = vunpack.i.l.bf16 %v5163_v20  ;;  %v5089_v20 = vunpack.i.l.bf16 %v5088_v17 }
 0x361   : > { %v3354_v28 = vsel %vm602_vm9, %v3322_v42, %v5160_v33  ;;  %v3353_v52 = vsel %vm602_vm9, %v3321_v11, %v5159_v34  ;;  %v3326_v34 = vsel %vm598_vm7, %v6804_v62, %v5090_v8 }
 0x362   : > { %v4455_v37 = vpack.c.bf16 %v3354_v28, %v3354_v28  ;;  %v4454_v12 = vpack.c.bf16 %v3353_v52, %v3353_v52  ;;  %v3351_v40 = vsel %vm602_vm9, %v3319_v60, %v5164_v3  ;;  %v3352_v58 = vsel %vm602_vm9, %v3320_v41, %v5165_v4 }
 0x363   : > { %v4452_v59 = vpack.c.bf16 %v3351_v40, %v3351_v40  ;;  %v4453_v16 = vpack.c.bf16 %v3352_v58, %v3352_v58  ;;  %v3325_v17 = vsel %vm598_vm7, %v6809_v46, %v5089_v20  ;;  %v3323_v3 = vsel %vm598_vm7, %v6820_v56, %v5094_v27 }
 0x364   : > { %3515 = vst.msk [vmem:[%s7229_s18 + $0xc] sm:$0xf] %vm3511_vm12, %v4455_v37  ;;  %3514 = vst.msk [vmem:[%s7229_s18 + $0x8] sm:$0xf] %vm3511_vm12, %v4454_v12  ;;  %v5100_v60 = vunpack.i.h.bf16 %v7198_v35  ;;  %v5099_v46 = vunpack.i.l.bf16 %v7198_v35  ;;  %v5105_v12 = vunpack.i.h.bf16 %v7196_v22  ;;  %v5104_v56 = vunpack.i.l.bf16 %v7196_v22 }
 0x365   : > { %3512 = vst.msk [vmem:[%s7229_s18] sm:$0xf] %vm3511_vm12, %v4452_v59  ;;  %3513 = vst.msk [vmem:[%s7229_s18 + $0x4] sm:$0xf] %vm3511_vm12, %v4453_v16  ;;  %v5168_v13 = vpop.permute.xlu1 %5167  ;;  %v3324_v16 = vsel %vm598_vm7, %v6816_v31, %v5095_v36 }
 0x366   : > { %v5170_v57 = vunpack.i.h.bf16 %v5168_v13  ;;  %v5169_v33 = vunpack.i.l.bf16 %v5168_v13  ;;  %v3330_v8 = vsel %vm598_vm7, %v6870_v26, %v5100_v60  ;;  %v3329_v20 = vsel %vm598_vm7, %v6874_v53, %v5099_v46 }
 0x367   : > { %v5173_v42 = vpop.permute.xlu0 %5172 }
 0x368   : > { %v3358_v11 = vsel %vm602_vm9, %v3326_v34, %v5170_v57  ;;  %v3357_v21 = vsel %vm602_vm9, %v3325_v17, %v5169_v33  ;;  %v5175_v4 = vunpack.i.h.bf16 %v5173_v42  ;;  %v5174_v59 = vunpack.i.l.bf16 %v5173_v42 }
 0x369   : > { %v4459_v62 = vpack.c.bf16 %v3358_v11, %v3358_v11  ;;  %v4458_v41 = vpack.c.bf16 %v3357_v21, %v3357_v21  ;;  %v3328_v33 = vsel %vm598_vm7, %v6885_v43, %v5105_v12  ;;  %v3327_v34 = vsel %vm598_vm7, %v6889_v61, %v5104_v56 }
 0x36a   : > { %v3355_v28 = vsel %vm602_vm9, %v3323_v3, %v5174_v59  ;;  %v3356_v52 = vsel %vm602_vm9, %v3324_v16, %v5175_v4  ;;  %v5115_v4 = vunpack.i.h.bf16 %v7202_v19  ;;  %v5114_v59 = vunpack.i.l.bf16 %v7202_v19 }
 0x36b   : > { %3519 = vst.msk [vmem:[%s7229_s18 + $0x1c] sm:$0xf] %vm3511_vm12, %v4459_v62  ;;  %3518 = vst.msk [vmem:[%s7229_s18 + $0x18] sm:$0xf] %vm3511_vm12, %v4458_v41  ;;  %v4456_v37 = vpack.c.bf16 %v3355_v28, %v3355_v28  ;;  %v4457_v31 = vpack.c.bf16 %v3356_v52, %v3356_v52  ;;  %v5110_v43 = vunpack.i.h.bf16 %v7200_v5  ;;  %v5109_v61 = vunpack.i.l.bf16 %v7200_v5 }
 0x36c   : > { %v3332_v28 = vsel %vm598_vm7, %v6950_v39, %v5115_v4  ;;  %v3331_v19 = vsel %vm598_vm7, %v6954_v15, %v5114_v59  ;;  %v5120_v15 = vunpack.i.h.bf16 %v7204_v49  ;;  %v5135_v59 = vunpack.i.h.bf16 %v7210_v32 }
 0x36d   : > { %v5178_v40 = vpop.permute.xlu1 %5177  ;;  %3516 = vst.msk [vmem:[%s7229_s18 + $0x10] sm:$0xf] %vm3511_vm12, %v4456_v37  ;;  %3517 = vst.msk [vmem:[%s7229_s18 + $0x14] sm:$0xf] %vm3511_vm12, %v4457_v31  ;;  %v3334_v5 = vsel %vm598_vm7, %v6938_v47, %v5110_v43  ;;  %v3333_v52 = vsel %vm598_vm7, %v6945_v51, %v5109_v61  ;;  %v5125_v47 = vunpack.i.h.bf16 %v7206_v14  ;;  %v5124_v51 = vunpack.i.l.bf16 %v7206_v14 }
 0x36e   : > { %v5180_v35 = vunpack.i.h.bf16 %v5178_v40  ;;  %v5179_v58 = vunpack.i.l.bf16 %v5178_v40 }
 0x36f   : > { %v5183_v36 = vpop.permute.xlu0 %5182  ;;  %v3336_v14 = vsel %vm598_vm7, %v7022_v30, %v5125_v47 }
 0x370   : > { %v3362_v27 = vsel %vm602_vm9, %v3330_v8, %v5180_v35  ;;  %v3361_v22 = vsel %vm602_vm9, %v3329_v20, %v5179_v58  ;;  %v5185_v13 = vunpack.i.h.bf16 %v5183_v36  ;;  %v5184_v57 = vunpack.i.l.bf16 %v5183_v36 }
 0x371   : > { %v4463_v17 = vpack.c.bf16 %v3362_v27, %v3362_v27  ;;  %v4462_v26 = vpack.c.bf16 %v3361_v22, %v3361_v22  ;;  %v5119_v8 = vunpack.i.l.bf16 %v7204_v49  ;;  %v3338_v22 = vsel %vm598_vm7, %v7005_v2, %v5120_v15 }
 0x372   : > { %v3359_v42 = vsel %vm602_vm9, %v3327_v34, %v5184_v57  ;;  %v3360_v53 = vsel %vm602_vm9, %v3328_v33, %v5185_v13 }
 0x373   : > { %3523 = vst.msk [vmem:[%s7229_s18 + $0x2c] sm:$0xf] %vm3511_vm12, %v4463_v17  ;;  %3522 = vst.msk [vmem:[%s7229_s18 + $0x28] sm:$0xf] %vm3511_vm12, %v4462_v26  ;;  %v4460_v11 = vpack.c.bf16 %v3359_v42, %v3359_v42  ;;  %v4461_v21 = vpack.c.bf16 %v3360_v53, %v3360_v53  ;;  %v3337_v49 = vsel %vm598_vm7, %v7009_v54, %v5119_v8  ;;  %v5130_v53 = vunpack.i.h.bf16 %v7208_v7 }
 0x374   : > { %v3335_v26 = vsel %vm598_vm7, %v7026_v1, %v5124_v51  ;;  %v5129_v54 = vunpack.i.l.bf16 %v7208_v7  ;;  %v5134_v1 = vunpack.i.l.bf16 %v7210_v32 }
 0x375   : > { %3520 = vst.msk [vmem:[%s7229_s18 + $0x20] sm:$0xf] %vm3511_vm12, %v4460_v11  ;;  %3521 = vst.msk [vmem:[%s7229_s18 + $0x24] sm:$0xf] %vm3511_vm12, %v4461_v21 }
 0x376   : > { %v5188_v16 = vpop.permute.xlu1 %5187 }
 0x377   : > { %v5193_v3 = vpop.permute.xlu0 %5192  ;;  %v5190_v62 = vunpack.i.h.bf16 %v5188_v16  ;;  %v5189_v41 = vunpack.i.l.bf16 %v5188_v16  ;;  %v3342_v16 = vsel %vm598_vm7, %v7074_v38, %v5130_v53 }
 0x378   : > { %v5195_v60 = vunpack.i.h.bf16 %v5193_v3  ;;  %v5194_v46 = vunpack.i.l.bf16 %v5193_v3  ;;  %v3341_v3 = vsel %vm598_vm7, %v7079_v55, %v5129_v54 }
 0x379   : > { %v3366_v37 = vsel %vm602_vm9, %v3334_v5, %v5190_v62  ;;  %v3365_v31 = vsel %vm602_vm9, %v3333_v52, %v5189_v41 }
 0x37a   : > { %v3363_v12 = vsel %vm602_vm9, %v3331_v19, %v5194_v46  ;;  %v3364_v56 = vsel %vm602_vm9, %v3332_v28, %v5195_v60  ;;  %v4467_v39 = vpack.c.bf16 %v3366_v37, %v3366_v37  ;;  %v4466_v40 = vpack.c.bf16 %v3365_v31, %v3365_v31 }
 0x37b   : > { %v4464_v35 = vpack.c.bf16 %v3363_v12, %v3363_v12  ;;  %v4465_v58 = vpack.c.bf16 %v3364_v56, %v3364_v56  ;;  %v3340_v28 = vsel %vm598_vm7, %v7088_v0, %v5135_v59  ;;  %v3339_v19 = vsel %vm598_vm7, %v7092_v6, %v5134_v1 }
 0x37c   : > { %3527 = vst.msk [vmem:[%s7229_s18 + $0x3c] sm:$0xf] %vm3511_vm12, %v4467_v39  ;;  %3526 = vst.msk [vmem:[%s7229_s18 + $0x38] sm:$0xf] %vm3511_vm12, %v4466_v40  ;;  %v5140_v12 = vunpack.i.h.bf16 %v7212_v50  ;;  %v5139_v56 = vunpack.i.l.bf16 %v7212_v50  ;;  %v5145_v0 = vunpack.i.h.bf16 %v7214_v45  ;;  %v5144_v6 = vunpack.i.l.bf16 %v7214_v45 }
 0x37d   : > { %3524 = vst.msk [vmem:[%s7229_s18 + $0x30] sm:$0xf] %vm3511_vm12, %v4464_v35  ;;  %3525 = vst.msk [vmem:[%s7229_s18 + $0x34] sm:$0xf] %vm3511_vm12, %v4465_v58  ;;  %v5198_v20 = vpop.permute.xlu1 %5197 }
 0x37e   : > { %v5200_v36 = vunpack.i.h.bf16 %v5198_v20  ;;  %v5199_v27 = vunpack.i.l.bf16 %v5198_v20  ;;  %v3346_v15 = vsel %vm598_vm7, %v7140_v63, %v5140_v12  ;;  %v3345_v8 = vsel %vm598_vm7, %v7143_v48, %v5139_v56 }
 0x37f   : > { %v5203_v13 = vpop.permute.xlu0 %5202  ;;  %v3344_v51 = vsel %vm598_vm7, %v7155_v10, %v5145_v0  ;;  %v3343_v45 = vsel %vm598_vm7, %v7158_v44, %v5144_v6  ;;  %v5155_v44 = vunpack.i.h.bf16 %v7218_v9 }
 0x380   : > { %v3370_v57 = vsel %vm602_vm9, %v3338_v22, %v5200_v36  ;;  %v3369_v33 = vsel %vm602_vm9, %v3337_v49, %v5199_v27  ;;  %v5205_v34 = vunpack.i.h.bf16 %v5203_v13  ;;  %v5204_v17 = vunpack.i.l.bf16 %v5203_v13 }
 0x381   : > { %v4471_v2 = vpack.c.bf16 %v3370_v57, %v3370_v57  ;;  %v4470_v42 = vpack.c.bf16 %v3369_v33, %v3369_v33  ;;  %v5150_v49 = vunpack.i.h.bf16 %v7216_v29  ;;  %v5149_v13 = vunpack.i.l.bf16 %v7216_v29 }
 0x382   : > { %v3367_v11 = vsel %vm602_vm9, %v3335_v26, %v5204_v17  ;;  %v3368_v21 = vsel %vm602_vm9, %v3336_v14, %v5205_v34  ;;  %v5154_v33 = vunpack.i.l.bf16 %v7218_v9  ;;  %v7629_v17 = vld [vmem:[#allocation67_spill] sm:$0xff]  ;;  %v7630_v14 = vld [vmem:[#allocation30_spill] sm:$0xff] }
 0x383   : > { %3531 = vst.msk [vmem:[%s7229_s18 + $0x4c] sm:$0xf] %vm3511_vm12, %v4471_v2  ;;  %3530 = vst.msk [vmem:[%s7229_s18 + $0x48] sm:$0xf] %vm3511_vm12, %v4470_v42  ;;  %v4468_v4 = vpack.c.bf16 %v3367_v11, %v3367_v11  ;;  %v4469_v30 = vpack.c.bf16 %v3368_v21, %v3368_v21  ;;  %v3959_v26 = vsel %vm414_vm1, %v7630_v14, %v7629_v17 }
 0x384   : > { %v3991_v42 = vsel %vm598_vm7, %v3959_v26, %v6681_v23  ;;  %v3350_v53 = vsel %vm598_vm7, %v7186_v18, %v5150_v49  ;;  %v3349_v9 = vsel %vm598_vm7, %v7189_v24, %v5149_v13  ;;  %v3347_v59 = vsel %vm598_vm7, %v7177_v25, %v5154_v33  ;;  %v7631_v23 = vld [vmem:[#allocation38_spill] sm:$0xff]  ;;  %v7634_v25 = vld [vmem:[#allocation93_spill] sm:$0xff] }
 0x385   : > { %v5208_v43 = vpop.permute.xlu1 %5207  ;;  %3528 = vst.msk [vmem:[%s7229_s18 + $0x40] sm:$0xf] %vm3511_vm12, %v4468_v4  ;;  %3529 = vst.msk [vmem:[%s7229_s18 + $0x44] sm:$0xf] %vm3511_vm12, %v4469_v30  ;;  %v3348_v1 = vsel %vm598_vm7, %v7631_v23, %v5155_v44 }
 0x386   : > { %v5210_v7 = vunpack.i.h.bf16 %v5208_v43  ;;  %v5209_v61 = vunpack.i.l.bf16 %v5208_v43 }
 0x387   : > { %v5213_v62 = vpop.permute.xlu0 %5212 }
 0x388   : > { %v3374_v41 = vsel %vm602_vm9, %v3342_v16, %v5210_v7  ;;  %v3373_v32 = vsel %vm602_vm9, %v3341_v3, %v5209_v61  ;;  %v5215_v60 = vunpack.i.h.bf16 %v5213_v62  ;;  %v5214_v46 = vunpack.i.l.bf16 %v5213_v62  ;;  %v7632_v7 = vld [vmem:[#allocation65_spill] sm:$0xff]  ;;  %v7633_v61 = vld [vmem:[#allocation28_spill] sm:$0xff] }
 0x389   : > { %v4475_v5 = vpack.c.bf16 %v3374_v41, %v3374_v41  ;;  %v4474_v38 = vpack.c.bf16 %v3373_v32, %v3373_v32  ;;  %v3958_v16 = vsel %vm414_vm1, %v7633_v61, %v7632_v7 }
 0x38a   : > { %v3371_v52 = vsel %vm602_vm9, %v3339_v19, %v5214_v46  ;;  %v3372_v55 = vsel %vm602_vm9, %v3340_v28, %v5215_v60  ;;  %v3990_v32 = vsel %vm598_vm7, %v3958_v16, %v7634_v25 }
 0x38b   : > { %3535 = vst.msk [vmem:[%s7229_s18 + $0x5c] sm:$0xf] %vm3511_vm12, %v4475_v5  ;;  %3534 = vst.msk [vmem:[%s7229_s18 + $0x58] sm:$0xf] %vm3511_vm12, %v4474_v38  ;;  %v4472_v37 = vpack.c.bf16 %v3371_v52, %v3371_v52  ;;  %v4473_v31 = vpack.c.bf16 %v3372_v55, %v3372_v55 }
 0x38d   : > { %3532 = vst.msk [vmem:[%s7229_s18 + $0x50] sm:$0xf] %vm3511_vm12, %v4472_v37  ;;  %3533 = vst.msk [vmem:[%s7229_s18 + $0x54] sm:$0xf] %vm3511_vm12, %v4473_v31 }
 0x38e   : > { %v5218_v39 = vpop.permute.xlu1 %5217 }
 0x38f   : > { %v5220_v40 = vunpack.i.h.bf16 %v5218_v39  ;;  %v5219_v35 = vunpack.i.l.bf16 %v5218_v39  ;;  %v5223_v58 = vpop.permute.xlu0 %5222 }
 0x390   : > { %v5225_v50 = vunpack.i.h.bf16 %v5223_v58  ;;  %v5224_v47 = vunpack.i.l.bf16 %v5223_v58 }
 0x391   : > { %v3378_v20 = vsel %vm602_vm9, %v3346_v15, %v5220_v40  ;;  %v3377_v36 = vsel %vm602_vm9, %v3345_v8, %v5219_v35 }
 0x392   : > { %v4479_v63 = vpack.c.bf16 %v3378_v20, %v3378_v20  ;;  %v4478_v27 = vpack.c.bf16 %v3377_v36, %v3377_v36  ;;  %v3375_v22 = vsel %vm602_vm9, %v3343_v45, %v5224_v47  ;;  %v3376_v48 = vsel %vm602_vm9, %v3344_v51, %v5225_v50 }
 0x393   : > { %v4476_v10 = vpack.c.bf16 %v3375_v22, %v3375_v22  ;;  %v4477_v57 = vpack.c.bf16 %v3376_v48, %v3376_v48 }
 0x394   : > { %3539 = vst.msk [vmem:[%s7229_s18 + $0x6c] sm:$0xf] %vm3511_vm12, %v4479_v63  ;;  %3538 = vst.msk [vmem:[%s7229_s18 + $0x68] sm:$0xf] %vm3511_vm12, %v4478_v27 }
 0x395   : > { %3536 = vst.msk [vmem:[%s7229_s18 + $0x60] sm:$0xf] %vm3511_vm12, %v4476_v10  ;;  %3537 = vst.msk [vmem:[%s7229_s18 + $0x64] sm:$0xf] %vm3511_vm12, %v4477_v57  ;;  %v5228_v34 = vpop.permute.xlu1 %5227 }
 0x396   : > { %v5230_v29 = vunpack.i.h.bf16 %v5228_v34  ;;  %v5229_v2 = vunpack.i.l.bf16 %v5228_v34 }
 0x397   : > { %v5233_v54 = vpop.permute.xlu0 %5232 }
 0x398   : > { %v3382_v11 = vsel %vm602_vm9, %v3350_v53, %v5230_v29  ;;  %v3381_v21 = vsel %vm602_vm9, %v3349_v9, %v5229_v2  ;;  %v5235_v4 = vunpack.i.h.bf16 %v5233_v54  ;;  %v5234_v30 = vunpack.i.l.bf16 %v5233_v54 }
 0x399   : > { %v4483_v18 = vpack.c.bf16 %v3382_v11, %v3382_v11  ;;  %v4482_v24 = vpack.c.bf16 %v3381_v21, %v3381_v21  ;;  %v3895_v43 = vpop.permute.xlu1 %3894 }
 0x39a   : > { %v3379_v3 = vsel %vm602_vm9, %v3347_v59, %v5234_v30  ;;  %v3380_v62 = vsel %vm602_vm9, %v3348_v1, %v5235_v4  ;;  %v4023_v41 = vsel %vm602_vm9, %v3991_v42, %v3895_v43 }
 0x39b   : > { %3543 = vst.msk [vmem:[%s7229_s18 + $0x7c] sm:$0xf] %vm3511_vm12, %v4483_v18  ;;  %3542 = vst.msk [vmem:[%s7229_s18 + $0x78] sm:$0xf] %vm3511_vm12, %v4482_v24  ;;  %v4480_v60 = vpack.c.bf16 %v3379_v3, %v3379_v3  ;;  %v4481_v46 = vpack.c.bf16 %v3380_v62, %v3380_v62  ;;  %v3893_v28 = vpop.permute.xlu0 %3892 }
 0x39c   : > { %4055 = vst.msk [vmem:[%s6673_s17 + $0xf8] sm:$0xff] %vm606_vm11, %v4023_v41  ;;  %v4022_v19 = vsel %vm602_vm9, %v3990_v32, %v3893_v28 }
 0x39d   : > { %3540 = vst.msk [vmem:[%s7229_s18 + $0x70] sm:$0xf] %vm3511_vm12, %v4480_v60  ;;  %3541 = vst.msk [vmem:[%s7229_s18 + $0x74] sm:$0xf] %vm3511_vm12, %v4481_v46 }
 0x39e   : > { %4054 = vst.msk [vmem:[%s6673_s17 + $0xf0] sm:$0xff] %vm606_vm11, %v4022_v19 }
 0x39f PF: > { %s20_s11 = sadd.s32 1, %s5317_s11   ;;  %s7635_s30 = smov %s5313_s10 }
 0x3a0   : > { %p17_p5 = scmp.ge.s32.totalorder %s20_s11, 4   ;;  %s7636_s10 = smov %s7638_s12 }
 0x3a2   :  { %19 = sbr.rel (!%p17_p5) target bundleno = 2 (0x2), region = 103 }

// kernel: synthesis_block_forward.3
= control target key start
LH: loop header
LB: loop body
LE: loop exit
PB: predicated region body
PF: predicated region fallthrough
CT: control target
= control target key end

     0   :  { %s2259_s27 = smov 0   ;;  %s2261_s28 = smov 0   ;;  %s2825_s0 = inlined_call_operand.vmem [shape: bf16[2,1024,72], index: 0, kind: input, shape index: {}]   ;;  %s2826_s1 = inlined_call_operand.vmem [shape: f32[2,1,8], index: 1, kind: input, shape index: {}]   ;;  %s2827_s2 = inlined_call_operand.vmem [shape: f32[8,8], index: 2, kind: input, shape index: {}]   ;;  %s2828_s3 = inlined_call_operand.vmem [shape: f32[1,8], index: 3, kind: input, shape index: {}]   ;;  %s2829_s4 = inlined_call_operand.vmem [shape: f32[8,8], index: 4, kind: input, shape index: {}]   ;;  %s2830_s5 = inlined_call_operand.vmem [shape: bf16[72,8], index: 5, kind: input, shape index: {}]   ;;  %s2831_s6 = inlined_call_operand.vmem [shape: f32[1,8], index: 6, kind: input, shape index: {}]   ;;  %s2832_s7 = inlined_call_operand.vmem [shape: f32[2,1024,8], index: 7, kind: input, shape index: {}]   ;;  %s2833_s8 = inlined_call_operand.vmem [shape: f32[2,1024,8], index: 8, kind: output, shape index: {}]  }
   0x1   :  { %s2263_s29 = smov 0   ;;  %s2265_s30 = smov 0  }
   0x2   :  { %s2267_s9 = smov 0  }
   0x3 LB: > { %s27_s10 = sadd.s32 1, %s2194_s29  ;;  %s30_s11 = sadd.s32 1, %s2198_s30  ;;  %s2202_s9 = sphi %s2267_s9, %s18_s9   ;;  %s2198_s30 = sphi %s2265_s30, %s2837_s30   ;;  %s2194_s29 = sphi %s2263_s29, %s2836_s29   ;;  %s2190_s28 = sphi %s2261_s28, %s2835_s28   ;;  %s2186_s27 = sphi %s2259_s27, %s2834_s27  }
   0x4   : > { %p28_p0 = scmp.ge.s32.totalorder %s27_s10, 2  ;;  %p1759_p1 = scmp.ge.s32.totalorder %s2202_s9, 1 }
   0x5   : > { %p308_p2 = scmp.lt.s32.totalorder %s2202_s9, 5 }
   0x6   : > { %s2839_s10 = smov (%p28_p0, %s27_s10), 0  ;;  %s2841_s11 = smov (!%p28_p0, %s30_s11), %s2198_s30 }
   0x7   : > { %p309_p3 = pnand %p1759_p1, %p308_p2  ;;  %p32_p4 = scmp.ge.s32.totalorder %s2841_s11, 2 }
   0x8   : > { %p363_p5 = scmp.lt.s32.totalorder (!%p309_p3), %s2190_s28, 1  ;;  %s2206_s14 = smov (!%p309_p3), 24  }
   0x9   : > { %s2843_s11 = smov (%p32_p4, %s2841_s11), 0  ;;  %312 = sbr.rel (%p309_p3) target bundleno = 617 (0x269), region = 52 }
   0xa   : > { %s2207_s15 = smov (!%p309_p3), 8   ;;  %s2208_s18 = smov (!%p309_p3), 32  }
   0xb   : > { %s2209_s19 = smov (!%p309_p3), 16   ;;  %s2210_s20 = smov (!%p309_p3), 48  }
   0xc   : > { %s2211_s21 = smov (!%p309_p3), 40   ;;  %s2212_s22 = smov (!%p309_p3), 64  }
   0xd   : > { %s2213_s23 = smov (!%p309_p3), 56   ;;  %s1760_s24 = sshll.u32 (!%p309_p3), %s2186_s27, 6 }
   0xe   : > { %v397_v0 = vld [vmem:[%s2827_s2] sm:$0xff]  ;;  %v2204_v1 = vmov 0.0   ;;  %vm2205_vm0 = vmmov 0   ;;  %s2845_s28 = smov (!%p363_p5, %s2190_s28), 1  ;;  %vm399_vm1 = vcmask 64512   ;;  %vm950_vm2 = vcmask 1043456  }
   0xf   : > { %2011 = vmatprep.subr.mxu0 %v2204_v1  ;;  %2013 = vmatprep.mubr.msk.f32.mxu0 %vm2205_vm0, %v2204_v1  ;;  %s374_s16 = scalar_lea.vmem %s2826_s1, %s2845_s28  ;;  %v474_v3 = vld [vmem:[%s2829_s4] sm:$0xff]  ;;  %v2158_v6 = vld [vmem:[%s2830_s5 + $0x18] sm:$0xff]   ;;  %v2159_v7 = vld [vmem:[%s2830_s5 + $0x10] sm:$0xff]   ;;  %p365_p6 = scmp.lt.s32.totalorder %s1760_s24, 127  ;;  %vm575_vm3 = vcmask 130048   ;;  %vm577_vm4 = vcmask 195584   ;;  %v717_v17 = vlaneseq }
  0x10   : > { %2012 = vmatpush3.msra.mxu0 %v397_v0  ;;  %2016 = vmatprep.subr.mxu1 %v2204_v1  ;;  %v396_v2 = vld [vmem:[%s374_s16] sm:$0x1]  ;;  %v2160_v11 = vld [vmem:[%s2830_s5 + $0x8] sm:$0xff]   ;;  %s1761_s25 = sshll.u32 %s2845_s28, 7  ;;  %vm579_vm5 = vcmask 261120   ;;  %vm581_vm6 = vcmask 326656  }
  0x11   : > { %2018 = vmatprep.mubr.msk.f32.mxu1 %vm2205_vm0, %v2204_v1  ;;  %2014 = vmatmul.mubr.msk.f32.vlgmr.msra.gmra.mxu0 %vm399_vm1, %v396_v2  ;;  %v2157_v4 = vld [vmem:[%s2830_s5 + $0x20] ss:$0 sps:$4 sm:$0xff]   ;;  %s2847_s24 = smov (!%p365_p6, %s1760_s24), 127  ;;  %v2334_v24 = vshrl.u32 %v717_v17, 7  ;;  %vm583_vm7 = vcmask 392192   ;;  %vm585_vm8 = vcmask 457728  }
  0x12   : > { %2017 = vmatpush3.msra.mxu1 %v474_v3  ;;  %2105 = vmatprep.subr.msk.bf16.mxu0 %vm950_vm2, %v2157_v4  ;;  %v952_v5 = vsel %vm950_vm2, %v2157_v4, 0  ;;  %v398_v8 = vld [vmem:[%s2828_s3] sm:$0x1]  ;;  %s2325_s26 = sadd.s32 %s1761_s25, %s2847_s24  ;;  %vm587_vm9 = vcmask 523264   ;;  %vm853_vm10 = vcmask 588800  }
  0x13   : > { %2106 = vmatprep.subr.msk.bf16.mxu1 %vm950_vm2, %v2157_v4  ;;  %2022 = vmatpush3.bf16.msra.mxu0 %v952_v5  ;;  %v2161_v14 = vld [vmem:[%s2830_s5] sm:$0xff]   ;;  %s1762_s12 = sshll.u32 %s2325_s26, 2  ;;  %v719_v32 = vsub.s32 0, %v2334_v24  ;;  %s1765_s28 = sshll.u32 %s2325_s26, 3 }
  0x14   : > { %2023 = vmatprep.subr.bf16.mxu0 %v2158_v6  ;;  %s2332_s27 = scalar_lea.vmem %s2825_s0, %s1762_s12 }
  0x15   : > { %v1812_v27 = vld [vmem:[%s2332_s27] sm:$0xff]   ;;  %v1939_v30 = vld [vmem:[%s2332_s27 + $0x8] sm:$0xff]   ;;  %v1940_v35 = vld [vmem:[%s2332_s27 + $0x10] sm:$0xff]  }
  0x16   : > { %v1954_v29 = vld [vmem:[%s2332_s27 + $0x80] sm:$0xff]   ;;  %v1955_v31 = vld [vmem:[%s2332_s27 + $0x88] sm:$0xff]   ;;  %v1813_v33 = vunpack.c.l.bf16 %v1812_v27  ;;  %v1814_v34 = vunpack.c.h.bf16 %v1812_v27  ;;  %v1956_v36 = vld [vmem:[%s2332_s27 + $0x90] sm:$0xff]   ;;  %v1817_v42 = vunpack.c.l.bf16 %v1939_v30  ;;  %v1818_v45 = vunpack.c.h.bf16 %v1939_v30 }
  0x17   : > { %2024 = vmatpush3.bf16.msra.mxu0 %v2158_v6  ;;  %v1877_v40 = vunpack.c.l.bf16 %v1954_v29  ;;  %v1878_v41 = vunpack.c.h.bf16 %v1954_v29  ;;  %v1941_v43 = vld [vmem:[%s2332_s27 + $0x18] sm:$0xff]   ;;  %v1881_v46 = vunpack.c.l.bf16 %v1955_v31  ;;  %v1882_v47 = vunpack.c.h.bf16 %v1955_v31  ;;  %v1942_v49 = vld [vmem:[%s2332_s27 + $0x20] sm:$0xff]   ;;  %v1944_v30 = vld [vmem:[%s2332_s27 + $0x30] sm:$0xff]  }
  0x18   : > { %2025 = vmatprep.subr.bf16.mxu0 %v2159_v7  ;;  %v1957_v48 = vld [vmem:[%s2332_s27 + $0x98] sm:$0xff]   ;;  %v1821_v51 = vunpack.c.l.bf16 %v1940_v35  ;;  %v1822_v52 = vunpack.c.h.bf16 %v1940_v35  ;;  %v1885_v53 = vunpack.c.l.bf16 %v1956_v36  ;;  %v1886_v55 = vunpack.c.h.bf16 %v1956_v36  ;;  %v1960_v31 = vld [vmem:[%s2332_s27 + $0xb0] sm:$0xff]  }
  0x19   : > { %v1825_v56 = vunpack.c.l.bf16 %v1941_v43  ;;  %v1826_v57 = vunpack.c.h.bf16 %v1941_v43  ;;  %v1889_v58 = vunpack.c.l.bf16 %v1957_v48  ;;  %v1890_v59 = vunpack.c.h.bf16 %v1957_v48 }
  0x1a   : > { %v1829_v60 = vunpack.c.l.bf16 %v1942_v49  ;;  %v1901_v43 = vunpack.c.l.bf16 %v1960_v31 }
  0x1b   : > { %2026 = vmatpush3.bf16.msra.mxu0 %v2159_v7 }
  0x1c   : > { %2027 = vmatprep.subr.bf16.mxu0 %v2160_v11 }
  0x1f   : > { %2028 = vmatpush3.bf16.msra.mxu0 %v2160_v11 }
  0x20   : > { %2029 = vmatprep.subr.bf16.mxu0 %v2161_v14 }
  0x23   : > { %2030 = vmatpush3.bf16.msra.mxu0 %v2161_v14 }
  0xd1   : > { %v469_v9 = vpop.f32.mrf.mxu0 }
  0xd2   : > { %v470_v10 = vadd.f32 %v469_v9, %v398_v8 }
  0xd3   : > { %v2015_v12 = vpop.f32.mrf.mxu0 }
  0xd4   : > { %556 = vrot.lane.b32.xlu1 %v470_v10, %s2206_s14  ;;  %550 = vrot.lane.b32.xlu0 %v470_v10, %s2207_s15  ;;  %v473_v13 = vmul.f32 %v470_v10, %v470_v10 }
  0xd6   : > { %2019 = vmatmul.mubr.msk.f32.vlgmr.msra.gmra.mxu1 %vm399_vm1, %v473_v13 }
  0xd7   : > { %2100 = vmatpush3.bf16.msra.mxu1 %v952_v5  ;;  %v1958_v5 = vld [vmem:[%s2332_s27 + $0xa0] sm:$0xff]  }
  0xd8   : > { %559 = vrot.lane.b32.xlu1 %v470_v10, %s2208_s18  ;;  %553 = vrot.lane.b32.xlu0 %v470_v10, %s2209_s19  ;;  %v1894_v17 = vunpack.c.h.bf16 %v1958_v5  ;;  %s2483_s19 = scalar_lea.vmem %s2832_s7, %s1765_s28 }
  0xd9   : > { %2096 = vmatprep.subr.bf16.mxu1 %v2158_v6 }
  0xdb   : > { %2101 = vmatpush3.bf16.msra.mxu1 %v2158_v6 }
  0xdc   : > { %565 = vrot.lane.b32.xlu1 %v470_v10, %s2210_s20  ;;  %562 = vrot.lane.b32.xlu0 %v470_v10, %s2211_s21 }
  0xdd   : > { %2097 = vmatprep.subr.bf16.mxu1 %v2159_v7 }
  0xdf   : > { %2102 = vmatpush3.bf16.msra.mxu1 %v2159_v7 }
  0xe0   : > { %571 = vrot.lane.b32.xlu1 %v470_v10, %s2212_s22  ;;  %568 = vrot.lane.b32.xlu0 %v470_v10, %s2213_s23  ;;  %s2498_s22 = scalar_lea.vmem %s2833_s8, %s1765_s28 }
  0xe1   : > { %2098 = vmatprep.subr.bf16.mxu1 %v2160_v11 }
  0xe3   : > { %2103 = vmatpush3.bf16.msra.mxu1 %v2160_v11 }
  0xe4   : > { %2099 = vmatprep.subr.bf16.mxu1 %v2161_v14 }
  0xe7   : > { %2104 = vmatpush3.bf16.msra.mxu1 %v2161_v14 }
 0x146   : > { %v557_v15 = vpop.permute.xlu1 %556  ;;  %v551_v16 = vpop.permute.xlu0 %550 }
 0x147   : > { %v574_v18 = vsel %vm399_vm1, %v470_v10, %v551_v16  ;;  %v1893_v16 = vunpack.c.l.bf16 %v1958_v5 }
 0x14a   : > { %v560_v19 = vpop.permute.xlu1 %559  ;;  %v554_v20 = vpop.permute.xlu0 %553 }
 0x14b   : > { %v576_v21 = vsel %vm575_vm3, %v574_v18, %v554_v20 }
 0x14c   : > { %v578_v22 = vsel %vm577_vm4, %v576_v21, %v557_v15  ;;  %v1830_v15 = vunpack.c.h.bf16 %v1942_v49  ;;  %v1945_v49 = vld [vmem:[%s2332_s27 + $0x38] sm:$0xff]  }
 0x14d   : > { %v580_v23 = vsel %vm579_vm5, %v578_v22, %v560_v19 }
 0x14e   : > { %v566_v25 = vpop.permute.xlu1 %565  ;;  %v563_v26 = vpop.permute.xlu0 %562 }
 0x14f   : > { %v582_v28 = vsel %vm581_vm6, %v580_v23, %v563_v26  ;;  %v1943_v23 = vld [vmem:[%s2332_s27 + $0x28] sm:$0xff]  }
 0x150   : > { %v584_v38 = vsel %vm583_vm7, %v582_v28, %v566_v25  ;;  %v1959_v25 = vld [vmem:[%s2332_s27 + $0xa8] sm:$0xff]  }
 0x151   : > { %v1897_v35 = vunpack.c.l.bf16 %v1959_v25  ;;  %v1898_v36 = vunpack.c.h.bf16 %v1959_v25 }
 0x152   : > { %v572_v37 = vpop.permute.xlu1 %571  ;;  %v569_v39 = vpop.permute.xlu0 %568 }
 0x153   : > { %v586_v44 = vsel %vm585_vm8, %v584_v38, %v569_v39  ;;  %v1837_v39 = vunpack.c.l.bf16 %v1944_v30 }
 0x154   : > { %v588_v50 = vsel %vm587_vm9, %v586_v44, %v572_v37  ;;  %v1902_v44 = vunpack.c.h.bf16 %v1960_v31 }
 0x155   : > { %v2349_v54 = vrot.slane %v588_v50, %v719_v32  ;;  %v1961_v50 = vld [vmem:[%s2332_s27 + $0xb8] sm:$0xff]  }
 0x157   : > { %v721_v61 = vmul.f32 %v1813_v33, %v2349_v54  ;;  %v722_v62 = vmul.f32 %v1814_v34, %v2349_v54  ;;  %v753_v63 = vmul.f32 %v1877_v40, %v2349_v54  ;;  %v754_v0 = vmul.f32 %v1878_v41, %v2349_v54 }
 0x158   : > { %v723_v1 = vmul.f32 %v1817_v42, %v2349_v54  ;;  %v724_v2 = vmul.f32 %v1818_v45, %v2349_v54  ;;  %v755_v3 = vmul.f32 %v1881_v46, %v2349_v54  ;;  %v756_v4 = vmul.f32 %v1882_v47, %v2349_v54 }
 0x159   : > { %v785_v6 = vpack.c.bf16 %v722_v62, %v721_v61  ;;  %v801_v7 = vpack.c.bf16 %v754_v0, %v753_v63  ;;  %v725_v8 = vmul.f32 %v1821_v51, %v2349_v54  ;;  %v726_v9 = vmul.f32 %v1822_v52, %v2349_v54 }
 0x15a   : > { %v786_v10 = vpack.c.bf16 %v724_v2, %v723_v1  ;;  %v802_v11 = vpack.c.bf16 %v756_v4, %v755_v3  ;;  %v757_v12 = vmul.f32 %v1885_v53, %v2349_v54  ;;  %v758_v13 = vmul.f32 %v1886_v55, %v2349_v54 }
 0x15b   : > { %2031 = vmatprep.mubr.msk.bf16.mxu0 %vm853_vm10, %v785_v6  ;;  %2063 = vmatprep.mubr.msk.bf16.mxu1 %vm853_vm10, %v801_v7  ;;  %v787_v14 = vpack.c.bf16 %v726_v9, %v725_v8  ;;  %v727_v19 = vmul.f32 %v1825_v56, %v2349_v54  ;;  %v728_v20 = vmul.f32 %v1826_v57, %v2349_v54  ;;  %v1833_v33 = vunpack.c.l.bf16 %v1943_v23  ;;  %v1946_v56 = vld [vmem:[%s2332_s27 + $0x40] sm:$0xff]  }
 0x15c   : > { %2032 = vmatmul.mubr.msk.bf16.vlgmr.msra.gmra.mxu0 %vm853_vm10, %v786_v10  ;;  %2064 = vmatmul.mubr.msk.bf16.vlgmr.msra.gmra.mxu1 %vm853_vm10, %v802_v11  ;;  %v803_v18 = vpack.c.bf16 %v758_v13, %v757_v12  ;;  %v759_v21 = vmul.f32 %v1889_v58, %v2349_v54  ;;  %v760_v22 = vmul.f32 %v1890_v59, %v2349_v54  ;;  %v1834_v34 = vunpack.c.h.bf16 %v1943_v23  ;;  %v1962_v57 = vld [vmem:[%s2332_s27 + $0xc0] sm:$0xff]   ;;  %v1947_v10 = vld [vmem:[%s2332_s27 + $0x48] sm:$0xff]  }
 0x15d   : > { %2035 = vmatprep.mubr.msk.bf16.mxu0 %vm853_vm10, %v787_v14  ;;  %v729_v26 = vmul.f32 %v1829_v60, %v2349_v54  ;;  %v730_v27 = vmul.f32 %v1830_v15, %v2349_v54  ;;  %v761_v28 = vmul.f32 %v1893_v16, %v2349_v54  ;;  %v762_v29 = vmul.f32 %v1894_v17, %v2349_v54  ;;  %v1963_v11 = vld [vmem:[%s2332_s27 + $0xc8] sm:$0xff]   ;;  %v1948_v16 = vld [vmem:[%s2332_s27 + $0x50] sm:$0xff]  }
 0x15e   : > { %2067 = vmatprep.mubr.msk.bf16.mxu1 %vm853_vm10, %v803_v18  ;;  %v788_v37 = vpack.c.bf16 %v728_v20, %v727_v19  ;;  %v804_v38 = vpack.c.bf16 %v760_v22, %v759_v21  ;;  %v1838_v40 = vunpack.c.h.bf16 %v1944_v30  ;;  %v731_v45 = vmul.f32 %v1833_v33, %v2349_v54  ;;  %v1964_v17 = vld [vmem:[%s2332_s27 + $0xd0] sm:$0xff]  }
 0x15f   : > { %v789_v41 = vpack.c.bf16 %v730_v27, %v729_v26  ;;  %v805_v42 = vpack.c.bf16 %v762_v29, %v761_v28  ;;  %v732_v46 = vmul.f32 %v1834_v34, %v2349_v54  ;;  %v763_v47 = vmul.f32 %v1897_v35, %v2349_v54 }
 0x160   : > { %v764_v48 = vmul.f32 %v1898_v36, %v2349_v54  ;;  %v733_v51 = vmul.f32 %v1837_v39, %v2349_v54  ;;  %v734_v52 = vmul.f32 %v1838_v40, %v2349_v54  ;;  %v765_v53 = vmul.f32 %v1901_v43, %v2349_v54  ;;  %v1949_v36 = vld [vmem:[%s2332_s27 + $0x58] sm:$0xff]   ;;  %v1966_v43 = vld [vmem:[%s2332_s27 + $0xe0] sm:$0xff]  }
 0x161   : > { %v766_v55 = vmul.f32 %v1902_v44, %v2349_v54  ;;  %v1841_v58 = vunpack.c.l.bf16 %v1945_v49  ;;  %v1842_v59 = vunpack.c.h.bf16 %v1945_v49  ;;  %v1905_v60 = vunpack.c.l.bf16 %v1961_v50 }
 0x162   : > { %v1906_v61 = vunpack.c.h.bf16 %v1961_v50  ;;  %v790_v62 = vpack.c.bf16 %v732_v46, %v731_v45  ;;  %v806_v63 = vpack.c.bf16 %v764_v48, %v763_v47  ;;  %v1845_v0 = vunpack.c.l.bf16 %v1946_v56 }
 0x163   : > { %v1846_v1 = vunpack.c.h.bf16 %v1946_v56  ;;  %v791_v2 = vpack.c.bf16 %v734_v52, %v733_v51  ;;  %v807_v3 = vpack.c.bf16 %v766_v55, %v765_v53  ;;  %v1909_v4 = vunpack.c.l.bf16 %v1962_v57 }
 0x164   : > { %2036 = vmatmul.mubr.msk.bf16.gmra.mxu0 %vm853_vm10, %v788_v37  ;;  %2068 = vmatmul.mubr.msk.bf16.gmra.mxu1 %vm853_vm10, %v804_v38  ;;  %v1910_v5 = vunpack.c.h.bf16 %v1962_v57  ;;  %v735_v6 = vmul.f32 %v1841_v58, %v2349_v54  ;;  %v736_v7 = vmul.f32 %v1842_v59, %v2349_v54  ;;  %v767_v8 = vmul.f32 %v1905_v60, %v2349_v54  ;;  %v1965_v37 = vld [vmem:[%s2332_s27 + $0xd8] sm:$0xff]  }
 0x165   : > { %2039 = vmatprep.mubr.msk.bf16.mxu0 %vm853_vm10, %v789_v41  ;;  %2071 = vmatprep.mubr.msk.bf16.mxu1 %vm853_vm10, %v805_v42  ;;  %v768_v9 = vmul.f32 %v1906_v61, %v2349_v54  ;;  %v737_v12 = vmul.f32 %v1845_v0, %v2349_v54  ;;  %v738_v13 = vmul.f32 %v1846_v1, %v2349_v54  ;;  %v1849_v18 = vunpack.c.l.bf16 %v1947_v10  ;;  %v1950_v42 = vld [vmem:[%s2332_s27 + $0x60] sm:$0xff]   ;;  %v1951_v61 = vld [vmem:[%s2332_s27 + $0x68] sm:$0xff]  }
 0x166   : > { %v769_v14 = vmul.f32 %v1909_v4, %v2349_v54  ;;  %v770_v15 = vmul.f32 %v1910_v5, %v2349_v54  ;;  %v1850_v19 = vunpack.c.h.bf16 %v1947_v10  ;;  %v1913_v20 = vunpack.c.l.bf16 %v1963_v11  ;;  %v1968_v4 = vld [vmem:[%s2332_s27 + $0xf0] sm:$0xff]  }
 0x167   : > { %v1914_v21 = vunpack.c.h.bf16 %v1963_v11  ;;  %v792_v22 = vpack.c.bf16 %v736_v7, %v735_v6  ;;  %v808_v23 = vpack.c.bf16 %v768_v9, %v767_v8  ;;  %v1853_v25 = vunpack.c.l.bf16 %v1948_v16 }
 0x168   : > { %v1854_v26 = vunpack.c.h.bf16 %v1948_v16  ;;  %v793_v27 = vpack.c.bf16 %v738_v13, %v737_v12  ;;  %v809_v28 = vpack.c.bf16 %v770_v15, %v769_v14  ;;  %v1917_v29 = vunpack.c.l.bf16 %v1964_v17 }
 0x169   : > { %v1918_v30 = vunpack.c.h.bf16 %v1964_v17  ;;  %v739_v31 = vmul.f32 %v1849_v18, %v2349_v54  ;;  %v740_v33 = vmul.f32 %v1850_v19, %v2349_v54  ;;  %v771_v34 = vmul.f32 %v1913_v20, %v2349_v54 }
 0x16a   : > { %v772_v35 = vmul.f32 %v1914_v21, %v2349_v54  ;;  %v741_v38 = vmul.f32 %v1853_v25, %v2349_v54  ;;  %v742_v39 = vmul.f32 %v1854_v26, %v2349_v54  ;;  %v773_v40 = vmul.f32 %v1917_v29, %v2349_v54  ;;  %v1953_v21 = vld [vmem:[%s2332_s27 + $0x78] sm:$0xff]  }
 0x16b   : > { %v774_v41 = vmul.f32 %v1918_v30, %v2349_v54  ;;  %v1857_v44 = vunpack.c.l.bf16 %v1949_v36  ;;  %v1858_v45 = vunpack.c.h.bf16 %v1949_v36  ;;  %v1921_v46 = vunpack.c.l.bf16 %v1965_v37 }
 0x16c   : > { %2040 = vmatmul.mubr.msk.bf16.gmra.mxu0 %vm853_vm10, %v790_v62  ;;  %2072 = vmatmul.mubr.msk.bf16.gmra.mxu1 %vm853_vm10, %v806_v63  ;;  %v1922_v47 = vunpack.c.h.bf16 %v1965_v37  ;;  %v794_v48 = vpack.c.bf16 %v740_v33, %v739_v31  ;;  %v810_v49 = vpack.c.bf16 %v772_v35, %v771_v34  ;;  %v1861_v50 = vunpack.c.l.bf16 %v1950_v42  ;;  %v1967_v62 = vld [vmem:[%s2332_s27 + $0xe8] sm:$0xff]  }
 0x16d   : > { %2043 = vmatprep.mubr.msk.bf16.mxu0 %vm853_vm10, %v791_v2  ;;  %2075 = vmatprep.mubr.msk.bf16.mxu1 %vm853_vm10, %v807_v3  ;;  %v1862_v51 = vunpack.c.h.bf16 %v1950_v42  ;;  %v795_v52 = vpack.c.bf16 %v742_v39, %v741_v38  ;;  %v811_v53 = vpack.c.bf16 %v774_v41, %v773_v40  ;;  %v1925_v55 = vunpack.c.l.bf16 %v1966_v43  ;;  %v1952_v3 = vld [vmem:[%s2332_s27 + $0x70] sm:$0xff]  }
 0x16e   : > { %v1926_v56 = vunpack.c.h.bf16 %v1966_v43  ;;  %v743_v57 = vmul.f32 %v1857_v44, %v2349_v54  ;;  %v744_v58 = vmul.f32 %v1858_v45, %v2349_v54  ;;  %v775_v59 = vmul.f32 %v1921_v46, %v2349_v54 }
 0x16f   : > { %v776_v60 = vmul.f32 %v1922_v47, %v2349_v54  ;;  %v745_v63 = vmul.f32 %v1861_v50, %v2349_v54  ;;  %v746_v0 = vmul.f32 %v1862_v51, %v2349_v54  ;;  %v777_v1 = vmul.f32 %v1925_v55, %v2349_v54 }
 0x170   : > { %v778_v2 = vmul.f32 %v1926_v56, %v2349_v54  ;;  %v1865_v5 = vunpack.c.l.bf16 %v1951_v61  ;;  %v1866_v6 = vunpack.c.h.bf16 %v1951_v61  ;;  %v1929_v7 = vunpack.c.l.bf16 %v1967_v62 }
 0x171   : > { %v1930_v8 = vunpack.c.h.bf16 %v1967_v62  ;;  %v796_v9 = vpack.c.bf16 %v744_v58, %v743_v57  ;;  %v812_v10 = vpack.c.bf16 %v776_v60, %v775_v59  ;;  %v1869_v11 = vunpack.c.l.bf16 %v1952_v3  ;;  %v1448_v57 = vld [vmem:[%s2483_s19 + $0x10] sm:$0xff] }
 0x172   : > { %v1870_v12 = vunpack.c.h.bf16 %v1952_v3  ;;  %v797_v13 = vpack.c.bf16 %v746_v0, %v745_v63  ;;  %v813_v14 = vpack.c.bf16 %v778_v2, %v777_v1  ;;  %v1933_v15 = vunpack.c.l.bf16 %v1968_v4  ;;  %v1480_v58 = vld [vmem:[%s2483_s19 + $0x110] sm:$0xff]  ;;  %v1446_v1 = vld [vmem:[%s2483_s19] sm:$0xff] }
 0x173   : > { %v1934_v16 = vunpack.c.h.bf16 %v1968_v4  ;;  %v747_v17 = vmul.f32 %v1865_v5, %v2349_v54  ;;  %v748_v18 = vmul.f32 %v1866_v6, %v2349_v54  ;;  %v779_v19 = vmul.f32 %v1929_v7, %v2349_v54  ;;  %v1478_v2 = vld [vmem:[%s2483_s19 + $0x100] sm:$0xff] }
 0x174   : > { %2044 = vmatmul.mubr.msk.bf16.gmra.mxu0 %vm853_vm10, %v792_v22  ;;  %2076 = vmatmul.mubr.msk.bf16.gmra.mxu1 %vm853_vm10, %v808_v23  ;;  %v780_v20 = vmul.f32 %v1930_v8, %v2349_v54  ;;  %v749_v22 = vmul.f32 %v1869_v11, %v2349_v54  ;;  %v750_v23 = vmul.f32 %v1870_v12, %v2349_v54  ;;  %v1874_v29 = vunpack.c.h.bf16 %v1953_v21 }
 0x175   : > { %2047 = vmatprep.mubr.msk.bf16.mxu0 %vm853_vm10, %v793_v27  ;;  %2079 = vmatprep.mubr.msk.bf16.mxu1 %vm853_vm10, %v809_v28  ;;  %v781_v25 = vmul.f32 %v1933_v15, %v2349_v54  ;;  %v782_v26 = vmul.f32 %v1934_v16, %v2349_v54  ;;  %v1969_v27 = vld [vmem:[%s2332_s27 + $0xf8] sm:$0xff]   ;;  %v1873_v28 = vunpack.c.l.bf16 %v1953_v21  ;;  %v798_v30 = vpack.c.bf16 %v748_v18, %v747_v17 }
 0x176   : > { %v814_v31 = vpack.c.bf16 %v780_v20, %v779_v19  ;;  %v1937_v33 = vunpack.c.l.bf16 %v1969_v27  ;;  %v1938_v34 = vunpack.c.h.bf16 %v1969_v27  ;;  %v799_v35 = vpack.c.bf16 %v750_v23, %v749_v22  ;;  %v1449_v19 = vld [vmem:[%s2483_s19 + $0x18] sm:$0xff] }
 0x177   : > { %v815_v36 = vpack.c.bf16 %v782_v26, %v781_v25  ;;  %v751_v37 = vmul.f32 %v1873_v28, %v2349_v54  ;;  %v752_v38 = vmul.f32 %v1874_v29, %v2349_v54  ;;  %v1481_v20 = vld [vmem:[%s2483_s19 + $0x118] sm:$0xff] }
 0x178   : > { %v783_v39 = vmul.f32 %v1937_v33, %v2349_v54  ;;  %v784_v40 = vmul.f32 %v1938_v34, %v2349_v54  ;;  %v2478_v54 = vld [vmem:[%s2831_s6] ss:$0 sm:$0xff] }
 0x179   : > { %v800_v41 = vpack.c.bf16 %v752_v38, %v751_v37 }
 0x17a   : > { %v816_v42 = vpack.c.bf16 %v784_v40, %v783_v39 }
 0x17c   : > { %2048 = vmatmul.mubr.msk.bf16.gmra.mxu0 %vm853_vm10, %v794_v48  ;;  %2080 = vmatmul.mubr.msk.bf16.gmra.mxu1 %vm853_vm10, %v810_v49 }
 0x17d   : > { %2051 = vmatprep.mubr.msk.bf16.mxu0 %vm853_vm10, %v795_v52  ;;  %2083 = vmatprep.mubr.msk.bf16.mxu1 %vm853_vm10, %v811_v53 }
 0x184   : > { %2052 = vmatmul.mubr.msk.bf16.gmra.mxu0 %vm853_vm10, %v796_v9  ;;  %2084 = vmatmul.mubr.msk.bf16.gmra.mxu1 %vm853_vm10, %v812_v10 }
 0x185   : > { %2055 = vmatprep.mubr.msk.bf16.mxu0 %vm853_vm10, %v797_v13  ;;  %2087 = vmatprep.mubr.msk.bf16.mxu1 %vm853_vm10, %v813_v14 }
 0x18c   : > { %2056 = vmatmul.mubr.msk.bf16.gmra.mxu0 %vm853_vm10, %v798_v30  ;;  %2088 = vmatmul.mubr.msk.bf16.gmra.mxu1 %vm853_vm10, %v814_v31  ;;  %v1447_v30 = vld [vmem:[%s2483_s19 + $0x8] sm:$0xff] }
 0x18d   : > { %2059 = vmatprep.mubr.msk.bf16.mxu0 %vm853_vm10, %v799_v35  ;;  %2091 = vmatprep.mubr.msk.bf16.mxu1 %vm853_vm10, %v815_v36  ;;  %v1479_v31 = vld [vmem:[%s2483_s19 + $0x108] sm:$0xff] }
 0x194   : > { %2060 = vmatmul.mubr.msk.bf16.gmra.mxu0 %vm853_vm10, %v800_v41  ;;  %2092 = vmatmul.mubr.msk.bf16.gmra.mxu1 %vm853_vm10, %v816_v42  ;;  %v1452_v41 = vld [vmem:[%s2483_s19 + $0x30] sm:$0xff] }
 0x195   : > { %v1484_v42 = vld [vmem:[%s2483_s19 + $0x130] sm:$0xff] }
 0x196   : > { %v544_v43 = vpop.f32.mrf.mxu1 }
 0x197   : > { %v545_v45 = vadd.f32 1e-08, %v544_v43 }
 0x198   : > { %v2020_v44 = vpop.f32.mrf.mxu1 }
 0x199   : > { %2162 = vrsqrt.f32 %v545_v45 }
 0x1a6   : > { %v2163_v46 = vpop.eup %2162 }
 0x1a7   : > { %v2473_v47 = vrot.slane %v2163_v46, %v719_v32 }
 0x21c   : > { %v2033_v48 = vpop.f32.mrf.mxu0  ;;  %v2065_v49 = vpop.f32.mrf.mxu1 }
 0x21d   : > { %v1249_v50 = vmul.f32 %v2033_v48, %v2473_v47  ;;  %v1281_v24 = vmul.f32 %v2065_v49, %v2473_v47 }
 0x21e   : > { %v988_v32 = vpop.f32.mrf.mxu0  ;;  %v1116_v51 = vpop.f32.mrf.mxu1 }
 0x21f   : > { %v1320_v52 = vadd.f32 %v2478_v54, %v1249_v50  ;;  %v1352_v53 = vadd.f32 %v2478_v54, %v1281_v24  ;;  %v1247_v55 = vmul.f32 %v2473_v47, %v988_v32  ;;  %v1279_v56 = vmul.f32 %v2473_v47, %v1116_v51  ;;  %v1450_v32 = vld [vmem:[%s2483_s19 + $0x20] sm:$0xff] }
 0x220   : > { %v2034_v59 = vpop.f32.mrf.mxu0  ;;  %v2066_v60 = vpop.f32.mrf.mxu1  ;;  %v1482_v51 = vld [vmem:[%s2483_s19 + $0x120] sm:$0xff] }
 0x221   : > { %v1384_v61 = vmax.f32 %v1320_v52, 0.0  ;;  %v1416_v62 = vmax.f32 %v1352_v53, 0.0  ;;  %v1318_v63 = vadd.f32 %v2478_v54, %v1247_v55  ;;  %v1350_v0 = vadd.f32 %v2478_v54, %v1279_v56 }
 0x222   : > { %v1250_v3 = vmul.f32 %v2034_v59, %v2473_v47  ;;  %v1282_v4 = vmul.f32 %v2066_v60, %v2473_v47  ;;  %v991_v5 = vpop.f32.mrf.mxu0  ;;  %v1119_v6 = vpop.f32.mrf.mxu1 }
 0x223   : > { %v1512_v7 = vadd.f32 %v1448_v57, %v1384_v61  ;;  %v1544_v8 = vadd.f32 %v1480_v58, %v1416_v62  ;;  %v1382_v9 = vmax.f32 %v1318_v63, 0.0  ;;  %v1414_v10 = vmax.f32 %v1350_v0, 0.0 }
 0x224   : > { %v1321_v11 = vadd.f32 %v2478_v54, %v1250_v3  ;;  %v1353_v12 = vadd.f32 %v2478_v54, %v1282_v4  ;;  %v1248_v13 = vmul.f32 %v2473_v47, %v991_v5  ;;  %v1280_v14 = vmul.f32 %v2473_v47, %v1119_v6  ;;  %v2037_v15 = vpop.f32.mrf.mxu0  ;;  %v2069_v16 = vpop.f32.mrf.mxu1  ;;  %v1453_v5 = vld [vmem:[%s2483_s19 + $0x38] sm:$0xff] }
 0x225   : > { %1576 = vst.msk [vmem:[%s2498_s22 + $0x10] sm:$0xff] %vm399_vm1, %v1512_v7  ;;  %1608 = vst.msk [vmem:[%s2498_s22 + $0x110] sm:$0xff] %vm399_vm1, %v1544_v8  ;;  %v1510_v17 = vadd.f32 %v1446_v1, %v1382_v9  ;;  %v1542_v18 = vadd.f32 %v1478_v2, %v1414_v10  ;;  %v1253_v21 = vmul.f32 %v2037_v15, %v2473_v47  ;;  %v1485_v6 = vld [vmem:[%s2483_s19 + $0x138] sm:$0xff]  ;;  %v1451_v15 = vld [vmem:[%s2483_s19 + $0x28] sm:$0xff] }
 0x226   : > { %v1285_v22 = vmul.f32 %v2069_v16, %v2473_v47  ;;  %v1385_v23 = vmax.f32 %v1321_v11, 0.0  ;;  %v1417_v25 = vmax.f32 %v1353_v12, 0.0  ;;  %v1319_v26 = vadd.f32 %v2478_v54, %v1248_v13  ;;  %v1004_v28 = vpop.f32.mrf.mxu0  ;;  %v1132_v29 = vpop.f32.mrf.mxu1  ;;  %v1483_v16 = vld [vmem:[%s2483_s19 + $0x128] sm:$0xff] }
 0x227   : > { %v1351_v27 = vadd.f32 %v2478_v54, %v1280_v14  ;;  %1574 = vst.msk [vmem:[%s2498_s22] sm:$0xff] %vm399_vm1, %v1510_v17  ;;  %1606 = vst.msk [vmem:[%s2498_s22 + $0x100] sm:$0xff] %vm399_vm1, %v1542_v18  ;;  %v1324_v33 = vadd.f32 %v2478_v54, %v1253_v21  ;;  %v1251_v35 = vmul.f32 %v2473_v47, %v1004_v28 }
 0x228   : > { %v1356_v34 = vadd.f32 %v2478_v54, %v1285_v22  ;;  %v1283_v36 = vmul.f32 %v2473_v47, %v1132_v29  ;;  %v1513_v37 = vadd.f32 %v1449_v19, %v1385_v23  ;;  %v1545_v38 = vadd.f32 %v1481_v20, %v1417_v25  ;;  %v2038_v43 = vpop.f32.mrf.mxu0  ;;  %v2070_v44 = vpop.f32.mrf.mxu1 }
 0x229   : > { %v1383_v39 = vmax.f32 %v1319_v26, 0.0  ;;  %v1415_v40 = vmax.f32 %v1351_v27, 0.0  ;;  %v1388_v45 = vmax.f32 %v1324_v33, 0.0  ;;  %v1322_v48 = vadd.f32 %v2478_v54, %v1251_v35  ;;  %v1456_v26 = vld [vmem:[%s2483_s19 + $0x50] sm:$0xff] }
 0x22a   : > { %v1420_v46 = vmax.f32 %v1356_v34, 0.0  ;;  %v1354_v49 = vadd.f32 %v2478_v54, %v1283_v36  ;;  %1577 = vst.msk [vmem:[%s2498_s22 + $0x18] sm:$0xff] %vm399_vm1, %v1513_v37  ;;  %1609 = vst.msk [vmem:[%s2498_s22 + $0x118] sm:$0xff] %vm399_vm1, %v1545_v38  ;;  %v1254_v52 = vmul.f32 %v2038_v43, %v2473_v47  ;;  %v1286_v53 = vmul.f32 %v2070_v44, %v2473_v47  ;;  %v1007_v55 = vpop.f32.mrf.mxu0  ;;  %v1135_v56 = vpop.f32.mrf.mxu1  ;;  %v1488_v27 = vld [vmem:[%s2483_s19 + $0x150] sm:$0xff]  ;;  %v1454_v37 = vld [vmem:[%s2483_s19 + $0x40] sm:$0xff] }
 0x22b   : > { %v1511_v50 = vadd.f32 %v1447_v30, %v1383_v39  ;;  %v1543_v24 = vadd.f32 %v1479_v31, %v1415_v40  ;;  %v1516_v57 = vadd.f32 %v1452_v41, %v1388_v45  ;;  %v1386_v59 = vmax.f32 %v1322_v48, 0.0  ;;  %v1486_v38 = vld [vmem:[%s2483_s19 + $0x140] sm:$0xff] }
 0x22c   : > { %v1548_v58 = vadd.f32 %v1484_v42, %v1420_v46  ;;  %v1418_v60 = vmax.f32 %v1354_v49, 0.0  ;;  %v1325_v61 = vadd.f32 %v2478_v54, %v1254_v52  ;;  %v1357_v62 = vadd.f32 %v2478_v54, %v1286_v53  ;;  %v2041_v1 = vpop.f32.mrf.mxu0  ;;  %v2073_v2 = vpop.f32.mrf.mxu1 }
 0x22d   : > { %1575 = vst.msk [vmem:[%s2498_s22 + $0x8] sm:$0xff] %vm399_vm1, %v1511_v50  ;;  %1607 = vst.msk [vmem:[%s2498_s22 + $0x108] sm:$0xff] %vm399_vm1, %v1543_v24  ;;  %v1252_v63 = vmul.f32 %v2473_v47, %v1007_v55  ;;  %v1284_v0 = vmul.f32 %v2473_v47, %v1135_v56  ;;  %v1514_v3 = vadd.f32 %v1450_v32, %v1386_v59  ;;  %v1457_v55 = vld [vmem:[%s2483_s19 + $0x58] sm:$0xff] }
 0x22e   : > { %1580 = vst.msk [vmem:[%s2498_s22 + $0x30] sm:$0xff] %vm399_vm1, %v1516_v57  ;;  %1612 = vst.msk [vmem:[%s2498_s22 + $0x130] sm:$0xff] %vm399_vm1, %v1548_v58  ;;  %v1546_v4 = vadd.f32 %v1482_v51, %v1418_v60  ;;  %v1257_v7 = vmul.f32 %v2041_v1, %v2473_v47  ;;  %v1289_v8 = vmul.f32 %v2073_v2, %v2473_v47  ;;  %v1389_v9 = vmax.f32 %v1325_v61, 0.0  ;;  %v1020_v13 = vpop.f32.mrf.mxu0  ;;  %v1148_v14 = vpop.f32.mrf.mxu1  ;;  %v1489_v56 = vld [vmem:[%s2483_s19 + $0x158] sm:$0xff]  ;;  %v1455_v1 = vld [vmem:[%s2483_s19 + $0x48] sm:$0xff] }
 0x22f   : > { %v1421_v10 = vmax.f32 %v1357_v62, 0.0  ;;  %v1323_v11 = vadd.f32 %v2478_v54, %v1252_v63  ;;  %v1355_v12 = vadd.f32 %v2478_v54, %v1284_v0  ;;  %1578 = vst.msk [vmem:[%s2498_s22 + $0x20] sm:$0xff] %vm399_vm1, %v1514_v3  ;;  %v1255_v19 = vmul.f32 %v2473_v47, %v1020_v13  ;;  %v1487_v2 = vld [vmem:[%s2483_s19 + $0x148] sm:$0xff] }
 0x230   : > { %1610 = vst.msk [vmem:[%s2498_s22 + $0x120] sm:$0xff] %vm399_vm1, %v1546_v4  ;;  %v1328_v17 = vadd.f32 %v2478_v54, %v1257_v7  ;;  %v1360_v18 = vadd.f32 %v2478_v54, %v1289_v8  ;;  %v1287_v20 = vmul.f32 %v2473_v47, %v1148_v14  ;;  %v1517_v21 = vadd.f32 %v1453_v5, %v1389_v9  ;;  %v2042_v28 = vpop.f32.mrf.mxu0  ;;  %v2074_v29 = vpop.f32.mrf.mxu1 }
 0x231   : > { %v1549_v22 = vadd.f32 %v1485_v6, %v1421_v10  ;;  %v1387_v23 = vmax.f32 %v1323_v11, 0.0  ;;  %v1419_v25 = vmax.f32 %v1355_v12, 0.0  ;;  %v1326_v33 = vadd.f32 %v2478_v54, %v1255_v19  ;;  %v1460_v11 = vld [vmem:[%s2483_s19 + $0x70] sm:$0xff] }
 0x232   : > { %v1392_v30 = vmax.f32 %v1328_v17, 0.0  ;;  %v1424_v31 = vmax.f32 %v1360_v18, 0.0  ;;  %v1358_v34 = vadd.f32 %v2478_v54, %v1287_v20  ;;  %1581 = vst.msk [vmem:[%s2498_s22 + $0x38] sm:$0xff] %vm399_vm1, %v1517_v21  ;;  %v1258_v39 = vmul.f32 %v2042_v28, %v2473_v47  ;;  %v1023_v41 = vpop.f32.mrf.mxu0  ;;  %v1151_v42 = vpop.f32.mrf.mxu1  ;;  %v1492_v12 = vld [vmem:[%s2483_s19 + $0x170] sm:$0xff]  ;;  %v1458_v21 = vld [vmem:[%s2483_s19 + $0x60] sm:$0xff] }
 0x233   : > { %1613 = vst.msk [vmem:[%s2498_s22 + $0x138] sm:$0xff] %vm399_vm1, %v1549_v22  ;;  %v1515_v35 = vadd.f32 %v1451_v15, %v1387_v23  ;;  %v1547_v36 = vadd.f32 %v1483_v16, %v1419_v25  ;;  %v1290_v40 = vmul.f32 %v2074_v29, %v2473_v47  ;;  %v1390_v45 = vmax.f32 %v1326_v33, 0.0  ;;  %v1490_v22 = vld [vmem:[%s2483_s19 + $0x160] sm:$0xff] }
 0x234   : > { %v1520_v43 = vadd.f32 %v1456_v26, %v1392_v30  ;;  %v1552_v44 = vadd.f32 %v1488_v27, %v1424_v31  ;;  %v1422_v46 = vmax.f32 %v1358_v34, 0.0  ;;  %v1329_v48 = vadd.f32 %v2478_v54, %v1258_v39  ;;  %v2045_v32 = vpop.f32.mrf.mxu0  ;;  %v2077_v51 = vpop.f32.mrf.mxu1 }
 0x235   : > { %1579 = vst.msk [vmem:[%s2498_s22 + $0x28] sm:$0xff] %vm399_vm1, %v1515_v35  ;;  %1611 = vst.msk [vmem:[%s2498_s22 + $0x128] sm:$0xff] %vm399_vm1, %v1547_v36  ;;  %v1361_v49 = vadd.f32 %v2478_v54, %v1290_v40  ;;  %v1256_v50 = vmul.f32 %v2473_v47, %v1023_v41  ;;  %v1288_v24 = vmul.f32 %v2473_v47, %v1151_v42  ;;  %v1461_v41 = vld [vmem:[%s2483_s19 + $0x78] sm:$0xff] }
 0x236   : > { %1584 = vst.msk [vmem:[%s2498_s22 + $0x50] sm:$0xff] %vm399_vm1, %v1520_v43  ;;  %1616 = vst.msk [vmem:[%s2498_s22 + $0x150] sm:$0xff] %vm399_vm1, %v1552_v44  ;;  %v1518_v52 = vadd.f32 %v1454_v37, %v1390_v45  ;;  %v1550_v53 = vadd.f32 %v1486_v38, %v1422_v46  ;;  %v1261_v57 = vmul.f32 %v2045_v32, %v2473_v47  ;;  %v1393_v59 = vmax.f32 %v1329_v48, 0.0  ;;  %v1036_v63 = vpop.f32.mrf.mxu0  ;;  %v1164_v0 = vpop.f32.mrf.mxu1  ;;  %v1493_v42 = vld [vmem:[%s2483_s19 + $0x178] sm:$0xff]  ;;  %v1459_v32 = vld [vmem:[%s2483_s19 + $0x68] sm:$0xff] }
 0x237   : > { %v1293_v58 = vmul.f32 %v2077_v51, %v2473_v47  ;;  %v1425_v60 = vmax.f32 %v1361_v49, 0.0  ;;  %v1327_v61 = vadd.f32 %v2478_v54, %v1256_v50  ;;  %v1359_v62 = vadd.f32 %v2478_v54, %v1288_v24  ;;  %v1491_v51 = vld [vmem:[%s2483_s19 + $0x168] sm:$0xff] }
 0x238   : > { %1582 = vst.msk [vmem:[%s2498_s22 + $0x40] sm:$0xff] %vm399_vm1, %v1518_v52  ;;  %1614 = vst.msk [vmem:[%s2498_s22 + $0x140] sm:$0xff] %vm399_vm1, %v1550_v53  ;;  %v1332_v3 = vadd.f32 %v2478_v54, %v1261_v57  ;;  %v1259_v5 = vmul.f32 %v2473_v47, %v1036_v63  ;;  %v1291_v6 = vmul.f32 %v2473_v47, %v1164_v0  ;;  %v2046_v13 = vpop.f32.mrf.mxu0  ;;  %v2078_v14 = vpop.f32.mrf.mxu1 }
 0x239   : > { %v1364_v4 = vadd.f32 %v2478_v54, %v1293_v58  ;;  %v1521_v7 = vadd.f32 %v1457_v55, %v1393_v59  ;;  %v1553_v8 = vadd.f32 %v1489_v56, %v1425_v60  ;;  %v1391_v9 = vmax.f32 %v1327_v61, 0.0  ;;  %v1464_v61 = vld [vmem:[%s2483_s19 + $0x90] sm:$0xff] }
 0x23a   : > { %v1423_v10 = vmax.f32 %v1359_v62, 0.0  ;;  %v1396_v15 = vmax.f32 %v1332_v3, 0.0  ;;  %v1330_v17 = vadd.f32 %v2478_v54, %v1259_v5  ;;  %v1362_v18 = vadd.f32 %v2478_v54, %v1291_v6  ;;  %v1039_v26 = vpop.f32.mrf.mxu0  ;;  %v1167_v27 = vpop.f32.mrf.mxu1  ;;  %v1496_v62 = vld [vmem:[%s2483_s19 + $0x190] sm:$0xff] }
 0x23b   : > { %v1428_v16 = vmax.f32 %v1364_v4, 0.0  ;;  %1585 = vst.msk [vmem:[%s2498_s22 + $0x58] sm:$0xff] %vm399_vm1, %v1521_v7  ;;  %1617 = vst.msk [vmem:[%s2498_s22 + $0x158] sm:$0xff] %vm399_vm1, %v1553_v8  ;;  %v1519_v19 = vadd.f32 %v1455_v1, %v1391_v9  ;;  %v1262_v23 = vmul.f32 %v2046_v13, %v2473_v47  ;;  %v1294_v25 = vmul.f32 %v2078_v14, %v2473_v47  ;;  %v1462_v7 = vld [vmem:[%s2483_s19 + $0x80] sm:$0xff] }
 0x23c   : > { %v1551_v20 = vadd.f32 %v1487_v2, %v1423_v10  ;;  %v1524_v28 = vadd.f32 %v1460_v11, %v1396_v15  ;;  %v1394_v30 = vmax.f32 %v1330_v17, 0.0  ;;  %v1426_v31 = vmax.f32 %v1362_v18, 0.0  ;;  %v2049_v37 = vpop.f32.mrf.mxu0  ;;  %v2081_v38 = vpop.f32.mrf.mxu1  ;;  %v1494_v8 = vld [vmem:[%s2483_s19 + $0x180] sm:$0xff] }
 0x23d   : > { %v1556_v29 = vadd.f32 %v1492_v12, %v1428_v16  ;;  %1583 = vst.msk [vmem:[%s2498_s22 + $0x48] sm:$0xff] %vm399_vm1, %v1519_v19  ;;  %v1333_v33 = vadd.f32 %v2478_v54, %v1262_v23  ;;  %v1365_v34 = vadd.f32 %v2478_v54, %v1294_v25  ;;  %v1260_v35 = vmul.f32 %v2473_v47, %v1039_v26  ;;  %v1465_v26 = vld [vmem:[%s2483_s19 + $0x98] sm:$0xff] }
 0x23e   : > { %1615 = vst.msk [vmem:[%s2498_s22 + $0x148] sm:$0xff] %vm399_vm1, %v1551_v20  ;;  %v1292_v36 = vmul.f32 %v2473_v47, %v1167_v27  ;;  %1588 = vst.msk [vmem:[%s2498_s22 + $0x70] sm:$0xff] %vm399_vm1, %v1524_v28  ;;  %v1522_v39 = vadd.f32 %v1458_v21, %v1394_v30  ;;  %v1554_v40 = vadd.f32 %v1490_v22, %v1426_v31  ;;  %v1052_v50 = vpop.f32.mrf.mxu0  ;;  %v1180_v24 = vpop.f32.mrf.mxu1  ;;  %v1497_v27 = vld [vmem:[%s2483_s19 + $0x198] sm:$0xff] }
 0x23f   : > { %1620 = vst.msk [vmem:[%s2498_s22 + $0x170] sm:$0xff] %vm399_vm1, %v1556_v29  ;;  %v1265_v43 = vmul.f32 %v2049_v37, %v2473_v47  ;;  %v1297_v44 = vmul.f32 %v2081_v38, %v2473_v47  ;;  %v1397_v45 = vmax.f32 %v1333_v33, 0.0  ;;  %v1429_v46 = vmax.f32 %v1365_v34, 0.0  ;;  %v1463_v37 = vld [vmem:[%s2483_s19 + $0x88] sm:$0xff] }
 0x240   : > { %v1331_v48 = vadd.f32 %v2478_v54, %v1260_v35  ;;  %v1363_v49 = vadd.f32 %v2478_v54, %v1292_v36  ;;  %1586 = vst.msk [vmem:[%s2498_s22 + $0x60] sm:$0xff] %vm399_vm1, %v1522_v39  ;;  %1618 = vst.msk [vmem:[%s2498_s22 + $0x160] sm:$0xff] %vm399_vm1, %v1554_v40  ;;  %v1263_v55 = vmul.f32 %v2473_v47, %v1052_v50  ;;  %v2050_v63 = vpop.f32.mrf.mxu0  ;;  %v2082_v0 = vpop.f32.mrf.mxu1  ;;  %v1495_v38 = vld [vmem:[%s2483_s19 + $0x188] sm:$0xff] }
 0x241   : > { %v1336_v52 = vadd.f32 %v2478_v54, %v1265_v43  ;;  %v1368_v53 = vadd.f32 %v2478_v54, %v1297_v44  ;;  %v1295_v56 = vmul.f32 %v2473_v47, %v1180_v24  ;;  %v1525_v57 = vadd.f32 %v1461_v41, %v1397_v45 }
 0x242   : > { %v1557_v58 = vadd.f32 %v1493_v42, %v1429_v46  ;;  %v1395_v59 = vmax.f32 %v1331_v48, 0.0  ;;  %v1427_v60 = vmax.f32 %v1363_v49, 0.0  ;;  %v1334_v3 = vadd.f32 %v2478_v54, %v1263_v55  ;;  %v1055_v11 = vpop.f32.mrf.mxu0  ;;  %v1183_v12 = vpop.f32.mrf.mxu1  ;;  %v1468_v48 = vld [vmem:[%s2483_s19 + $0xb0] sm:$0xff] }
 0x243   : > { %v1400_v1 = vmax.f32 %v1336_v52, 0.0  ;;  %v1432_v2 = vmax.f32 %v1368_v53, 0.0  ;;  %v1366_v4 = vadd.f32 %v2478_v54, %v1295_v56  ;;  %1589 = vst.msk [vmem:[%s2498_s22 + $0x78] sm:$0xff] %vm399_vm1, %v1525_v57  ;;  %v1266_v9 = vmul.f32 %v2050_v63, %v2473_v47  ;;  %v1500_v49 = vld [vmem:[%s2483_s19 + $0x1b0] sm:$0xff]  ;;  %v1466_v57 = vld [vmem:[%s2483_s19 + $0xa0] sm:$0xff] }
 0x244   : > { %1621 = vst.msk [vmem:[%s2498_s22 + $0x178] sm:$0xff] %vm399_vm1, %v1557_v58  ;;  %v1523_v5 = vadd.f32 %v1459_v32, %v1395_v59  ;;  %v1555_v6 = vadd.f32 %v1491_v51, %v1427_v60  ;;  %v1298_v10 = vmul.f32 %v2082_v0, %v2473_v47  ;;  %v1398_v15 = vmax.f32 %v1334_v3, 0.0  ;;  %v2053_v21 = vpop.f32.mrf.mxu0  ;;  %v2085_v22 = vpop.f32.mrf.mxu1  ;;  %v1498_v58 = vld [vmem:[%s2483_s19 + $0x1a0] sm:$0xff] }
 0x245   : > { %v1528_v13 = vadd.f32 %v1464_v61, %v1400_v1  ;;  %v1560_v14 = vadd.f32 %v1496_v62, %v1432_v2  ;;  %v1430_v16 = vmax.f32 %v1366_v4, 0.0  ;;  %v1337_v17 = vadd.f32 %v2478_v54, %v1266_v9 }
 0x246   : > { %1587 = vst.msk [vmem:[%s2498_s22 + $0x68] sm:$0xff] %vm399_vm1, %v1523_v5  ;;  %1619 = vst.msk [vmem:[%s2498_s22 + $0x168] sm:$0xff] %vm399_vm1, %v1555_v6  ;;  %v1369_v18 = vadd.f32 %v2478_v54, %v1298_v10  ;;  %v1264_v19 = vmul.f32 %v2473_v47, %v1055_v11  ;;  %v1296_v20 = vmul.f32 %v2473_v47, %v1183_v12  ;;  %v1068_v35 = vpop.f32.mrf.mxu0  ;;  %v1196_v36 = vpop.f32.mrf.mxu1  ;;  %v1469_v11 = vld [vmem:[%s2483_s19 + $0xb8] sm:$0xff] }
 0x247   : > { %1592 = vst.msk [vmem:[%s2498_s22 + $0x90] sm:$0xff] %vm399_vm1, %v1528_v13  ;;  %1624 = vst.msk [vmem:[%s2498_s22 + $0x190] sm:$0xff] %vm399_vm1, %v1560_v14  ;;  %v1526_v23 = vadd.f32 %v1462_v7, %v1398_v15  ;;  %v1558_v25 = vadd.f32 %v1494_v8, %v1430_v16  ;;  %v1269_v28 = vmul.f32 %v2053_v21, %v2473_v47  ;;  %v1401_v30 = vmax.f32 %v1337_v17, 0.0  ;;  %v1501_v12 = vld [vmem:[%s2483_s19 + $0x1b8] sm:$0xff]  ;;  %v1467_v21 = vld [vmem:[%s2483_s19 + $0xa8] sm:$0xff] }
 0x248   : > { %v1301_v29 = vmul.f32 %v2085_v22, %v2473_v47  ;;  %v1433_v31 = vmax.f32 %v1369_v18, 0.0  ;;  %v1335_v33 = vadd.f32 %v2478_v54, %v1264_v19  ;;  %v1367_v34 = vadd.f32 %v2478_v54, %v1296_v20  ;;  %v2054_v50 = vpop.f32.mrf.mxu0  ;;  %v2086_v24 = vpop.f32.mrf.mxu1  ;;  %v1499_v22 = vld [vmem:[%s2483_s19 + $0x1a8] sm:$0xff] }
 0x249   : > { %1590 = vst.msk [vmem:[%s2498_s22 + $0x80] sm:$0xff] %vm399_vm1, %v1526_v23  ;;  %1622 = vst.msk [vmem:[%s2498_s22 + $0x180] sm:$0xff] %vm399_vm1, %v1558_v25  ;;  %v1340_v39 = vadd.f32 %v2478_v54, %v1269_v28  ;;  %v1267_v41 = vmul.f32 %v2473_v47, %v1068_v35  ;;  %v1299_v42 = vmul.f32 %v2473_v47, %v1196_v36 }
 0x24a   : > { %v1372_v40 = vadd.f32 %v2478_v54, %v1301_v29  ;;  %v1529_v43 = vadd.f32 %v1465_v26, %v1401_v30  ;;  %v1561_v44 = vadd.f32 %v1497_v27, %v1433_v31  ;;  %v1399_v45 = vmax.f32 %v1335_v33, 0.0  ;;  %v1071_v61 = vpop.f32.mrf.mxu0  ;;  %v1199_v62 = vpop.f32.mrf.mxu1  ;;  %v1472_v33 = vld [vmem:[%s2483_s19 + $0xd0] sm:$0xff] }
 0x24b   : > { %v1431_v46 = vmax.f32 %v1367_v34, 0.0  ;;  %v1404_v32 = vmax.f32 %v1340_v39, 0.0  ;;  %v1338_v52 = vadd.f32 %v2478_v54, %v1267_v41  ;;  %v1370_v53 = vadd.f32 %v2478_v54, %v1299_v42  ;;  %v1504_v34 = vld [vmem:[%s2483_s19 + $0x1d0] sm:$0xff] }
 0x24c   : > { %v1436_v51 = vmax.f32 %v1372_v40, 0.0  ;;  %1593 = vst.msk [vmem:[%s2498_s22 + $0x98] sm:$0xff] %vm399_vm1, %v1529_v43  ;;  %1625 = vst.msk [vmem:[%s2498_s22 + $0x198] sm:$0xff] %vm399_vm1, %v1561_v44  ;;  %v1527_v55 = vadd.f32 %v1463_v37, %v1399_v45  ;;  %v1270_v59 = vmul.f32 %v2054_v50, %v2473_v47  ;;  %v1302_v60 = vmul.f32 %v2086_v24, %v2473_v47  ;;  %v2057_v7 = vpop.f32.mrf.mxu0  ;;  %v2089_v8 = vpop.f32.mrf.mxu1  ;;  %v1470_v43 = vld [vmem:[%s2483_s19 + $0xc0] sm:$0xff] }
 0x24d   : > { %v1559_v56 = vadd.f32 %v1495_v38, %v1431_v46  ;;  %v1532_v63 = vadd.f32 %v1468_v48, %v1404_v32  ;;  %v1402_v1 = vmax.f32 %v1338_v52, 0.0  ;;  %v1434_v2 = vmax.f32 %v1370_v53, 0.0  ;;  %v1502_v44 = vld [vmem:[%s2483_s19 + $0x1c0] sm:$0xff] }
 0x24e   : > { %v1564_v0 = vadd.f32 %v1500_v49, %v1436_v51  ;;  %1591 = vst.msk [vmem:[%s2498_s22 + $0x88] sm:$0xff] %vm399_vm1, %v1527_v55  ;;  %v1341_v3 = vadd.f32 %v2478_v54, %v1270_v59  ;;  %v1373_v4 = vadd.f32 %v2478_v54, %v1302_v60  ;;  %v1268_v5 = vmul.f32 %v2473_v47, %v1071_v61  ;;  %v1084_v19 = vpop.f32.mrf.mxu0  ;;  %v1212_v20 = vpop.f32.mrf.mxu1  ;;  %v1473_v61 = vld [vmem:[%s2483_s19 + $0xd8] sm:$0xff] }
 0x24f   : > { %1623 = vst.msk [vmem:[%s2498_s22 + $0x188] sm:$0xff] %vm399_vm1, %v1559_v56  ;;  %v1300_v6 = vmul.f32 %v2473_v47, %v1199_v62  ;;  %1596 = vst.msk [vmem:[%s2498_s22 + $0xb0] sm:$0xff] %vm399_vm1, %v1532_v63  ;;  %v1530_v9 = vadd.f32 %v1466_v57, %v1402_v1  ;;  %v1562_v10 = vadd.f32 %v1498_v58, %v1434_v2  ;;  %v1505_v62 = vld [vmem:[%s2483_s19 + $0x1d8] sm:$0xff] }
 0x250   : > { %1628 = vst.msk [vmem:[%s2498_s22 + $0x1b0] sm:$0xff] %vm399_vm1, %v1564_v0  ;;  %v1273_v13 = vmul.f32 %v2057_v7, %v2473_v47  ;;  %v1305_v14 = vmul.f32 %v2089_v8, %v2473_v47  ;;  %v1405_v15 = vmax.f32 %v1341_v3, 0.0  ;;  %v1437_v16 = vmax.f32 %v1373_v4, 0.0  ;;  %v2058_v35 = vpop.f32.mrf.mxu0  ;;  %v2090_v36 = vpop.f32.mrf.mxu1  ;;  %v1471_v7 = vld [vmem:[%s2483_s19 + $0xc8] sm:$0xff] }
 0x251   : > { %v1339_v17 = vadd.f32 %v2478_v54, %v1268_v5  ;;  %v1371_v18 = vadd.f32 %v2478_v54, %v1300_v6  ;;  %1594 = vst.msk [vmem:[%s2498_s22 + $0xa0] sm:$0xff] %vm399_vm1, %v1530_v9  ;;  %1626 = vst.msk [vmem:[%s2498_s22 + $0x1a0] sm:$0xff] %vm399_vm1, %v1562_v10  ;;  %v1271_v26 = vmul.f32 %v2473_v47, %v1084_v19  ;;  %v1503_v8 = vld [vmem:[%s2483_s19 + $0x1c8] sm:$0xff] }
 0x252   : > { %v1344_v23 = vadd.f32 %v2478_v54, %v1273_v13  ;;  %v1376_v25 = vadd.f32 %v2478_v54, %v1305_v14  ;;  %v1303_v27 = vmul.f32 %v2473_v47, %v1212_v20  ;;  %v1533_v28 = vadd.f32 %v1469_v11, %v1405_v15  ;;  %v1087_v48 = vpop.f32.mrf.mxu0  ;;  %v1215_v49 = vpop.f32.mrf.mxu1 }
 0x253   : > { %v1565_v29 = vadd.f32 %v1501_v12, %v1437_v16  ;;  %v1403_v30 = vmax.f32 %v1339_v17, 0.0  ;;  %v1435_v31 = vmax.f32 %v1371_v18, 0.0  ;;  %v1342_v39 = vadd.f32 %v2478_v54, %v1271_v26  ;;  %v1476_v17 = vld [vmem:[%s2483_s19 + $0xf0] sm:$0xff] }
 0x254   : > { %v1408_v37 = vmax.f32 %v1344_v23, 0.0  ;;  %v1440_v38 = vmax.f32 %v1376_v25, 0.0  ;;  %v1374_v40 = vadd.f32 %v2478_v54, %v1303_v27  ;;  %1597 = vst.msk [vmem:[%s2498_s22 + $0xb8] sm:$0xff] %vm399_vm1, %v1533_v28  ;;  %v1274_v45 = vmul.f32 %v2058_v35, %v2473_v47  ;;  %v2061_v57 = vpop.f32.mrf.mxu0  ;;  %v2093_v58 = vpop.f32.mrf.mxu1  ;;  %v1508_v18 = vld [vmem:[%s2483_s19 + $0x1f0] sm:$0xff]  ;;  %v1474_v28 = vld [vmem:[%s2483_s19 + $0xe0] sm:$0xff] }
 0x255   : > { %1629 = vst.msk [vmem:[%s2498_s22 + $0x1b8] sm:$0xff] %vm399_vm1, %v1565_v29  ;;  %v1531_v41 = vadd.f32 %v1467_v21, %v1403_v30  ;;  %v1563_v42 = vadd.f32 %v1499_v22, %v1435_v31  ;;  %v1306_v46 = vmul.f32 %v2090_v36, %v2473_v47  ;;  %v1406_v32 = vmax.f32 %v1342_v39, 0.0  ;;  %v1506_v29 = vld [vmem:[%s2483_s19 + $0x1e0] sm:$0xff] }
 0x256   : > { %v1536_v50 = vadd.f32 %v1472_v33, %v1408_v37  ;;  %v1568_v24 = vadd.f32 %v1504_v34, %v1440_v38  ;;  %v1438_v51 = vmax.f32 %v1374_v40, 0.0  ;;  %v1345_v52 = vadd.f32 %v2478_v54, %v1274_v45  ;;  %v1100_v5 = vpop.f32.mrf.mxu0  ;;  %v1228_v6 = vpop.f32.mrf.mxu1  ;;  %v1477_v45 = vld [vmem:[%s2483_s19 + $0xf8] sm:$0xff] }
 0x257   : > { %1595 = vst.msk [vmem:[%s2498_s22 + $0xa8] sm:$0xff] %vm399_vm1, %v1531_v41  ;;  %1627 = vst.msk [vmem:[%s2498_s22 + $0x1a8] sm:$0xff] %vm399_vm1, %v1563_v42  ;;  %v1377_v53 = vadd.f32 %v2478_v54, %v1306_v46  ;;  %v1272_v55 = vmul.f32 %v2473_v47, %v1087_v48  ;;  %v1304_v56 = vmul.f32 %v2473_v47, %v1215_v49  ;;  %v1509_v46 = vld [vmem:[%s2483_s19 + $0x1f8] sm:$0xff] }
 0x258   : > { %1600 = vst.msk [vmem:[%s2498_s22 + $0xd0] sm:$0xff] %vm399_vm1, %v1536_v50  ;;  %1632 = vst.msk [vmem:[%s2498_s22 + $0x1d0] sm:$0xff] %vm399_vm1, %v1568_v24  ;;  %v1534_v59 = vadd.f32 %v1470_v43, %v1406_v32  ;;  %v1566_v60 = vadd.f32 %v1502_v44, %v1438_v51  ;;  %v1277_v63 = vmul.f32 %v2061_v57, %v2473_v47  ;;  %v1409_v1 = vmax.f32 %v1345_v52, 0.0  ;;  %v2062_v19 = vpop.f32.mrf.mxu0  ;;  %v2094_v20 = vpop.f32.mrf.mxu1  ;;  %v1507_v32 = vld [vmem:[%s2483_s19 + $0x1e8] sm:$0xff] }
 0x259   : > { %v1309_v0 = vmul.f32 %v2093_v58, %v2473_v47  ;;  %v1441_v2 = vmax.f32 %v1377_v53, 0.0  ;;  %v1343_v3 = vadd.f32 %v2478_v54, %v1272_v55  ;;  %v1375_v4 = vadd.f32 %v2478_v54, %v1304_v56 }
 0x25a   : > { %1598 = vst.msk [vmem:[%s2498_s22 + $0xc0] sm:$0xff] %vm399_vm1, %v1534_v59  ;;  %1630 = vst.msk [vmem:[%s2498_s22 + $0x1c0] sm:$0xff] %vm399_vm1, %v1566_v60  ;;  %v1348_v9 = vadd.f32 %v2478_v54, %v1277_v63  ;;  %v1275_v11 = vmul.f32 %v2473_v47, %v1100_v5  ;;  %v1307_v12 = vmul.f32 %v2473_v47, %v1228_v6  ;;  %v1103_v33 = vpop.f32.mrf.mxu0  ;;  %v1231_v34 = vpop.f32.mrf.mxu1 }
 0x25b   : > { %v1380_v10 = vadd.f32 %v2478_v54, %v1309_v0  ;;  %v1537_v13 = vadd.f32 %v1473_v61, %v1409_v1  ;;  %v1569_v14 = vadd.f32 %v1505_v62, %v1441_v2  ;;  %v1407_v15 = vmax.f32 %v1343_v3, 0.0 }
 0x25c   : > { %v1439_v16 = vmax.f32 %v1375_v4, 0.0  ;;  %v1412_v21 = vmax.f32 %v1348_v9, 0.0  ;;  %v1346_v23 = vadd.f32 %v2478_v54, %v1275_v11  ;;  %v1378_v25 = vadd.f32 %v2478_v54, %v1307_v12 }
 0x25d   : > { %v1444_v22 = vmax.f32 %v1380_v10, 0.0  ;;  %1601 = vst.msk [vmem:[%s2498_s22 + $0xd8] sm:$0xff] %vm399_vm1, %v1537_v13  ;;  %1633 = vst.msk [vmem:[%s2498_s22 + $0x1d8] sm:$0xff] %vm399_vm1, %v1569_v14  ;;  %v1535_v26 = vadd.f32 %v1471_v7, %v1407_v15  ;;  %v1278_v30 = vmul.f32 %v2062_v19, %v2473_v47  ;;  %v1310_v31 = vmul.f32 %v2094_v20, %v2473_v47 }
 0x25e   : > { %v1567_v27 = vadd.f32 %v1503_v8, %v1439_v16  ;;  %v1540_v35 = vadd.f32 %v1476_v17, %v1412_v21  ;;  %v1410_v37 = vmax.f32 %v1346_v23, 0.0  ;;  %v1442_v38 = vmax.f32 %v1378_v25, 0.0 }
 0x25f   : > { %v1572_v36 = vadd.f32 %v1508_v18, %v1444_v22  ;;  %1599 = vst.msk [vmem:[%s2498_s22 + $0xc8] sm:$0xff] %vm399_vm1, %v1535_v26  ;;  %v1349_v39 = vadd.f32 %v2478_v54, %v1278_v30  ;;  %v1381_v40 = vadd.f32 %v2478_v54, %v1310_v31  ;;  %v1276_v41 = vmul.f32 %v2473_v47, %v1103_v33 }
 0x260   : > { %1631 = vst.msk [vmem:[%s2498_s22 + $0x1c8] sm:$0xff] %vm399_vm1, %v1567_v27  ;;  %v1308_v42 = vmul.f32 %v2473_v47, %v1231_v34  ;;  %1604 = vst.msk [vmem:[%s2498_s22 + $0xf0] sm:$0xff] %vm399_vm1, %v1540_v35  ;;  %v1538_v43 = vadd.f32 %v1474_v28, %v1410_v37  ;;  %v1570_v44 = vadd.f32 %v1506_v29, %v1442_v38  ;;  %v1475_v47 = vld [vmem:[%s2483_s19 + $0xe8] sm:$0xff] }
 0x261   : > { %1636 = vst.msk [vmem:[%s2498_s22 + $0x1f0] sm:$0xff] %vm399_vm1, %v1572_v36  ;;  %v1413_v48 = vmax.f32 %v1349_v39, 0.0  ;;  %v1445_v49 = vmax.f32 %v1381_v40, 0.0  ;;  %v1347_v50 = vadd.f32 %v2478_v54, %v1276_v41 }
 0x262   : > { %v1379_v24 = vadd.f32 %v2478_v54, %v1308_v42  ;;  %1602 = vst.msk [vmem:[%s2498_s22 + $0xe0] sm:$0xff] %vm399_vm1, %v1538_v43  ;;  %1634 = vst.msk [vmem:[%s2498_s22 + $0x1e0] sm:$0xff] %vm399_vm1, %v1570_v44 }
 0x263   : > { %v1541_v51 = vadd.f32 %v1477_v45, %v1413_v48  ;;  %v1573_v52 = vadd.f32 %v1509_v46, %v1445_v49  ;;  %v1411_v53 = vmax.f32 %v1347_v50, 0.0 }
 0x264   : > { %v1443_v55 = vmax.f32 %v1379_v24, 0.0 }
 0x265   : > { %1605 = vst.msk [vmem:[%s2498_s22 + $0xf8] sm:$0xff] %vm399_vm1, %v1541_v51  ;;  %1637 = vst.msk [vmem:[%s2498_s22 + $0x1f8] sm:$0xff] %vm399_vm1, %v1573_v52  ;;  %v1539_v56 = vadd.f32 %v1475_v47, %v1411_v53 }
 0x266   : > { %v1571_v57 = vadd.f32 %v1507_v32, %v1443_v55 }
 0x267   : > { %1603 = vst.msk [vmem:[%s2498_s22 + $0xe8] sm:$0xff] %vm399_vm1, %v1539_v56 }
 0x268   : > { %1635 = vst.msk [vmem:[%s2498_s22 + $0x1e8] sm:$0xff] %vm399_vm1, %v1571_v57 }
 0x269 PF: > { %s18_s9 = sadd.s32 1, %s2202_s9   ;;  %s2834_s27 = smov %s2194_s29 }
 0x26a   : > { %p15_p7 = scmp.ge.s32.totalorder %s18_s9, 6   ;;  %s2835_s28 = smov %s2198_s30 }
 0x26b   : > { %s2836_s29 = smov %s2839_s10  ;;  %s2837_s30 = smov %s2843_s11 }
 0x26c   :  { %17 = sbr.rel (!%p15_p7) target bundleno = 3 (0x3), region = 88 }

</bundles_post_ra>
